<compile_context>
chip_gen: v6e
topology: v6e:2x2x1
jax: 0.10.0
libtpu: 0.0.40
codegen_flags: <defaults>
</compile_context>

<pallas_src>
import functools
import math

import jax
import jax.numpy as jnp
from jax import lax
from jax.experimental import pallas as pl
from jax.experimental.pallas import tpu as pltpu

CP = 128  # padded channel width (lane dimension)


# ------------------------------ fused kernel ------------------------------- #

def resnet_kernel(x_ref, w1_ref, w2_ref, ws_ref, bias_ref, wf_ref, o_ref,
                  *, seq_len, tile_b, proj_blocks):
    n_rows = tile_b * seq_len
    x = x_ref[...].astype(jnp.float32)            # (N, 128); input stored as bf16
    btab = bias_ref[...]                          # (16, 128) f32 bias table

    # Boundary masks: batch is flattened into sublanes, so the conv halo must be
    # zeroed at sample boundaries.  (N, 1) 0/1 float columns, broadcast at use.
    pos = lax.broadcasted_iota(jnp.int32, (n_rows, 1), 0) % seq_len
    not_first = (pos != 0).astype(jnp.float32)
    not_last = (pos != seq_len - 1).astype(jnp.float32)

    def conv3(h, wref, i):
        # Conv1d(k=3, stride=1, padding=1): 3 accumulating K=128 bf16 matmuls
        # reading the shifted taps in place (no (N, 384) concat temporary).
        h_prev = pltpu.roll(h, 1, 0) * not_first               # h[l-1]
        h_next = pltpu.roll(h, n_rows - 1, 0) * not_last       # h[l+1]
        acc = jnp.dot(h_prev.astype(jnp.bfloat16), wref[i, 0],
                      preferred_element_type=jnp.float32)
        acc = acc + jnp.dot(h.astype(jnp.bfloat16), wref[i, 1],
                            preferred_element_type=jnp.float32)
        acc = acc + jnp.dot(h_next.astype(jnp.bfloat16), wref[i, 2],
                            preferred_element_type=jnp.float32)
        return acc

    # 6 residual blocks, statically unrolled (weight indices are static).
    proj = {b: j for j, b in enumerate(proj_blocks)}
    for i in range(6):
        h = jnp.maximum(conv3(x, w1_ref, i) + btab[i:i + 1], 0.0)   # conv1/bn1/relu
        h = conv3(h, w2_ref, i) + btab[6 + i:7 + i]                 # conv2/bn2
        if i in proj:                                               # 1x1 conv + bn
            j = proj[i]
            sc = (jnp.dot(x.astype(jnp.bfloat16), ws_ref[j],
                          preferred_element_type=jnp.float32)
                  + btab[12 + j:13 + j])
        else:                                                       # identity
            sc = x
        x = jnp.maximum(h + sc, 0.0)

    # Head: AdaptiveAvgPool1d(1) as a sublane reduction over L, then fc against a
    # lane-padded (128, 128) bf16 weight; logits live in lanes [:num_classes].
    pooled = jnp.mean(x.reshape(tile_b, seq_len, CP), axis=1)       # (TILE_B, 128)
    logits = (jnp.dot(pooled.astype(jnp.bfloat16), wf_ref[...],
                      preferred_element_type=jnp.float32) + btab[14:15])
    o_ref[0] = logits.astype(o_ref.dtype)


# -------------------------------- wrapper ----------------------------------- #

def _choose_tile_b(batch, seq_len, target_rows=512):
    """Pick samples-per-tile so rows/tile ~ target and rows % 8 == 0."""
    step = 8 // math.gcd(seq_len, 8)              # granularity for rows % 8 == 0
    tile_b = max(step, (target_rows // max(seq_len, 1)) // step * step)
    batch_ceil = -(-batch // step) * step
    return max(step, min(tile_b, batch_ceil))


def resnet_forward(x, packed, tile_b=None):
    B, L, cin = x.shape
    num_classes = packed["num_classes"]
    proj_blocks = packed["proj_blocks"]
    nproj = packed["ws"].shape[0]

    step = 8 // math.gcd(L, 8)
    if tile_b is None:
        tile_b = _choose_tile_b(B, L)
    tile_b = -(-tile_b // step) * step            # enforce rows_tile % 8 == 0
    num_tiles = -(-B // tile_b)
    b_pad = num_tiles * tile_b
    rows_tile = tile_b * L

    # channels-last activation, batch flattened into sublanes, lanes padded to 128,
    # stored bf16 (matmul operand dtype) to halve activation HBM traffic.
    xp = jnp.zeros((b_pad * L, CP), jnp.bfloat16)
    xp = xp.at[:B * L, :cin].set(x.reshape(B * L, cin).astype(jnp.bfloat16))

    kernel = functools.partial(resnet_kernel, seq_len=L, tile_b=tile_b,
                               proj_blocks=proj_blocks)

    n_rows_total = b_pad * L
    flops = (n_rows_total * (12 * 3 * 2 * CP * CP + nproj * 2 * CP * CP)
             + b_pad * 2 * CP * CP)
    bytes_accessed = (2 * xp.size
                      + 2 * (packed["w1"].size + packed["w2"].size
                             + packed["ws"].size + packed["wf"].size)
                      + 4 * packed["bias"].size
                      + 4 * num_tiles * tile_b * CP)

    out = pl.pallas_call(
        kernel,
        out_shape=jax.ShapeDtypeStruct((num_tiles, tile_b, CP), jnp.float32),
        grid=(num_tiles,),
        in_specs=[
            pl.BlockSpec((rows_tile, CP), lambda i: (i, 0)),        # activations
            pl.BlockSpec((6, 3, CP, CP), lambda i: (0, 0, 0, 0)),   # conv1 weights
            pl.BlockSpec((6, 3, CP, CP), lambda i: (0, 0, 0, 0)),   # conv2 weights
            pl.BlockSpec((nproj, CP, CP), lambda i: (0, 0, 0)),     # shortcut weights
            pl.BlockSpec((16, CP), lambda i: (0, 0)),               # bias table
            pl.BlockSpec((CP, CP), lambda i: (0, 0)),               # fc weight
        ],
        out_specs=pl.BlockSpec((1, tile_b, CP), lambda i: (i, 0, 0)),
        compiler_params=pltpu.CompilerParams(
            dimension_semantics=("parallel",),
            vmem_limit_bytes=48 * 1024 * 1024),
        cost_estimate=pl.CostEstimate(flops=int(flops), transcendentals=0,
                                      bytes_accessed=int(bytes_accessed)),
    )(xp, packed["w1"], packed["w2"], packed["ws"], packed["bias"], packed["wf"])

    return out.reshape(b_pad, CP)[:B, :num_classes]


# --------------------------- parameter building ---------------------------- #

def _fold_bn(w, b, gamma, beta, mean, var, eps=1e-5):
    """Fold eval-mode BatchNorm1d into a PyTorch-layout Conv1d weight (Cout, Cin, K)."""
    s = gamma / jnp.sqrt(var + eps)
    wf = jnp.transpose(w, (2, 1, 0)) * s[None, None, :]            # (K, Cin, Cout)
    bf = (b - mean) * s + beta
    return wf.astype(jnp.float32), bf.reshape(1, -1).astype(jnp.float32)


def make_block_params(key, cin, cout):
    ks = jax.random.split(key, 16)
    nrm = lambda k, shape, scale=0.1: scale * jax.random.normal(k, shape, jnp.float32)
    # conv1 + bn1
    w1, b1 = nrm(ks[0], (cout, cin, 3)), nrm(ks[1], (cout,))
    g1, be1 = 1.0 + nrm(ks[2], (cout,)), nrm(ks[3], (cout,))
    m1, v1 = nrm(ks[4], (cout,)), 1.0 + jnp.abs(nrm(ks[5], (cout,)))
    W1, B1 = _fold_bn(w1, b1, g1, be1, m1, v1)
    # conv2 + bn2
    w2, b2 = nrm(ks[6], (cout, cout, 3)), nrm(ks[7], (cout,))
    g2, be2 = 1.0 + nrm(ks[8], (cout,)), nrm(ks[9], (cout,))
    m2, v2 = nrm(ks[10], (cout,)), 1.0 + jnp.abs(nrm(ks[11], (cout,)))
    W2, B2 = _fold_bn(w2, b2, g2, be2, m2, v2)
    # shortcut (Conv1d 1x1 + BN when channels change, identity otherwise)
    if cin != cout:
        wsc, bsc = nrm(ks[12], (cout, cin, 1)), nrm(ks[13], (cout,))
        gsc, besc = 1.0 + nrm(ks[14], (cout,)), nrm(ks[15], (cout,))
        Wsk, Bs = _fold_bn(wsc, bsc, gsc, besc, jnp.zeros((cout,)), jnp.ones((cout,)))
        return (W1, B1, W2, B2, Wsk[0], Bs, True)      # Ws: (cin, cout)
    return (W1, B1, W2, B2, None, None, False)


def make_params(key, enc_in, num_classes):
    # layer1: enc_in->64, 64->64 ; layer2: 64->128, 128->128 ; layer3: 128->128 x2
    chans = [(enc_in, 64), (64, 64), (64, 128), (128, 128), (128, 128), (128, 128)]
    keys = jax.random.split(key, len(chans) + 2)
    blocks = [make_block_params(keys[i], ci, co) for i, (ci, co) in enumerate(chans)]
    wf = 0.1 * jax.random.normal(keys[-2], (128, num_classes), jnp.float32)
    bf = 0.1 * jax.random.normal(keys[-1], (1, num_classes), jnp.float32)
    return {"blocks": blocks, "wf": wf, "bf": bf}


def pack_params(params, num_classes):
    """Pack folded per-block weights into lane-padded bf16 stacks for the kernel."""
    blocks = params["blocks"]
    w1_list, w2_list, ws_list, proj_blocks = [], [], [], []
    btab = jnp.zeros((16, CP), jnp.float32)

    def pad_conv(W):  # (3, cin, cout) -> (3, 128, 128)
        _, ci, co = W.shape
        return jnp.zeros((3, CP, CP), jnp.float32).at[:, :ci, :co].set(W)

    for i, (W1, B1, W2, B2, Ws, Bs, has_proj) in enumerate(blocks):
        cout = W1.shape[2]
        w1_list.append(pad_conv(W1))
        w2_list.append(pad_conv(W2))
        btab = btab.at[i, :cout].set(B1[0])
        btab = btab.at[6 + i, :cout].set(B2[0])
        if has_proj:                                   # projection shortcut
            j = len(proj_blocks)
            proj_blocks.append(i)
            wsp = jnp.zeros((CP, CP), jnp.float32).at[:Ws.shape[0], :cout].set(Ws)
            ws_list.append(wsp)
            btab = btab.at[12 + j, :cout].set(Bs[0])
    if not ws_list:
        ws_list.append(jnp.zeros((CP, CP), jnp.float32))

    wf, bf = params["wf"], params["bf"]
    nc = wf.shape[1]
    wfp = jnp.zeros((CP, CP), jnp.float32).at[:, :nc].set(wf)
    btab = btab.at[14, :nc].set(bf[0])

    return {"w1": jnp.stack(w1_list).astype(jnp.bfloat16),
            "w2": jnp.stack(w2_list).astype(jnp.bfloat16),
            "ws": jnp.stack(ws_list).astype(jnp.bfloat16),
            "bias": btab,
            "wf": wfp.astype(jnp.bfloat16),
            "proj_blocks": tuple(proj_blocks),
            "num_classes": num_classes}


# ---------------------------- pure-JAX reference ---------------------------- #
# Mirrors the kernel numerics: bf16 matmul operands, f32 accumulation,
# f32 elementwise math.

def _mm(a, b):
    return jnp.dot(a.astype(jnp.bfloat16), b.astype(jnp.bfloat16),
                   preferred_element_type=jnp.float32)


def _conv3_ref(x, w, b):          # x: (B, L, Cin), w: (3, Cin, Cout)
    Bb, L, C = x.shape
    xp = jnp.pad(x, ((0, 0), (1, 1), (0, 0)))
    taps = (xp[:, :-2], xp[:, 1:-1], xp[:, 2:])
    out = sum(_mm(t.reshape(Bb * L, C), w[k]) for k, t in enumerate(taps))
    return out.reshape(Bb, L, -1) + b


def resnet_ref(x, params):
    out = x
    for (W1, B1, W2, B2, Ws, Bs, has_proj) in params["blocks"]:
        h = jnp.maximum(_conv3_ref(out, W1, B1), 0.0)
        h = _conv3_ref(h, W2, B2)
        if has_proj:
            Bb, L, C = out.shape
            sc = _mm(out.reshape(Bb * L, C), Ws).reshape(Bb, L, -1) + Bs
        else:
            sc = out
        out = jnp.maximum(h + sc, 0.0)
    pooled = jnp.mean(out, axis=1)                                  # (B, 128)
    return _mm(pooled, params["wf"]) + params["bf"]


# ----------------------------------- main ----------------------------------- #

if __name__ == "__main__":
    B, L, ENC_IN, NUM_CLASSES = 4, 16, 4, 5
    key = jax.random.PRNGKey(0)
    k_x, k_p = jax.random.split(key)
    x = jax.random.normal(k_x, (B, L, ENC_IN), jnp.float32)   # (batch, seq, enc_in)
    params = make_params(k_p, ENC_IN, NUM_CLASSES)
    packed = pack_params(params, NUM_CLASSES)

    # tile_b=2 -> 2 samples (32 rows) per grid step, grid=(2,) exercises the
    # batch-tiled pipeline; the default heuristic targets ~512 rows/step.
    out = jax.block_until_ready(resnet_forward(x, packed, tile_b=2))
    ref = jax.block_until_ready(resnet_ref(x, params))

    assert out.shape == (B, NUM_CLASSES), out.shape
    assert jnp.allclose(out, ref, atol=1e-2, rtol=1e-2), (out, ref)
    print("KERNEL_OK")
</pallas_src>

<mosaic_0001>
module attributes {stable_mosaic.version = 11 : i64} {
  func.func @resnet_kernel(%arg0: i32, %arg1: memref<32x128xbf16, #tpu.memory_space<vmem>>, %arg2: memref<6x3x128x128xbf16, #tpu.memory_space<vmem>>, %arg3: memref<6x3x128x128xbf16, #tpu.memory_space<vmem>>, %arg4: memref<2x128x128xbf16, #tpu.memory_space<vmem>>, %arg5: memref<16x128xf32, #tpu.memory_space<vmem>>, %arg6: memref<128x128xbf16, #tpu.memory_space<vmem>>, %arg7: memref<1x2x128xf32, #tpu.memory_space<vmem>>) attributes {dimension_semantics = [#tpu.dimension_semantics<parallel>], iteration_bounds = array<i64: 2>, scalar_prefetch = 0 : i64, scratch_operands = 0 : i64, tpu.core_type = #tpu.core_type<tc>, window_params = [{transform_indices = @transform_0, window_bounds = array<i64: 32, 128>}, {pipeline_mode = #tpu.pipeline_mode<synchronous>, transform_indices = @transform_1, window_bounds = array<i64: 6, 3, 128, 128>}, {pipeline_mode = #tpu.pipeline_mode<synchronous>, transform_indices = @transform_2, window_bounds = array<i64: 6, 3, 128, 128>}, {pipeline_mode = #tpu.pipeline_mode<synchronous>, transform_indices = @transform_3, window_bounds = array<i64: 2, 128, 128>}, {pipeline_mode = #tpu.pipeline_mode<synchronous>, transform_indices = @transform_4, window_bounds = array<i64: 16, 128>}, {pipeline_mode = #tpu.pipeline_mode<synchronous>, transform_indices = @transform_5, window_bounds = array<i64: 128, 128>}, {transform_indices = @transform_6, window_bounds = array<i64: 1, 2, 128>}]} {
    %c0 = arith.constant 0 : index
    %c0_0 = arith.constant 0 : index
    %0 = vector.load %arg1[%c0, %c0_0] : memref<32x128xbf16, #tpu.memory_space<vmem>>, vector<32x128xbf16>
    %1 = arith.extf %0 : vector<32x128xbf16> to vector<32x128xf32>
    %c0_1 = arith.constant 0 : index
    %c0_2 = arith.constant 0 : index
    %2 = vector.load %arg5[%c0_1, %c0_2] : memref<16x128xf32, #tpu.memory_space<vmem>>, vector<16x128xf32>
    %3 = tpu.iota {dimensions = array<i32: 0>} : vector<32x1xi32>
    %c16_i32 = arith.constant 16 : i32
    %c0_i32 = arith.constant 0 : i32
    %4 = arith.cmpi eq, %c16_i32, %c0_i32 : i32
    %c1_i32 = arith.constant 1 : i32
    %5 = arith.select %4, %c1_i32, %c16_i32 : i32
    %6 = vector.broadcast %5 : i32 to vector<32x1xi32>
    %7 = arith.remsi %3, %6 : vector<32x1xi32>
    %c0_i32_3 = arith.constant 0 : i32
    %8 = vector.broadcast %c0_i32_3 : i32 to vector<32x1xi32>
    %9 = arith.cmpi ne, %7, %8 : vector<32x1xi32>
    %c0_i32_4 = arith.constant 0 : i32
    %10 = vector.broadcast %c0_i32_4 : i32 to vector<32x1xi32>
    %11 = arith.cmpi slt, %7, %10 : vector<32x1xi32>
    %c0_i32_5 = arith.constant 0 : i32
    %12 = arith.cmpi slt, %5, %c0_i32_5 : i32
    %13 = vector.broadcast %12 : i1 to vector<32x1xi1>
    %14 = vector.broadcast %13 : vector<32x1xi1> to vector<32x1xi1>
    %15 = arith.xori %11, %14 : vector<32x1xi1>
    %16 = arith.andi %15, %9 : vector<32x1xi1>
    %17 = vector.broadcast %5 : i32 to vector<32x1xi32>
    %18 = arith.addi %7, %17 : vector<32x1xi32>
    %19 = arith.select %16, %18, %7 : vector<32x1xi1>, vector<32x1xi32>
    %c0_i32_6 = arith.constant 0 : i32
    %20 = vector.broadcast %c0_i32_6 : i32 to vector<32x1xi32>
    %21 = arith.cmpi ne, %19, %20 : vector<32x1xi32>
    %22 = arith.extui %21 : vector<32x1xi1> to vector<32x1xi32>
    %23 = arith.sitofp %22 : vector<32x1xi32> to vector<32x1xf32>
    %c15_i32 = arith.constant 15 : i32
    %24 = vector.broadcast %c15_i32 : i32 to vector<32x1xi32>
    %25 = arith.cmpi ne, %19, %24 : vector<32x1xi32>
    %26 = arith.extui %25 : vector<32x1xi1> to vector<32x1xi32>
    %27 = arith.sitofp %26 : vector<32x1xi32> to vector<32x1xf32>
    %c1_i32_7 = arith.constant 1 : i32
    %28 = tpu.dynamic_rotate %1 by %c1_i32_7 dim 0 : vector<32x128xf32>, i32 -> vector<32x128xf32>
    %29 = vector.broadcast %23 : vector<32x1xf32> to vector<32x128xf32>
    %30 = arith.mulf %28, %29 : vector<32x128xf32>
    %c31_i32 = arith.constant 31 : i32
    %31 = tpu.dynamic_rotate %1 by %c31_i32 dim 0 : vector<32x128xf32>, i32 -> vector<32x128xf32>
    %32 = vector.broadcast %27 : vector<32x1xf32> to vector<32x128xf32>
    %33 = arith.mulf %31, %32 : vector<32x128xf32>
    %34 = arith.truncf %30 : vector<32x128xf32> to vector<32x128xbf16>
    %c0_8 = arith.constant 0 : index
    %c0_9 = arith.constant 0 : index
    %c0_10 = arith.constant 0 : index
    %c0_11 = arith.constant 0 : index
    %35 = vector.load %arg2[%c0_8, %c0_9, %c0_10, %c0_11] : memref<6x3x128x128xbf16, #tpu.memory_space<vmem>>, vector<1x1x128x128xbf16>
    %36 = vector.shape_cast %35 : vector<1x1x128x128xbf16> to vector<128x128xbf16>
    %cst = arith.constant dense<0.000000e+00> : vector<32x128xf32>
    %37 = tpu.matmul %34, %36, %cst {dimension_numbers = #tpu.dot_dimension_numbers<[1], [0], [0], [1], [0, 0, 1, 1], [], []>} : vector<32x128xbf16>, vector<128x128xbf16>, vector<32x128xf32> -> vector<32x128xf32>
    %38 = arith.truncf %1 : vector<32x128xf32> to vector<32x128xbf16>
    %c0_12 = arith.constant 0 : index
    %c1 = arith.constant 1 : index
    %c0_13 = arith.constant 0 : index
    %c0_14 = arith.constant 0 : index
    %39 = vector.load %arg2[%c0_12, %c1, %c0_13, %c0_14] : memref<6x3x128x128xbf16, #tpu.memory_space<vmem>>, vector<1x1x128x128xbf16>
    %40 = vector.shape_cast %39 : vector<1x1x128x128xbf16> to vector<128x128xbf16>
    %cst_15 = arith.constant dense<0.000000e+00> : vector<32x128xf32>
    %41 = tpu.matmul %38, %40, %cst_15 {dimension_numbers = #tpu.dot_dimension_numbers<[1], [0], [0], [1], [0, 0, 1, 1], [], []>} : vector<32x128xbf16>, vector<128x128xbf16>, vector<32x128xf32> -> vector<32x128xf32>
    %42 = arith.addf %37, %41 : vector<32x128xf32>
    %43 = arith.truncf %33 : vector<32x128xf32> to vector<32x128xbf16>
    %c0_16 = arith.constant 0 : index
    %c2 = arith.constant 2 : index
    %c0_17 = arith.constant 0 : index
    %c0_18 = arith.constant 0 : index
    %44 = vector.load %arg2[%c0_16, %c2, %c0_17, %c0_18] : memref<6x3x128x128xbf16, #tpu.memory_space<vmem>>, vector<1x1x128x128xbf16>
    %45 = vector.shape_cast %44 : vector<1x1x128x128xbf16> to vector<128x128xbf16>
    %cst_19 = arith.constant dense<0.000000e+00> : vector<32x128xf32>
    %46 = tpu.matmul %43, %45, %cst_19 {dimension_numbers = #tpu.dot_dimension_numbers<[1], [0], [0], [1], [0, 0, 1, 1], [], []>} : vector<32x128xbf16>, vector<128x128xbf16>, vector<32x128xf32> -> vector<32x128xf32>
    %47 = arith.addf %42, %46 : vector<32x128xf32>
    %48 = vector.extract_strided_slice %2 {offsets = [0, 0], sizes = [1, 128], strides = [1, 1]} : vector<16x128xf32> to vector<1x128xf32>
    %49 = vector.broadcast %48 : vector<1x128xf32> to vector<32x128xf32>
    %50 = arith.addf %47, %49 : vector<32x128xf32>
    %cst_20 = arith.constant 0.000000e+00 : f32
    %51 = vector.broadcast %cst_20 : f32 to vector<32x128xf32>
    %52 = arith.maximumf %50, %51 : vector<32x128xf32>
    %c1_i32_21 = arith.constant 1 : i32
    %53 = tpu.dynamic_rotate %52 by %c1_i32_21 dim 0 : vector<32x128xf32>, i32 -> vector<32x128xf32>
    %54 = vector.broadcast %23 : vector<32x1xf32> to vector<32x128xf32>
    %55 = arith.mulf %53, %54 : vector<32x128xf32>
    %c31_i32_22 = arith.constant 31 : i32
    %56 = tpu.dynamic_rotate %52 by %c31_i32_22 dim 0 : vector<32x128xf32>, i32 -> vector<32x128xf32>
    %57 = vector.broadcast %27 : vector<32x1xf32> to vector<32x128xf32>
    %58 = arith.mulf %56, %57 : vector<32x128xf32>
    %59 = arith.truncf %55 : vector<32x128xf32> to vector<32x128xbf16>
    %c0_23 = arith.constant 0 : index
    %c0_24 = arith.constant 0 : index
    %c0_25 = arith.constant 0 : index
    %c0_26 = arith.constant 0 : index
    %60 = vector.load %arg3[%c0_23, %c0_24, %c0_25, %c0_26] : memref<6x3x128x128xbf16, #tpu.memory_space<vmem>>, vector<1x1x128x128xbf16>
    %61 = vector.shape_cast %60 : vector<1x1x128x128xbf16> to vector<128x128xbf16>
    %cst_27 = arith.constant dense<0.000000e+00> : vector<32x128xf32>
    %62 = tpu.matmul %59, %61, %cst_27 {dimension_numbers = #tpu.dot_dimension_numbers<[1], [0], [0], [1], [0, 0, 1, 1], [], []>} : vector<32x128xbf16>, vector<128x128xbf16>, vector<32x128xf32> -> vector<32x128xf32>
    %63 = arith.truncf %52 : vector<32x128xf32> to vector<32x128xbf16>
    %c0_28 = arith.constant 0 : index
    %c1_29 = arith.constant 1 : index
    %c0_30 = arith.constant 0 : index
    %c0_31 = arith.constant 0 : index
    %64 = vector.load %arg3[%c0_28, %c1_29, %c0_30, %c0_31] : memref<6x3x128x128xbf16, #tpu.memory_space<vmem>>, vector<1x1x128x128xbf16>
    %65 = vector.shape_cast %64 : vector<1x1x128x128xbf16> to vector<128x128xbf16>
    %cst_32 = arith.constant dense<0.000000e+00> : vector<32x128xf32>
    %66 = tpu.matmul %63, %65, %cst_32 {dimension_numbers = #tpu.dot_dimension_numbers<[1], [0], [0], [1], [0, 0, 1, 1], [], []>} : vector<32x128xbf16>, vector<128x128xbf16>, vector<32x128xf32> -> vector<32x128xf32>
    %67 = arith.addf %62, %66 : vector<32x128xf32>
    %68 = arith.truncf %58 : vector<32x128xf32> to vector<32x128xbf16>
    %c0_33 = arith.constant 0 : index
    %c2_34 = arith.constant 2 : index
    %c0_35 = arith.constant 0 : index
    %c0_36 = arith.constant 0 : index
    %69 = vector.load %arg3[%c0_33, %c2_34, %c0_35, %c0_36] : memref<6x3x128x128xbf16, #tpu.memory_space<vmem>>, vector<1x1x128x128xbf16>
    %70 = vector.shape_cast %69 : vector<1x1x128x128xbf16> to vector<128x128xbf16>
    %cst_37 = arith.constant dense<0.000000e+00> : vector<32x128xf32>
    %71 = tpu.matmul %68, %70, %cst_37 {dimension_numbers = #tpu.dot_dimension_numbers<[1], [0], [0], [1], [0, 0, 1, 1], [], []>} : vector<32x128xbf16>, vector<128x128xbf16>, vector<32x128xf32> -> vector<32x128xf32>
    %72 = arith.addf %67, %71 : vector<32x128xf32>
    %73 = vector.extract_strided_slice %2 {offsets = [6, 0], sizes = [1, 128], strides = [1, 1]} : vector<16x128xf32> to vector<1x128xf32>
    %74 = vector.broadcast %73 : vector<1x128xf32> to vector<32x128xf32>
    %75 = arith.addf %72, %74 : vector<32x128xf32>
    %76 = arith.truncf %1 : vector<32x128xf32> to vector<32x128xbf16>
    %c0_38 = arith.constant 0 : index
    %c0_39 = arith.constant 0 : index
    %c0_40 = arith.constant 0 : index
    %77 = vector.load %arg4[%c0_38, %c0_39, %c0_40] : memref<2x128x128xbf16, #tpu.memory_space<vmem>>, vector<1x128x128xbf16>
    %78 = vector.shape_cast %77 : vector<1x128x128xbf16> to vector<128x128xbf16>
    %cst_41 = arith.constant dense<0.000000e+00> : vector<32x128xf32>
    %79 = tpu.matmul %76, %78, %cst_41 {dimension_numbers = #tpu.dot_dimension_numbers<[1], [0], [0], [1], [0, 0, 1, 1], [], []>} : vector<32x128xbf16>, vector<128x128xbf16>, vector<32x128xf32> -> vector<32x128xf32>
    %80 = vector.extract_strided_slice %2 {offsets = [12, 0], sizes = [1, 128], strides = [1, 1]} : vector<16x128xf32> to vector<1x128xf32>
    %81 = vector.broadcast %80 : vector<1x128xf32> to vector<32x128xf32>
    %82 = arith.addf %79, %81 : vector<32x128xf32>
    %83 = arith.addf %75, %82 : vector<32x128xf32>
    %cst_42 = arith.constant 0.000000e+00 : f32
    %84 = vector.broadcast %cst_42 : f32 to vector<32x128xf32>
    %85 = arith.maximumf %83, %84 : vector<32x128xf32>
    %c1_i32_43 = arith.constant 1 : i32
    %86 = tpu.dynamic_rotate %85 by %c1_i32_43 dim 0 : vector<32x128xf32>, i32 -> vector<32x128xf32>
    %87 = vector.broadcast %23 : vector<32x1xf32> to vector<32x128xf32>
    %88 = arith.mulf %86, %87 : vector<32x128xf32>
    %c31_i32_44 = arith.constant 31 : i32
    %89 = tpu.dynamic_rotate %85 by %c31_i32_44 dim 0 : vector<32x128xf32>, i32 -> vector<32x128xf32>
    %90 = vector.broadcast %27 : vector<32x1xf32> to vector<32x128xf32>
    %91 = arith.mulf %89, %90 : vector<32x128xf32>
    %92 = arith.truncf %88 : vector<32x128xf32> to vector<32x128xbf16>
    %c1_45 = arith.constant 1 : index
    %c0_46 = arith.constant 0 : index
    %c0_47 = arith.constant 0 : index
    %c0_48 = arith.constant 0 : index
    %93 = vector.load %arg2[%c1_45, %c0_46, %c0_47, %c0_48] : memref<6x3x128x128xbf16, #tpu.memory_space<vmem>>, vector<1x1x128x128xbf16>
    %94 = vector.shape_cast %93 : vector<1x1x128x128xbf16> to vector<128x128xbf16>
    %cst_49 = arith.constant dense<0.000000e+00> : vector<32x128xf32>
    %95 = tpu.matmul %92, %94, %cst_49 {dimension_numbers = #tpu.dot_dimension_numbers<[1], [0], [0], [1], [0, 0, 1, 1], [], []>} : vector<32x128xbf16>, vector<128x128xbf16>, vector<32x128xf32> -> vector<32x128xf32>
    %96 = arith.truncf %85 : vector<32x128xf32> to vector<32x128xbf16>
    %c1_50 = arith.constant 1 : index
    %c1_51 = arith.constant 1 : index
    %c0_52 = arith.constant 0 : index
    %c0_53 = arith.constant 0 : index
    %97 = vector.load %arg2[%c1_50, %c1_51, %c0_52, %c0_53] : memref<6x3x128x128xbf16, #tpu.memory_space<vmem>>, vector<1x1x128x128xbf16>
    %98 = vector.shape_cast %97 : vector<1x1x128x128xbf16> to vector<128x128xbf16>
    %cst_54 = arith.constant dense<0.000000e+00> : vector<32x128xf32>
    %99 = tpu.matmul %96, %98, %cst_54 {dimension_numbers = #tpu.dot_dimension_numbers<[1], [0], [0], [1], [0, 0, 1, 1], [], []>} : vector<32x128xbf16>, vector<128x128xbf16>, vector<32x128xf32> -> vector<32x128xf32>
    %100 = arith.addf %95, %99 : vector<32x128xf32>
    %101 = arith.truncf %91 : vector<32x128xf32> to vector<32x128xbf16>
    %c1_55 = arith.constant 1 : index
    %c2_56 = arith.constant 2 : index
    %c0_57 = arith.constant 0 : index
    %c0_58 = arith.constant 0 : index
    %102 = vector.load %arg2[%c1_55, %c2_56, %c0_57, %c0_58] : memref<6x3x128x128xbf16, #tpu.memory_space<vmem>>, vector<1x1x128x128xbf16>
    %103 = vector.shape_cast %102 : vector<1x1x128x128xbf16> to vector<128x128xbf16>
    %cst_59 = arith.constant dense<0.000000e+00> : vector<32x128xf32>
    %104 = tpu.matmul %101, %103, %cst_59 {dimension_numbers = #tpu.dot_dimension_numbers<[1], [0], [0], [1], [0, 0, 1, 1], [], []>} : vector<32x128xbf16>, vector<128x128xbf16>, vector<32x128xf32> -> vector<32x128xf32>
    %105 = arith.addf %100, %104 : vector<32x128xf32>
    %106 = vector.extract_strided_slice %2 {offsets = [1, 0], sizes = [1, 128], strides = [1, 1]} : vector<16x128xf32> to vector<1x128xf32>
    %107 = vector.broadcast %106 : vector<1x128xf32> to vector<32x128xf32>
    %108 = arith.addf %105, %107 : vector<32x128xf32>
    %cst_60 = arith.constant 0.000000e+00 : f32
    %109 = vector.broadcast %cst_60 : f32 to vector<32x128xf32>
    %110 = arith.maximumf %108, %109 : vector<32x128xf32>
    %c1_i32_61 = arith.constant 1 : i32
    %111 = tpu.dynamic_rotate %110 by %c1_i32_61 dim 0 : vector<32x128xf32>, i32 -> vector<32x128xf32>
    %112 = vector.broadcast %23 : vector<32x1xf32> to vector<32x128xf32>
    %113 = arith.mulf %111, %112 : vector<32x128xf32>
    %c31_i32_62 = arith.constant 31 : i32
    %114 = tpu.dynamic_rotate %110 by %c31_i32_62 dim 0 : vector<32x128xf32>, i32 -> vector<32x128xf32>
    %115 = vector.broadcast %27 : vector<32x1xf32> to vector<32x128xf32>
    %116 = arith.mulf %114, %115 : vector<32x128xf32>
    %117 = arith.truncf %113 : vector<32x128xf32> to vector<32x128xbf16>
    %c1_63 = arith.constant 1 : index
    %c0_64 = arith.constant 0 : index
    %c0_65 = arith.constant 0 : index
    %c0_66 = arith.constant 0 : index
    %118 = vector.load %arg3[%c1_63, %c0_64, %c0_65, %c0_66] : memref<6x3x128x128xbf16, #tpu.memory_space<vmem>>, vector<1x1x128x128xbf16>
    %119 = vector.shape_cast %118 : vector<1x1x128x128xbf16> to vector<128x128xbf16>
    %cst_67 = arith.constant dense<0.000000e+00> : vector<32x128xf32>
    %120 = tpu.matmul %117, %119, %cst_67 {dimension_numbers = #tpu.dot_dimension_numbers<[1], [0], [0], [1], [0, 0, 1, 1], [], []>} : vector<32x128xbf16>, vector<128x128xbf16>, vector<32x128xf32> -> vector<32x128xf32>
    %121 = arith.truncf %110 : vector<32x128xf32> to vector<32x128xbf16>
    %c1_68 = arith.constant 1 : index
    %c1_69 = arith.constant 1 : index
    %c0_70 = arith.constant 0 : index
    %c0_71 = arith.constant 0 : index
    %122 = vector.load %arg3[%c1_68, %c1_69, %c0_70, %c0_71] : memref<6x3x128x128xbf16, #tpu.memory_space<vmem>>, vector<1x1x128x128xbf16>
    %123 = vector.shape_cast %122 : vector<1x1x128x128xbf16> to vector<128x128xbf16>
    %cst_72 = arith.constant dense<0.000000e+00> : vector<32x128xf32>
    %124 = tpu.matmul %121, %123, %cst_72 {dimension_numbers = #tpu.dot_dimension_numbers<[1], [0], [0], [1], [0, 0, 1, 1], [], []>} : vector<32x128xbf16>, vector<128x128xbf16>, vector<32x128xf32> -> vector<32x128xf32>
    %125 = arith.addf %120, %124 : vector<32x128xf32>
    %126 = arith.truncf %116 : vector<32x128xf32> to vector<32x128xbf16>
    %c1_73 = arith.constant 1 : index
    %c2_74 = arith.constant 2 : index
    %c0_75 = arith.constant 0 : index
    %c0_76 = arith.constant 0 : index
    %127 = vector.load %arg3[%c1_73, %c2_74, %c0_75, %c0_76] : memref<6x3x128x128xbf16, #tpu.memory_space<vmem>>, vector<1x1x128x128xbf16>
    %128 = vector.shape_cast %127 : vector<1x1x128x128xbf16> to vector<128x128xbf16>
    %cst_77 = arith.constant dense<0.000000e+00> : vector<32x128xf32>
    %129 = tpu.matmul %126, %128, %cst_77 {dimension_numbers = #tpu.dot_dimension_numbers<[1], [0], [0], [1], [0, 0, 1, 1], [], []>} : vector<32x128xbf16>, vector<128x128xbf16>, vector<32x128xf32> -> vector<32x128xf32>
    %130 = arith.addf %125, %129 : vector<32x128xf32>
    %131 = vector.extract_strided_slice %2 {offsets = [7, 0], sizes = [1, 128], strides = [1, 1]} : vector<16x128xf32> to vector<1x128xf32>
    %132 = vector.broadcast %131 : vector<1x128xf32> to vector<32x128xf32>
    %133 = arith.addf %130, %132 : vector<32x128xf32>
    %134 = arith.addf %133, %85 : vector<32x128xf32>
    %cst_78 = arith.constant 0.000000e+00 : f32
    %135 = vector.broadcast %cst_78 : f32 to vector<32x128xf32>
    %136 = arith.maximumf %134, %135 : vector<32x128xf32>
    %c1_i32_79 = arith.constant 1 : i32
    %137 = tpu.dynamic_rotate %136 by %c1_i32_79 dim 0 : vector<32x128xf32>, i32 -> vector<32x128xf32>
    %138 = vector.broadcast %23 : vector<32x1xf32> to vector<32x128xf32>
    %139 = arith.mulf %137, %138 : vector<32x128xf32>
    %c31_i32_80 = arith.constant 31 : i32
    %140 = tpu.dynamic_rotate %136 by %c31_i32_80 dim 0 : vector<32x128xf32>, i32 -> vector<32x128xf32>
    %141 = vector.broadcast %27 : vector<32x1xf32> to vector<32x128xf32>
    %142 = arith.mulf %140, %141 : vector<32x128xf32>
    %143 = arith.truncf %139 : vector<32x128xf32> to vector<32x128xbf16>
    %c2_81 = arith.constant 2 : index
    %c0_82 = arith.constant 0 : index
    %c0_83 = arith.constant 0 : index
    %c0_84 = arith.constant 0 : index
    %144 = vector.load %arg2[%c2_81, %c0_82, %c0_83, %c0_84] : memref<6x3x128x128xbf16, #tpu.memory_space<vmem>>, vector<1x1x128x128xbf16>
    %145 = vector.shape_cast %144 : vector<1x1x128x128xbf16> to vector<128x128xbf16>
    %cst_85 = arith.constant dense<0.000000e+00> : vector<32x128xf32>
    %146 = tpu.matmul %143, %145, %cst_85 {dimension_numbers = #tpu.dot_dimension_numbers<[1], [0], [0], [1], [0, 0, 1, 1], [], []>} : vector<32x128xbf16>, vector<128x128xbf16>, vector<32x128xf32> -> vector<32x128xf32>
    %147 = arith.truncf %136 : vector<32x128xf32> to vector<32x128xbf16>
    %c2_86 = arith.constant 2 : index
    %c1_87 = arith.constant 1 : index
    %c0_88 = arith.constant 0 : index
    %c0_89 = arith.constant 0 : index
    %148 = vector.load %arg2[%c2_86, %c1_87, %c0_88, %c0_89] : memref<6x3x128x128xbf16, #tpu.memory_space<vmem>>, vector<1x1x128x128xbf16>
    %149 = vector.shape_cast %148 : vector<1x1x128x128xbf16> to vector<128x128xbf16>
    %cst_90 = arith.constant dense<0.000000e+00> : vector<32x128xf32>
    %150 = tpu.matmul %147, %149, %cst_90 {dimension_numbers = #tpu.dot_dimension_numbers<[1], [0], [0], [1], [0, 0, 1, 1], [], []>} : vector<32x128xbf16>, vector<128x128xbf16>, vector<32x128xf32> -> vector<32x128xf32>
    %151 = arith.addf %146, %150 : vector<32x128xf32>
    %152 = arith.truncf %142 : vector<32x128xf32> to vector<32x128xbf16>
    %c2_91 = arith.constant 2 : index
    %c2_92 = arith.constant 2 : index
    %c0_93 = arith.constant 0 : index
    %c0_94 = arith.constant 0 : index
    %153 = vector.load %arg2[%c2_91, %c2_92, %c0_93, %c0_94] : memref<6x3x128x128xbf16, #tpu.memory_space<vmem>>, vector<1x1x128x128xbf16>
    %154 = vector.shape_cast %153 : vector<1x1x128x128xbf16> to vector<128x128xbf16>
    %cst_95 = arith.constant dense<0.000000e+00> : vector<32x128xf32>
    %155 = tpu.matmul %152, %154, %cst_95 {dimension_numbers = #tpu.dot_dimension_numbers<[1], [0], [0], [1], [0, 0, 1, 1], [], []>} : vector<32x128xbf16>, vector<128x128xbf16>, vector<32x128xf32> -> vector<32x128xf32>
    %156 = arith.addf %151, %155 : vector<32x128xf32>
    %157 = vector.extract_strided_slice %2 {offsets = [2, 0], sizes = [1, 128], strides = [1, 1]} : vector<16x128xf32> to vector<1x128xf32>
    %158 = vector.broadcast %157 : vector<1x128xf32> to vector<32x128xf32>
    %159 = arith.addf %156, %158 : vector<32x128xf32>
    %cst_96 = arith.constant 0.000000e+00 : f32
    %160 = vector.broadcast %cst_96 : f32 to vector<32x128xf32>
    %161 = arith.maximumf %159, %160 : vector<32x128xf32>
    %c1_i32_97 = arith.constant 1 : i32
    %162 = tpu.dynamic_rotate %161 by %c1_i32_97 dim 0 : vector<32x128xf32>, i32 -> vector<32x128xf32>
    %163 = vector.broadcast %23 : vector<32x1xf32> to vector<32x128xf32>
    %164 = arith.mulf %162, %163 : vector<32x128xf32>
    %c31_i32_98 = arith.constant 31 : i32
    %165 = tpu.dynamic_rotate %161 by %c31_i32_98 dim 0 : vector<32x128xf32>, i32 -> vector<32x128xf32>
    %166 = vector.broadcast %27 : vector<32x1xf32> to vector<32x128xf32>
    %167 = arith.mulf %165, %166 : vector<32x128xf32>
    %168 = arith.truncf %164 : vector<32x128xf32> to vector<32x128xbf16>
    %c2_99 = arith.constant 2 : index
    %c0_100 = arith.constant 0 : index
    %c0_101 = arith.constant 0 : index
    %c0_102 = arith.constant 0 : index
    %169 = vector.load %arg3[%c2_99, %c0_100, %c0_101, %c0_102] : memref<6x3x128x128xbf16, #tpu.memory_space<vmem>>, vector<1x1x128x128xbf16>
    %170 = vector.shape_cast %169 : vector<1x1x128x128xbf16> to vector<128x128xbf16>
    %cst_103 = arith.constant dense<0.000000e+00> : vector<32x128xf32>
    %171 = tpu.matmul %168, %170, %cst_103 {dimension_numbers = #tpu.dot_dimension_numbers<[1], [0], [0], [1], [0, 0, 1, 1], [], []>} : vector<32x128xbf16>, vector<128x128xbf16>, vector<32x128xf32> -> vector<32x128xf32>
    %172 = arith.truncf %161 : vector<32x128xf32> to vector<32x128xbf16>
    %c2_104 = arith.constant 2 : index
    %c1_105 = arith.constant 1 : index
    %c0_106 = arith.constant 0 : index
    %c0_107 = arith.constant 0 : index
    %173 = vector.load %arg3[%c2_104, %c1_105, %c0_106, %c0_107] : memref<6x3x128x128xbf16, #tpu.memory_space<vmem>>, vector<1x1x128x128xbf16>
    %174 = vector.shape_cast %173 : vector<1x1x128x128xbf16> to vector<128x128xbf16>
    %cst_108 = arith.constant dense<0.000000e+00> : vector<32x128xf32>
    %175 = tpu.matmul %172, %174, %cst_108 {dimension_numbers = #tpu.dot_dimension_numbers<[1], [0], [0], [1], [0, 0, 1, 1], [], []>} : vector<32x128xbf16>, vector<128x128xbf16>, vector<32x128xf32> -> vector<32x128xf32>
    %176 = arith.addf %171, %175 : vector<32x128xf32>
    %177 = arith.truncf %167 : vector<32x128xf32> to vector<32x128xbf16>
    %c2_109 = arith.constant 2 : index
    %c2_110 = arith.constant 2 : index
    %c0_111 = arith.constant 0 : index
    %c0_112 = arith.constant 0 : index
    %178 = vector.load %arg3[%c2_109, %c2_110, %c0_111, %c0_112] : memref<6x3x128x128xbf16, #tpu.memory_space<vmem>>, vector<1x1x128x128xbf16>
    %179 = vector.shape_cast %178 : vector<1x1x128x128xbf16> to vector<128x128xbf16>
    %cst_113 = arith.constant dense<0.000000e+00> : vector<32x128xf32>
    %180 = tpu.matmul %177, %179, %cst_113 {dimension_numbers = #tpu.dot_dimension_numbers<[1], [0], [0], [1], [0, 0, 1, 1], [], []>} : vector<32x128xbf16>, vector<128x128xbf16>, vector<32x128xf32> -> vector<32x128xf32>
    %181 = arith.addf %176, %180 : vector<32x128xf32>
    %182 = vector.extract_strided_slice %2 {offsets = [8, 0], sizes = [1, 128], strides = [1, 1]} : vector<16x128xf32> to vector<1x128xf32>
    %183 = vector.broadcast %182 : vector<1x128xf32> to vector<32x128xf32>
    %184 = arith.addf %181, %183 : vector<32x128xf32>
    %185 = arith.truncf %136 : vector<32x128xf32> to vector<32x128xbf16>
    %c1_114 = arith.constant 1 : index
    %c0_115 = arith.constant 0 : index
    %c0_116 = arith.constant 0 : index
    %186 = vector.load %arg4[%c1_114, %c0_115, %c0_116] : memref<2x128x128xbf16, #tpu.memory_space<vmem>>, vector<1x128x128xbf16>
    %187 = vector.shape_cast %186 : vector<1x128x128xbf16> to vector<128x128xbf16>
    %cst_117 = arith.constant dense<0.000000e+00> : vector<32x128xf32>
    %188 = tpu.matmul %185, %187, %cst_117 {dimension_numbers = #tpu.dot_dimension_numbers<[1], [0], [0], [1], [0, 0, 1, 1], [], []>} : vector<32x128xbf16>, vector<128x128xbf16>, vector<32x128xf32> -> vector<32x128xf32>
    %189 = vector.extract_strided_slice %2 {offsets = [13, 0], sizes = [1, 128], strides = [1, 1]} : vector<16x128xf32> to vector<1x128xf32>
    %190 = vector.broadcast %189 : vector<1x128xf32> to vector<32x128xf32>
    %191 = arith.addf %188, %190 : vector<32x128xf32>
    %192 = arith.addf %184, %191 : vector<32x128xf32>
    %cst_118 = arith.constant 0.000000e+00 : f32
    %193 = vector.broadcast %cst_118 : f32 to vector<32x128xf32>
    %194 = arith.maximumf %192, %193 : vector<32x128xf32>
    %c1_i32_119 = arith.constant 1 : i32
    %195 = tpu.dynamic_rotate %194 by %c1_i32_119 dim 0 : vector<32x128xf32>, i32 -> vector<32x128xf32>
    %196 = vector.broadcast %23 : vector<32x1xf32> to vector<32x128xf32>
    %197 = arith.mulf %195, %196 : vector<32x128xf32>
    %c31_i32_120 = arith.constant 31 : i32
    %198 = tpu.dynamic_rotate %194 by %c31_i32_120 dim 0 : vector<32x128xf32>, i32 -> vector<32x128xf32>
    %199 = vector.broadcast %27 : vector<32x1xf32> to vector<32x128xf32>
    %200 = arith.mulf %198, %199 : vector<32x128xf32>
    %201 = arith.truncf %197 : vector<32x128xf32> to vector<32x128xbf16>
    %c3 = arith.constant 3 : index
    %c0_121 = arith.constant 0 : index
    %c0_122 = arith.constant 0 : index
    %c0_123 = arith.constant 0 : index
    %202 = vector.load %arg2[%c3, %c0_121, %c0_122, %c0_123] : memref<6x3x128x128xbf16, #tpu.memory_space<vmem>>, vector<1x1x128x128xbf16>
    %203 = vector.shape_cast %202 : vector<1x1x128x128xbf16> to vector<128x128xbf16>
    %cst_124 = arith.constant dense<0.000000e+00> : vector<32x128xf32>
    %204 = tpu.matmul %201, %203, %cst_124 {dimension_numbers = #tpu.dot_dimension_numbers<[1], [0], [0], [1], [0, 0, 1, 1], [], []>} : vector<32x128xbf16>, vector<128x128xbf16>, vector<32x128xf32> -> vector<32x128xf32>
    %205 = arith.truncf %194 : vector<32x128xf32> to vector<32x128xbf16>
    %c3_125 = arith.constant 3 : index
    %c1_126 = arith.constant 1 : index
    %c0_127 = arith.constant 0 : index
    %c0_128 = arith.constant 0 : index
    %206 = vector.load %arg2[%c3_125, %c1_126, %c0_127, %c0_128] : memref<6x3x128x128xbf16, #tpu.memory_space<vmem>>, vector<1x1x128x128xbf16>
    %207 = vector.shape_cast %206 : vector<1x1x128x128xbf16> to vector<128x128xbf16>
    %cst_129 = arith.constant dense<0.000000e+00> : vector<32x128xf32>
    %208 = tpu.matmul %205, %207, %cst_129 {dimension_numbers = #tpu.dot_dimension_numbers<[1], [0], [0], [1], [0, 0, 1, 1], [], []>} : vector<32x128xbf16>, vector<128x128xbf16>, vector<32x128xf32> -> vector<32x128xf32>
    %209 = arith.addf %204, %208 : vector<32x128xf32>
    %210 = arith.truncf %200 : vector<32x128xf32> to vector<32x128xbf16>
    %c3_130 = arith.constant 3 : index
    %c2_131 = arith.constant 2 : index
    %c0_132 = arith.constant 0 : index
    %c0_133 = arith.constant 0 : index
    %211 = vector.load %arg2[%c3_130, %c2_131, %c0_132, %c0_133] : memref<6x3x128x128xbf16, #tpu.memory_space<vmem>>, vector<1x1x128x128xbf16>
    %212 = vector.shape_cast %211 : vector<1x1x128x128xbf16> to vector<128x128xbf16>
    %cst_134 = arith.constant dense<0.000000e+00> : vector<32x128xf32>
    %213 = tpu.matmul %210, %212, %cst_134 {dimension_numbers = #tpu.dot_dimension_numbers<[1], [0], [0], [1], [0, 0, 1, 1], [], []>} : vector<32x128xbf16>, vector<128x128xbf16>, vector<32x128xf32> -> vector<32x128xf32>
    %214 = arith.addf %209, %213 : vector<32x128xf32>
    %215 = vector.extract_strided_slice %2 {offsets = [3, 0], sizes = [1, 128], strides = [1, 1]} : vector<16x128xf32> to vector<1x128xf32>
    %216 = vector.broadcast %215 : vector<1x128xf32> to vector<32x128xf32>
    %217 = arith.addf %214, %216 : vector<32x128xf32>
    %cst_135 = arith.constant 0.000000e+00 : f32
    %218 = vector.broadcast %cst_135 : f32 to vector<32x128xf32>
    %219 = arith.maximumf %217, %218 : vector<32x128xf32>
    %c1_i32_136 = arith.constant 1 : i32
    %220 = tpu.dynamic_rotate %219 by %c1_i32_136 dim 0 : vector<32x128xf32>, i32 -> vector<32x128xf32>
    %221 = vector.broadcast %23 : vector<32x1xf32> to vector<32x128xf32>
    %222 = arith.mulf %220, %221 : vector<32x128xf32>
    %c31_i32_137 = arith.constant 31 : i32
    %223 = tpu.dynamic_rotate %219 by %c31_i32_137 dim 0 : vector<32x128xf32>, i32 -> vector<32x128xf32>
    %224 = vector.broadcast %27 : vector<32x1xf32> to vector<32x128xf32>
    %225 = arith.mulf %223, %224 : vector<32x128xf32>
    %226 = arith.truncf %222 : vector<32x128xf32> to vector<32x128xbf16>
    %c3_138 = arith.constant 3 : index
    %c0_139 = arith.constant 0 : index
    %c0_140 = arith.constant 0 : index
    %c0_141 = arith.constant 0 : index
    %227 = vector.load %arg3[%c3_138, %c0_139, %c0_140, %c0_141] : memref<6x3x128x128xbf16, #tpu.memory_space<vmem>>, vector<1x1x128x128xbf16>
    %228 = vector.shape_cast %227 : vector<1x1x128x128xbf16> to vector<128x128xbf16>
    %cst_142 = arith.constant dense<0.000000e+00> : vector<32x128xf32>
    %229 = tpu.matmul %226, %228, %cst_142 {dimension_numbers = #tpu.dot_dimension_numbers<[1], [0], [0], [1], [0, 0, 1, 1], [], []>} : vector<32x128xbf16>, vector<128x128xbf16>, vector<32x128xf32> -> vector<32x128xf32>
    %230 = arith.truncf %219 : vector<32x128xf32> to vector<32x128xbf16>
    %c3_143 = arith.constant 3 : index
    %c1_144 = arith.constant 1 : index
    %c0_145 = arith.constant 0 : index
    %c0_146 = arith.constant 0 : index
    %231 = vector.load %arg3[%c3_143, %c1_144, %c0_145, %c0_146] : memref<6x3x128x128xbf16, #tpu.memory_space<vmem>>, vector<1x1x128x128xbf16>
    %232 = vector.shape_cast %231 : vector<1x1x128x128xbf16> to vector<128x128xbf16>
    %cst_147 = arith.constant dense<0.000000e+00> : vector<32x128xf32>
    %233 = tpu.matmul %230, %232, %cst_147 {dimension_numbers = #tpu.dot_dimension_numbers<[1], [0], [0], [1], [0, 0, 1, 1], [], []>} : vector<32x128xbf16>, vector<128x128xbf16>, vector<32x128xf32> -> vector<32x128xf32>
    %234 = arith.addf %229, %233 : vector<32x128xf32>
    %235 = arith.truncf %225 : vector<32x128xf32> to vector<32x128xbf16>
    %c3_148 = arith.constant 3 : index
    %c2_149 = arith.constant 2 : index
    %c0_150 = arith.constant 0 : index
    %c0_151 = arith.constant 0 : index
    %236 = vector.load %arg3[%c3_148, %c2_149, %c0_150, %c0_151] : memref<6x3x128x128xbf16, #tpu.memory_space<vmem>>, vector<1x1x128x128xbf16>
    %237 = vector.shape_cast %236 : vector<1x1x128x128xbf16> to vector<128x128xbf16>
    %cst_152 = arith.constant dense<0.000000e+00> : vector<32x128xf32>
    %238 = tpu.matmul %235, %237, %cst_152 {dimension_numbers = #tpu.dot_dimension_numbers<[1], [0], [0], [1], [0, 0, 1, 1], [], []>} : vector<32x128xbf16>, vector<128x128xbf16>, vector<32x128xf32> -> vector<32x128xf32>
    %239 = arith.addf %234, %238 : vector<32x128xf32>
    %240 = vector.extract_strided_slice %2 {offsets = [9, 0], sizes = [1, 128], strides = [1, 1]} : vector<16x128xf32> to vector<1x128xf32>
    %241 = vector.broadcast %240 : vector<1x128xf32> to vector<32x128xf32>
    %242 = arith.addf %239, %241 : vector<32x128xf32>
    %243 = arith.addf %242, %194 : vector<32x128xf32>
    %cst_153 = arith.constant 0.000000e+00 : f32
    %244 = vector.broadcast %cst_153 : f32 to vector<32x128xf32>
    %245 = arith.maximumf %243, %244 : vector<32x128xf32>
    %c1_i32_154 = arith.constant 1 : i32
    %246 = tpu.dynamic_rotate %245 by %c1_i32_154 dim 0 : vector<32x128xf32>, i32 -> vector<32x128xf32>
    %247 = vector.broadcast %23 : vector<32x1xf32> to vector<32x128xf32>
    %248 = arith.mulf %246, %247 : vector<32x128xf32>
    %c31_i32_155 = arith.constant 31 : i32
    %249 = tpu.dynamic_rotate %245 by %c31_i32_155 dim 0 : vector<32x128xf32>, i32 -> vector<32x128xf32>
    %250 = vector.broadcast %27 : vector<32x1xf32> to vector<32x128xf32>
    %251 = arith.mulf %249, %250 : vector<32x128xf32>
    %252 = arith.truncf %248 : vector<32x128xf32> to vector<32x128xbf16>
    %c4 = arith.constant 4 : index
    %c0_156 = arith.constant 0 : index
    %c0_157 = arith.constant 0 : index
    %c0_158 = arith.constant 0 : index
    %253 = vector.load %arg2[%c4, %c0_156, %c0_157, %c0_158] : memref<6x3x128x128xbf16, #tpu.memory_space<vmem>>, vector<1x1x128x128xbf16>
    %254 = vector.shape_cast %253 : vector<1x1x128x128xbf16> to vector<128x128xbf16>
    %cst_159 = arith.constant dense<0.000000e+00> : vector<32x128xf32>
    %255 = tpu.matmul %252, %254, %cst_159 {dimension_numbers = #tpu.dot_dimension_numbers<[1], [0], [0], [1], [0, 0, 1, 1], [], []>} : vector<32x128xbf16>, vector<128x128xbf16>, vector<32x128xf32> -> vector<32x128xf32>
    %256 = arith.truncf %245 : vector<32x128xf32> to vector<32x128xbf16>
    %c4_160 = arith.constant 4 : index
    %c1_161 = arith.constant 1 : index
    %c0_162 = arith.constant 0 : index
    %c0_163 = arith.constant 0 : index
    %257 = vector.load %arg2[%c4_160, %c1_161, %c0_162, %c0_163] : memref<6x3x128x128xbf16, #tpu.memory_space<vmem>>, vector<1x1x128x128xbf16>
    %258 = vector.shape_cast %257 : vector<1x1x128x128xbf16> to vector<128x128xbf16>
    %cst_164 = arith.constant dense<0.000000e+00> : vector<32x128xf32>
    %259 = tpu.matmul %256, %258, %cst_164 {dimension_numbers = #tpu.dot_dimension_numbers<[1], [0], [0], [1], [0, 0, 1, 1], [], []>} : vector<32x128xbf16>, vector<128x128xbf16>, vector<32x128xf32> -> vector<32x128xf32>
    %260 = arith.addf %255, %259 : vector<32x128xf32>
    %261 = arith.truncf %251 : vector<32x128xf32> to vector<32x128xbf16>
    %c4_165 = arith.constant 4 : index
    %c2_166 = arith.constant 2 : index
    %c0_167 = arith.constant 0 : index
    %c0_168 = arith.constant 0 : index
    %262 = vector.load %arg2[%c4_165, %c2_166, %c0_167, %c0_168] : memref<6x3x128x128xbf16, #tpu.memory_space<vmem>>, vector<1x1x128x128xbf16>
    %263 = vector.shape_cast %262 : vector<1x1x128x128xbf16> to vector<128x128xbf16>
    %cst_169 = arith.constant dense<0.000000e+00> : vector<32x128xf32>
    %264 = tpu.matmul %261, %263, %cst_169 {dimension_numbers = #tpu.dot_dimension_numbers<[1], [0], [0], [1], [0, 0, 1, 1], [], []>} : vector<32x128xbf16>, vector<128x128xbf16>, vector<32x128xf32> -> vector<32x128xf32>
    %265 = arith.addf %260, %264 : vector<32x128xf32>
    %266 = vector.extract_strided_slice %2 {offsets = [4, 0], sizes = [1, 128], strides = [1, 1]} : vector<16x128xf32> to vector<1x128xf32>
    %267 = vector.broadcast %266 : vector<1x128xf32> to vector<32x128xf32>
    %268 = arith.addf %265, %267 : vector<32x128xf32>
    %cst_170 = arith.constant 0.000000e+00 : f32
    %269 = vector.broadcast %cst_170 : f32 to vector<32x128xf32>
    %270 = arith.maximumf %268, %269 : vector<32x128xf32>
    %c1_i32_171 = arith.constant 1 : i32
    %271 = tpu.dynamic_rotate %270 by %c1_i32_171 dim 0 : vector<32x128xf32>, i32 -> vector<32x128xf32>
    %272 = vector.broadcast %23 : vector<32x1xf32> to vector<32x128xf32>
    %273 = arith.mulf %271, %272 : vector<32x128xf32>
    %c31_i32_172 = arith.constant 31 : i32
    %274 = tpu.dynamic_rotate %270 by %c31_i32_172 dim 0 : vector<32x128xf32>, i32 -> vector<32x128xf32>
    %275 = vector.broadcast %27 : vector<32x1xf32> to vector<32x128xf32>
    %276 = arith.mulf %274, %275 : vector<32x128xf32>
    %277 = arith.truncf %273 : vector<32x128xf32> to vector<32x128xbf16>
    %c4_173 = arith.constant 4 : index
    %c0_174 = arith.constant 0 : index
    %c0_175 = arith.constant 0 : index
    %c0_176 = arith.constant 0 : index
    %278 = vector.load %arg3[%c4_173, %c0_174, %c0_175, %c0_176] : memref<6x3x128x128xbf16, #tpu.memory_space<vmem>>, vector<1x1x128x128xbf16>
    %279 = vector.shape_cast %278 : vector<1x1x128x128xbf16> to vector<128x128xbf16>
    %cst_177 = arith.constant dense<0.000000e+00> : vector<32x128xf32>
    %280 = tpu.matmul %277, %279, %cst_177 {dimension_numbers = #tpu.dot_dimension_numbers<[1], [0], [0], [1], [0, 0, 1, 1], [], []>} : vector<32x128xbf16>, vector<128x128xbf16>, vector<32x128xf32> -> vector<32x128xf32>
    %281 = arith.truncf %270 : vector<32x128xf32> to vector<32x128xbf16>
    %c4_178 = arith.constant 4 : index
    %c1_179 = arith.constant 1 : index
    %c0_180 = arith.constant 0 : index
    %c0_181 = arith.constant 0 : index
    %282 = vector.load %arg3[%c4_178, %c1_179, %c0_180, %c0_181] : memref<6x3x128x128xbf16, #tpu.memory_space<vmem>>, vector<1x1x128x128xbf16>
    %283 = vector.shape_cast %282 : vector<1x1x128x128xbf16> to vector<128x128xbf16>
    %cst_182 = arith.constant dense<0.000000e+00> : vector<32x128xf32>
    %284 = tpu.matmul %281, %283, %cst_182 {dimension_numbers = #tpu.dot_dimension_numbers<[1], [0], [0], [1], [0, 0, 1, 1], [], []>} : vector<32x128xbf16>, vector<128x128xbf16>, vector<32x128xf32> -> vector<32x128xf32>
    %285 = arith.addf %280, %284 : vector<32x128xf32>
    %286 = arith.truncf %276 : vector<32x128xf32> to vector<32x128xbf16>
    %c4_183 = arith.constant 4 : index
    %c2_184 = arith.constant 2 : index
    %c0_185 = arith.constant 0 : index
    %c0_186 = arith.constant 0 : index
    %287 = vector.load %arg3[%c4_183, %c2_184, %c0_185, %c0_186] : memref<6x3x128x128xbf16, #tpu.memory_space<vmem>>, vector<1x1x128x128xbf16>
    %288 = vector.shape_cast %287 : vector<1x1x128x128xbf16> to vector<128x128xbf16>
    %cst_187 = arith.constant dense<0.000000e+00> : vector<32x128xf32>
    %289 = tpu.matmul %286, %288, %cst_187 {dimension_numbers = #tpu.dot_dimension_numbers<[1], [0], [0], [1], [0, 0, 1, 1], [], []>} : vector<32x128xbf16>, vector<128x128xbf16>, vector<32x128xf32> -> vector<32x128xf32>
    %290 = arith.addf %285, %289 : vector<32x128xf32>
    %291 = vector.extract_strided_slice %2 {offsets = [10, 0], sizes = [1, 128], strides = [1, 1]} : vector<16x128xf32> to vector<1x128xf32>
    %292 = vector.broadcast %291 : vector<1x128xf32> to vector<32x128xf32>
    %293 = arith.addf %290, %292 : vector<32x128xf32>
    %294 = arith.addf %293, %245 : vector<32x128xf32>
    %cst_188 = arith.constant 0.000000e+00 : f32
    %295 = vector.broadcast %cst_188 : f32 to vector<32x128xf32>
    %296 = arith.maximumf %294, %295 : vector<32x128xf32>
    %c1_i32_189 = arith.constant 1 : i32
    %297 = tpu.dynamic_rotate %296 by %c1_i32_189 dim 0 : vector<32x128xf32>, i32 -> vector<32x128xf32>
    %298 = vector.broadcast %23 : vector<32x1xf32> to vector<32x128xf32>
    %299 = arith.mulf %297, %298 : vector<32x128xf32>
    %c31_i32_190 = arith.constant 31 : i32
    %300 = tpu.dynamic_rotate %296 by %c31_i32_190 dim 0 : vector<32x128xf32>, i32 -> vector<32x128xf32>
    %301 = vector.broadcast %27 : vector<32x1xf32> to vector<32x128xf32>
    %302 = arith.mulf %300, %301 : vector<32x128xf32>
    %303 = arith.truncf %299 : vector<32x128xf32> to vector<32x128xbf16>
    %c5 = arith.constant 5 : index
    %c0_191 = arith.constant 0 : index
    %c0_192 = arith.constant 0 : index
    %c0_193 = arith.constant 0 : index
    %304 = vector.load %arg2[%c5, %c0_191, %c0_192, %c0_193] : memref<6x3x128x128xbf16, #tpu.memory_space<vmem>>, vector<1x1x128x128xbf16>
    %305 = vector.shape_cast %304 : vector<1x1x128x128xbf16> to vector<128x128xbf16>
    %cst_194 = arith.constant dense<0.000000e+00> : vector<32x128xf32>
    %306 = tpu.matmul %303, %305, %cst_194 {dimension_numbers = #tpu.dot_dimension_numbers<[1], [0], [0], [1], [0, 0, 1, 1], [], []>} : vector<32x128xbf16>, vector<128x128xbf16>, vector<32x128xf32> -> vector<32x128xf32>
    %307 = arith.truncf %296 : vector<32x128xf32> to vector<32x128xbf16>
    %c5_195 = arith.constant 5 : index
    %c1_196 = arith.constant 1 : index
    %c0_197 = arith.constant 0 : index
    %c0_198 = arith.constant 0 : index
    %308 = vector.load %arg2[%c5_195, %c1_196, %c0_197, %c0_198] : memref<6x3x128x128xbf16, #tpu.memory_space<vmem>>, vector<1x1x128x128xbf16>
    %309 = vector.shape_cast %308 : vector<1x1x128x128xbf16> to vector<128x128xbf16>
    %cst_199 = arith.constant dense<0.000000e+00> : vector<32x128xf32>
    %310 = tpu.matmul %307, %309, %cst_199 {dimension_numbers = #tpu.dot_dimension_numbers<[1], [0], [0], [1], [0, 0, 1, 1], [], []>} : vector<32x128xbf16>, vector<128x128xbf16>, vector<32x128xf32> -> vector<32x128xf32>
    %311 = arith.addf %306, %310 : vector<32x128xf32>
    %312 = arith.truncf %302 : vector<32x128xf32> to vector<32x128xbf16>
    %c5_200 = arith.constant 5 : index
    %c2_201 = arith.constant 2 : index
    %c0_202 = arith.constant 0 : index
    %c0_203 = arith.constant 0 : index
    %313 = vector.load %arg2[%c5_200, %c2_201, %c0_202, %c0_203] : memref<6x3x128x128xbf16, #tpu.memory_space<vmem>>, vector<1x1x128x128xbf16>
    %314 = vector.shape_cast %313 : vector<1x1x128x128xbf16> to vector<128x128xbf16>
    %cst_204 = arith.constant dense<0.000000e+00> : vector<32x128xf32>
    %315 = tpu.matmul %312, %314, %cst_204 {dimension_numbers = #tpu.dot_dimension_numbers<[1], [0], [0], [1], [0, 0, 1, 1], [], []>} : vector<32x128xbf16>, vector<128x128xbf16>, vector<32x128xf32> -> vector<32x128xf32>
    %316 = arith.addf %311, %315 : vector<32x128xf32>
    %317 = vector.extract_strided_slice %2 {offsets = [5, 0], sizes = [1, 128], strides = [1, 1]} : vector<16x128xf32> to vector<1x128xf32>
    %318 = vector.broadcast %317 : vector<1x128xf32> to vector<32x128xf32>
    %319 = arith.addf %316, %318 : vector<32x128xf32>
    %cst_205 = arith.constant 0.000000e+00 : f32
    %320 = vector.broadcast %cst_205 : f32 to vector<32x128xf32>
    %321 = arith.maximumf %319, %320 : vector<32x128xf32>
    %c1_i32_206 = arith.constant 1 : i32
    %322 = tpu.dynamic_rotate %321 by %c1_i32_206 dim 0 : vector<32x128xf32>, i32 -> vector<32x128xf32>
    %323 = vector.broadcast %23 : vector<32x1xf32> to vector<32x128xf32>
    %324 = arith.mulf %322, %323 : vector<32x128xf32>
    %c31_i32_207 = arith.constant 31 : i32
    %325 = tpu.dynamic_rotate %321 by %c31_i32_207 dim 0 : vector<32x128xf32>, i32 -> vector<32x128xf32>
    %326 = vector.broadcast %27 : vector<32x1xf32> to vector<32x128xf32>
    %327 = arith.mulf %325, %326 : vector<32x128xf32>
    %328 = arith.truncf %324 : vector<32x128xf32> to vector<32x128xbf16>
    %c5_208 = arith.constant 5 : index
    %c0_209 = arith.constant 0 : index
    %c0_210 = arith.constant 0 : index
    %c0_211 = arith.constant 0 : index
    %329 = vector.load %arg3[%c5_208, %c0_209, %c0_210, %c0_211] : memref<6x3x128x128xbf16, #tpu.memory_space<vmem>>, vector<1x1x128x128xbf16>
    %330 = vector.shape_cast %329 : vector<1x1x128x128xbf16> to vector<128x128xbf16>
    %cst_212 = arith.constant dense<0.000000e+00> : vector<32x128xf32>
    %331 = tpu.matmul %328, %330, %cst_212 {dimension_numbers = #tpu.dot_dimension_numbers<[1], [0], [0], [1], [0, 0, 1, 1], [], []>} : vector<32x128xbf16>, vector<128x128xbf16>, vector<32x128xf32> -> vector<32x128xf32>
    %332 = arith.truncf %321 : vector<32x128xf32> to vector<32x128xbf16>
    %c5_213 = arith.constant 5 : index
    %c1_214 = arith.constant 1 : index
    %c0_215 = arith.constant 0 : index
    %c0_216 = arith.constant 0 : index
    %333 = vector.load %arg3[%c5_213, %c1_214, %c0_215, %c0_216] : memref<6x3x128x128xbf16, #tpu.memory_space<vmem>>, vector<1x1x128x128xbf16>
    %334 = vector.shape_cast %333 : vector<1x1x128x128xbf16> to vector<128x128xbf16>
    %cst_217 = arith.constant dense<0.000000e+00> : vector<32x128xf32>
    %335 = tpu.matmul %332, %334, %cst_217 {dimension_numbers = #tpu.dot_dimension_numbers<[1], [0], [0], [1], [0, 0, 1, 1], [], []>} : vector<32x128xbf16>, vector<128x128xbf16>, vector<32x128xf32> -> vector<32x128xf32>
    %336 = arith.addf %331, %335 : vector<32x128xf32>
    %337 = arith.truncf %327 : vector<32x128xf32> to vector<32x128xbf16>
    %c5_218 = arith.constant 5 : index
    %c2_219 = arith.constant 2 : index
    %c0_220 = arith.constant 0 : index
    %c0_221 = arith.constant 0 : index
    %338 = vector.load %arg3[%c5_218, %c2_219, %c0_220, %c0_221] : memref<6x3x128x128xbf16, #tpu.memory_space<vmem>>, vector<1x1x128x128xbf16>
    %339 = vector.shape_cast %338 : vector<1x1x128x128xbf16> to vector<128x128xbf16>
    %cst_222 = arith.constant dense<0.000000e+00> : vector<32x128xf32>
    %340 = tpu.matmul %337, %339, %cst_222 {dimension_numbers = #tpu.dot_dimension_numbers<[1], [0], [0], [1], [0, 0, 1, 1], [], []>} : vector<32x128xbf16>, vector<128x128xbf16>, vector<32x128xf32> -> vector<32x128xf32>
    %341 = arith.addf %336, %340 : vector<32x128xf32>
    %342 = vector.extract_strided_slice %2 {offsets = [11, 0], sizes = [1, 128], strides = [1, 1]} : vector<16x128xf32> to vector<1x128xf32>
    %343 = vector.broadcast %342 : vector<1x128xf32> to vector<32x128xf32>
    %344 = arith.addf %341, %343 : vector<32x128xf32>
    %345 = arith.addf %344, %296 : vector<32x128xf32>
    %cst_223 = arith.constant 0.000000e+00 : f32
    %346 = vector.broadcast %cst_223 : f32 to vector<32x128xf32>
    %347 = arith.maximumf %345, %346 : vector<32x128xf32>
    %348 = vector.shape_cast %347 : vector<32x128xf32> to vector<2x16x128xf32>
    %cst_224 = arith.constant dense<0.000000e+00> : vector<2x128xf32>
    %349 = vector.multi_reduction <add>, %348, %cst_224 [1] : vector<2x16x128xf32> to vector<2x128xf32>
    %cst_225 = arith.constant 1.600000e+01 : f32
    %350 = vector.broadcast %cst_225 : f32 to vector<2x128xf32>
    %351 = arith.divf %349, %350 : vector<2x128xf32>
    %352 = arith.truncf %351 : vector<2x128xf32> to vector<2x128xbf16>
    %c0_226 = arith.constant 0 : index
    %c0_227 = arith.constant 0 : index
    %353 = vector.load %arg6[%c0_226, %c0_227] : memref<128x128xbf16, #tpu.memory_space<vmem>>, vector<128x128xbf16>
    %cst_228 = arith.constant dense<0.000000e+00> : vector<2x128xf32>
    %354 = tpu.matmul %352, %353, %cst_228 {dimension_numbers = #tpu.dot_dimension_numbers<[1], [0], [0], [1], [0, 0, 1, 1], [], []>} : vector<2x128xbf16>, vector<128x128xbf16>, vector<2x128xf32> -> vector<2x128xf32>
    %355 = vector.extract_strided_slice %2 {offsets = [14, 0], sizes = [1, 128], strides = [1, 1]} : vector<16x128xf32> to vector<1x128xf32>
    %356 = vector.broadcast %355 : vector<1x128xf32> to vector<2x128xf32>
    %357 = arith.addf %354, %356 : vector<2x128xf32>
    %c0_229 = arith.constant 0 : index
    %c0_230 = arith.constant 0 : index
    %c0_231 = arith.constant 0 : index
    %358 = vector.load %arg7[%c0_229, %c0_230, %c0_231] : memref<1x2x128xf32, #tpu.memory_space<vmem>>, vector<1x2x128xf32>
    %359 = vector.shape_cast %358 : vector<1x2x128xf32> to vector<2x128xf32>
    %360 = vector.shape_cast %357 : vector<2x128xf32> to vector<1x2x128xf32>
    tpu.vector_store %arg7[%c0_229, %c0_230, %c0_231], %360 {strides = array<i32>} : memref<1x2x128xf32, #tpu.memory_space<vmem>>, vector<1x2x128xf32>,
    return
  }
  func.func @transform_0(%arg0: i32) -> (i32, i32) {
    %c0_i32 = arith.constant 0 : i32
    %c0_i32_0 = arith.constant 0 : i32
    return %arg0, %c0_i32 : i32, i32
  }
  func.func @transform_1(%arg0: i32) -> (i32, i32, i32, i32) {
    %c0_i32 = arith.constant 0 : i32
    %c0_i32_0 = arith.constant 0 : i32
    %c0_i32_1 = arith.constant 0 : i32
    %c0_i32_2 = arith.constant 0 : i32
    %c0_i32_3 = arith.constant 0 : i32
    return %c0_i32, %c0_i32_0, %c0_i32_1, %c0_i32_2 : i32, i32, i32, i32
  }
  func.func @transform_2(%arg0: i32) -> (i32, i32, i32, i32) {
    %c0_i32 = arith.constant 0 : i32
    %c0_i32_0 = arith.constant 0 : i32
    %c0_i32_1 = arith.constant 0 : i32
    %c0_i32_2 = arith.constant 0 : i32
    %c0_i32_3 = arith.constant 0 : i32
    return %c0_i32, %c0_i32_0, %c0_i32_1, %c0_i32_2 : i32, i32, i32, i32
  }
  func.func @transform_3(%arg0: i32) -> (i32, i32, i32) {
    %c0_i32 = arith.constant 0 : i32
    %c0_i32_0 = arith.constant 0 : i32
    %c0_i32_1 = arith.constant 0 : i32
    %c0_i32_2 = arith.constant 0 : i32
    return %c0_i32, %c0_i32_0, %c0_i32_1 : i32, i32, i32
  }
  func.func @transform_4(%arg0: i32) -> (i32, i32) {
    %c0_i32 = arith.constant 0 : i32
    %c0_i32_0 = arith.constant 0 : i32
    %c0_i32_1 = arith.constant 0 : i32
    return %c0_i32, %c0_i32_0 : i32, i32
  }
  func.func @transform_5(%arg0: i32) -> (i32, i32) {
    %c0_i32 = arith.constant 0 : i32
    %c0_i32_0 = arith.constant 0 : i32
    %c0_i32_1 = arith.constant 0 : i32
    return %c0_i32, %c0_i32_0 : i32, i32
  }
  func.func @transform_6(%arg0: i32) -> (i32, i32, i32) {
    %c0_i32 = arith.constant 0 : i32
    %c0_i32_0 = arith.constant 0 : i32
    %c0_i32_1 = arith.constant 0 : i32
    return %arg0, %c0_i32, %c0_i32_0 : i32, i32, i32
  }
}

</mosaic_0001>

<bundles_post_ra>
// kernel: tpu_custom_call.1
= control target key start
LH: loop header
LB: loop body
LE: loop exit
PB: predicated region body
PF: predicated region fallthrough
CT: control target
= control target key end

     0   :  { %11 = vsyncpa [#allocation3], 0  ;;  %s8615_s0 = inlined_call_operand.hbm [shape: bf16[64,128], index: 0, kind: input, shape index: {}]   ;;  %s8616_s1 = inlined_call_operand.hbm [shape: bf16[6,3,128,128], index: 1, kind: input, shape index: {}]   ;;  %s8617_s2 = inlined_call_operand.hbm [shape: bf16[6,3,128,128], index: 2, kind: input, shape index: {}]   ;;  %s8618_s3 = inlined_call_operand.hbm [shape: bf16[2,128,128], index: 3, kind: input, shape index: {}]   ;;  %s8619_s4 = inlined_call_operand.hbm [shape: f32[16,128], index: 4, kind: input, shape index: {}]   ;;  %s8620_s5 = inlined_call_operand.hbm [shape: bf16[128,128], index: 5, kind: input, shape index: {}]   ;;  %s8621_s6 = inlined_call_operand.hbm [shape: f32[2,2,128], index: 6, kind: output, shape index: {}]  }
   0x1   :  { %13 = vsyncpa [#allocation3 + $0x1], 0 }
   0x2   :  { %14 = vsyncpa [#allocation6], 0 }
   0x3   :  { %15 = vsyncpa [#allocation9], 0 }
   0x4   :  { %16 = vsyncpa [#allocation12], 0 }
   0x5   :  { %17 = vsyncpa [#allocation4], 0 }
   0x6   :  { %19 = vsyncpa [#allocation4 + $0x1], 0  ;;  %s7843_s21 = smov 0   ;;  %s7845_s22 = smov 0  }
   0x7   :  { %s7847_s23 = smov 0   ;;  %s7849_s24 = smov 0  }
   0x8 LB: > { %s7795_s25 = smov [#allocation5]   ;;  %s7864_s27 = sadd.s32 4294967295, %s7793_s24   ;;  %s7793_s24 = sphi %s7849_s24, %s8659_s24   ;;  %s7789_s23 = sphi %s7847_s23, %s8658_s23   ;;  %s7785_s22 = sphi %s7845_s22, %s8657_s22   ;;  %s7781_s21 = sphi %s7843_s21, %s8656_s21  }
   0x9   : > { %s199_s26 = sshll.u32 %s7795_s25, 4  ;;  %p5626_p0 = scmp.ge.s32.totalorder %s7793_s24, 1  ;;  %s200_s26 = int_to_ptr.vmem [resolvable:$true] %s199_s26 }
   0xa   : > { %p8622_p1 = scmp.eq.s32.totalorder %s7864_s27, 0  ;;  %p187_p2 = scmp.lt.s32.totalorder %s7793_s24, 3 }
   0xb   : > { %s7796_s29 = smov [#allocation8]   ;;  %s7797_s8 = smov [#allocation7]  }
   0xc   : > { %p7869_p3 = pnand %p5626_p0, %p187_p2  ;;  %s225_s30 = sshll.u32 %s7796_s29, 4  ;;  %s7882_s30 = int_to_ptr.vmem [resolvable:$true] %s225_s30 }
   0xd   : > { %s212_s9 = sshll.u32 %s7797_s8, 4  ;;  %s7570_s11 = scalar_lea.vmem %s200_s26, 18432  ;;  %s7884_s9 = int_to_ptr.vmem [resolvable:$true] %s212_s9 }
   0xe   : > { %s8628_s28 = scalar_select %p7869_p3, 1, 0 }
   0xf   : > { %p7160_p5 = pneg %p7869_p3  ;;  %p7571_p8 = scmp.ne.s32.totalorder %s200_s26, %s7570_s11 }
  0x10   : > { %p7578_p11 = scmp.lt.s32.totalorder %s200_s26, %s200_s26  ;;  %p7579_p12 = scmp.lt.s32.totalorder %s7570_s11, %s7570_s11 }
  0x11   : > { %p7878_p6 = pnand %p7160_p5, %p8622_p1 }
  0x12   : > { %p7580_p13 = por %p7579_p12, %p7578_p11 }
  0x13   : > { %p7888_p7 = pneg %p7878_p6 }
  0x15   : > { %p7573_p9 = pnand %p7571_p8, %p7888_p7 }
  0x17   : > { %p7574_p10 = pneg %p7573_p9 }
  0x19   : > { %p7581_p0 = pnand %p7580_p13, %p7574_p10 }
  0x1b   : > { %7584 = shalt.err (!%p7581_p0)
}
  0x1c   : > { %s8623_s12 = smov 64   ;;  %s8624_s13 = smov 4  }
  0x1d   : > { %7163 = dma.hbm_to_vmem [thread:$0]  (!%p7878_p6), %s8616_s1, 18432, %s200_s26, [#allocation6], %s8623_s12, %s8623_s12, %s8624_s13  }
  0x1e   : > { %s7596_s16 = scalar_lea.vmem %s7882_s30, 2048  ;;  %p7604_p9 = scmp.lt.s32.totalorder %s7882_s30, %s7882_s30 }
  0x1f   : > { %p7597_p2 = scmp.ne.s32.totalorder %s7882_s30, %s7596_s16  ;;  %p7605_p10 = scmp.lt.s32.totalorder %s7596_s16, %s7596_s16 }
  0x21   : > { %p7599_p5 = pnand %p7597_p2, %p7888_p7  ;;  %p7606_p11 = por %p7605_p10, %p7604_p9 }
  0x23   : > { %p7600_p8 = pneg %p7599_p5 }
  0x25   : > { %p7607_p12 = pnand %p7606_p11, %p7600_p8 }
  0x27   : > { %7610 = shalt.err (!%p7607_p12)
}
  0x28   : > { %7169 = dma.hbm_to_vmem [thread:$0]  (!%p7878_p6), %s8618_s3, 2048, %s7882_s30, [#allocation9], %s8623_s12, %s8623_s12, %s8624_s13  }
  0x29   : > { %s7622_s19 = scalar_lea.vmem %s7884_s9, 18432  ;;  %p7630_p5 = scmp.lt.s32.totalorder %s7884_s9, %s7884_s9 }
  0x2a   : > { %p7623_p13 = scmp.ne.s32.totalorder %s7884_s9, %s7622_s19  ;;  %p7631_p8 = scmp.lt.s32.totalorder %s7622_s19, %s7622_s19 }
  0x2c   : > { %p7625_p0 = pnand %p7623_p13, %p7888_p7  ;;  %p7632_p9 = por %p7631_p8, %p7630_p5 }
  0x2e   : > { %p7626_p2 = pneg %p7625_p0 }
  0x30   : > { %p7633_p10 = pnand %p7632_p9, %p7626_p2 }
  0x32   : > { %7636 = shalt.err (!%p7633_p10)
}
  0x33   : > { %7166 = dma.hbm_to_vmem [thread:$0]  (!%p7878_p6), %s8617_s2, 18432, %s7884_s9, [#allocation6], %s8623_s12, %s8623_s12, %s8624_s13  }
  0x34   : > { %s7800_s26 = smov [#allocation10]  }
  0x35   : > { %s238_s29 = sshll.u32 %s7800_s26, 4  ;;  %s239_s29 = int_to_ptr.vmem [resolvable:$true] %s238_s29 }
  0x36   : > { %s7648_s30 = scalar_lea.vmem %s239_s29, 256  ;;  %p7656_p0 = scmp.lt.s32.totalorder %s239_s29, %s239_s29 }
  0x37   : > { %p7649_p11 = scmp.ne.s32.totalorder %s239_s29, %s7648_s30  ;;  %p7657_p2 = scmp.lt.s32.totalorder %s7648_s30, %s7648_s30 }
  0x39   : > { %p7651_p12 = pnand %p7649_p11, %p7888_p7  ;;  %p7658_p5 = por %p7657_p2, %p7656_p0 }
  0x3b   : > { %p7652_p13 = pneg %p7651_p12 }
  0x3d   : > { %p7659_p8 = pnand %p7658_p5, %p7652_p13 }
  0x3f   : > { %7662 = shalt.err (!%p7659_p8)
}
  0x40   : > { %s7801_s8 = smov 128   ;;  %s7802_s11 = smov 8  }
  0x41   : > { %7172 = dma.hbm_to_vmem [thread:$0]  (!%p7878_p6), %s8619_s4, 256, %s239_s29, [#allocation9], %s7801_s8, %s7801_s8, %s7802_s11  }
  0x42   : > { %s7803_s15 = smov [#allocation11]  }
  0x43   : > { %s251_s16 = sshll.u32 %s7803_s15, 4  ;;  %s252_s16 = int_to_ptr.vmem [resolvable:$true] %s251_s16 }
  0x44   : > { %s7674_s17 = scalar_lea.vmem %s252_s16, 1024  ;;  %p7682_p12 = scmp.lt.s32.totalorder %s252_s16, %s252_s16 }
  0x45   : > { %p7675_p9 = scmp.ne.s32.totalorder %s252_s16, %s7674_s17  ;;  %p7683_p13 = scmp.lt.s32.totalorder %s7674_s17, %s7674_s17 }
  0x47   : > { %p7677_p10 = pnand %p7675_p9, %p7888_p7  ;;  %p7684_p0 = por %p7683_p13, %p7682_p12 }
  0x49   : > { %p7678_p11 = pneg %p7677_p10 }
  0x4b   : > { %p7685_p2 = pnand %p7684_p0, %p7678_p11 }
  0x4d   : > { %7688 = shalt.err (!%p7685_p2)
}
  0x4e   : > { %7175 = dma.hbm_to_vmem [thread:$0]  (!%p7878_p6), %s8620_s5, 1024, %s252_s16, [#allocation12], %s8623_s12, %s8623_s12, %s8624_s13  }
  0x4f   : > { %s5625_s7 = sadd.s32 4294967294, %s7793_s24   ;;  %s7951_s10 = sadd.s32 1, %s7793_s24  }
  0x50   : > { %s32_s20 = sadd.s32 1, %s7789_s23  ;;  %s29_s25 = ssub.s32 %s7793_s24, %s7951_s10 }
  0x51   : > { %p39_p7 = scmp.ne.s32.totalorder %s7789_s23, %s7785_s22  ;;  %p30_p5 = scmp.eq.s32.totalorder %s29_s25, 0 }
  0x52   : > { %p40_p8 = scmp.eq.s32.totalorder %s7793_s24, 0  ;;  %p45_p9 = scmp.ne.s32.totalorder %s7785_s22, %s7781_s21 }
  0x53   : > { %p174_p10 = scmp.eq.s32.totalorder %s7864_s27, 1  ;;  %p180_p13 = scmp.eq.s32.totalorder %s5625_s7, 1 }
  0x54   : > { %s7963_s26 = scalar_select %p30_p5, %s7789_s23, %s32_s20  }
  0x55   : > { %p41_p11 = por %p40_p8, %p39_p7  ;;  %p7967_p12 = por %p8622_p1, %p45_p9 }
  0x56   : > { %p7971_p6 = por %p174_p10, %p39_p7  ;;  %p7189_p0 = scmp.lt.s32.totalorder %s7793_s24, 2 }
  0x57   : > { %s8631_s29 = scalar_select %p7967_p12, 1, 0 }
  0x58   : > { %s8632_s30 = scalar_select %p7971_p6, 1, 0 }
  0x59   : > { %s265_s8 = sand.u32 1, %s7789_s23   ;;  %p7977_p2 = por %p180_p13, %p45_p9 }
  0x5a   : > { %s5633_s14 = sshll.u32 %s265_s8, 4  ;;  %s5966_s9 = sshll.u32 %s7793_s24, 8 }
  0x5b   : > { %s8633_s11 = scalar_select %p7977_p2, 1, 0 }
  0x5c   : > { %s7985_s17 = scalar_lea.hbm %s8615_s0, %s5966_s9  ;;  %s269_s18 = scalar_lea.vmem [#allocation2], %s5633_s14 }
  0x5d   : > { %s276_s19 = sshll.u32 %s269_s18, 4  ;;  %p7987_p7 = pnand %p7189_p0, %p41_p11  ;;  %s7991_s19 = int_to_ptr.vmem [resolvable:$true] %s276_s19 }
  0x5e   : > { %s7993_s20 = scalar_lea.sflag [#allocation3], %s265_s8  ;;  %s7689_s25 = scalar_lea.hbm %s7985_s17, 256 }
  0x5f   : > { %p7690_p5 = scmp.ne.s32.totalorder %s7985_s17, %s7689_s25  ;;  %p7691_p8 = pneg %p7987_p7 }
  0x60   : > { %s7694_s14 = scalar_lea.hbm %s8615_s0, 512  ;;  %p7695_p11 = scmp.lt.s32.totalorder %s7985_s17, %s8615_s0 }
  0x61   : > { %p7692_p9 = pnand %p7691_p8, %p7690_p5  ;;  %p7696_p13 = scmp.lt.s32.totalorder %s7694_s14, %s7689_s25 }
  0x63   : > { %p7693_p10 = pneg %p7692_p9  ;;  %p7697_p0 = por %p7696_p13, %p7695_p11 }
  0x65   : > { %p7698_p4 = pnand %p7697_p0, %p7693_p10 }
  0x67   : > { %7701 = shalt.err (!%p7698_p4)
}
  0x68   : > { %s7702_s8 = scalar_lea.vmem %s7991_s19, 256  ;;  %s7804_s12 = smov [#allocation2]  }
  0x69   : > { %p7703_p1 = scmp.ne.s32.totalorder %s7991_s19, %s7702_s8  ;;  %s7707_s13 = sshll.u32 %s7804_s12, 4  ;;  %s7708_s13 = int_to_ptr.vmem [resolvable:$false] %s7707_s13 }
  0x6a   : > { %s7709_s9 = scalar_lea.vmem %s7708_s13, 512  ;;  %p7710_p9 = scmp.lt.s32.totalorder %s7991_s19, %s7708_s13 }
  0x6b   : > { %p7705_p2 = pnand %p7703_p1, %p7691_p8  ;;  %p7711_p6 = scmp.lt.s32.totalorder %s7709_s9, %s7702_s8 }
  0x6d   : > { %p7706_p5 = pneg %p7705_p2  ;;  %p7712_p12 = por %p7711_p6, %p7710_p9 }
  0x6f   : > { %p7713_p3 = pnand %p7712_p12, %p7706_p5 }
  0x71   : > { %7716 = shalt.err (!%p7713_p3)
}
  0x72   : > { %s8635_s25 = smov 4   ;;  %s8636_s15 = smov 64  }
  0x73   : > { %7179 = dma.hbm_to_vmem [thread:$0]  (!%p7987_p7), %s7985_s17, 256, %s7991_s19, %s7993_s20, %s8636_s15, %s8636_s15, %s8635_s25  }
  0x74   : > { %p8637_p1 = scmp.ne.s32.totalorder %s8628_s28, 0 }
  0x75   : > { %s8020_s12 = sand.u32 (!%p8637_p1), 1, %s7785_s22   ;;  %p8638_p3 = scmp.ne.s32.totalorder (!%p8637_p1), %s8631_s29, 0 }
  0x76   : > { %288 = sbr.rel (%p8637_p1) target bundleno = 3292 (0xcdc), region = 44  ;;  %s5637_s13 = sshll.u32 (!%p8637_p1), %s8020_s12, 4 }
  0x77   : > { %s291_s14 = scalar_lea.sflag (!%p8637_p1), [#allocation3], %s8020_s12  ;;  %s8024_s16 = scalar_lea.vmem (!%p8637_p1), [#allocation2], %s5637_s13 }
  0x7b   : > { %7760 = dma.done.wait (%p8638_p3), %s291_s14, 256  }
  0x7c   : > { %7762 = vsyncadd (%p8638_p3), %s291_s14, 4294967040  ;;  %p8639_p4 = scmp.eq.s32.totalorder %s7864_s27, 0 }
  0x7e   : > { %7764 = dma.done.wait (%p8639_p4), [#allocation6], 36864   ;;  %p8640_p12 = pmov %p8639_p4 }
  0x7f   : > { %p8641_p6 = pmov %p8639_p4 }
  0x80   : > { %7766 = vsyncadd (%p8640_p12), [#allocation6], 4294930432 }
  0x81   : > { %7768 = dma.done.wait (%p8641_p6), [#allocation9], 2304   ;;  %p8642_p2 = pmov %p8639_p4 }
  0x83   : > { %7770 = vsyncadd (%p8642_p2), [#allocation9], 4294964992  ;;  %p8643_p7 = pmov %p8642_p2 }
  0x84   : > { %p8644_p8 = pmov %p8642_p2 }
  0x85   : > { %7772 = dma.done.wait (%p8643_p7), [#allocation12], 1024  }
  0x86   : > { %7774 = vsyncadd (%p8644_p8), [#allocation12], 4294966272  ;;  %v7239_v0 = vld [vmem:[#allocation5 + $0x78] sm:$0xff]   ;;  %v355_v2 = vlaneseq  ;;  %v7241_v3 = vld [vmem:[#allocation5 + $0x70] sm:$0xff]   ;;  %v7805_v27 = vmov 0.0   ;;  %vm7806_vm6 = vmmov 0  }
  0x87   : > { %v7240_v1 = vld [vmem:[#allocation5 + $0x38] sm:$0xff]   ;;  %6356 = vmatprep.subr.bf16.mxu0 %v7239_v0  ;;  %v7242_v4 = vld [vmem:[#allocation5 + $0x30] sm:$0xff]   ;;  %v7243_v5 = vld [vmem:[#allocation5 + $0x68] sm:$0xff]   ;;  %vm5400_vm7 = vcmask 1041409   ;;  %s5643_s28 = sshll.u32 %s8020_s12, 1  ;;  %s5963_s29 = sshll.u32 %s7864_s27, 5 }
  0x88   : > { %6376 = vmatprep.subr.bf16.mxu1 %v7240_v1  ;;  %6357 = vmatpush3.bf16.msra.mxu0 %v7239_v0  ;;  %v7244_v6 = vld [vmem:[#allocation5 + $0x28] sm:$0xff]   ;;  %v8042_v7 = vshrl.u32 %v355_v2, 7  ;;  %v7245_v8 = vld [vmem:[#allocation5 + $0x60] sm:$0xff]   ;;  %v7247_v14 = vld [vmem:[#allocation5 + $0x58] sm:$0xff]   ;;  %s342_s17 = scalar_lea.vmem [#allocation13], %s5643_s28  ;;  %s8572_s18 = scalar_lea.hbm %s8621_s6, %s5963_s29 }
  0x89   : > { %6377 = vmatpush3.bf16.msra.mxu1 %v7240_v1  ;;  %6358 = vmatprep.subr.bf16.mxu0 %v7241_v3  ;;  %v7246_v9 = vld [vmem:[#allocation5 + $0x20] sm:$0xff]   ;;  %v7248_v15 = vld [vmem:[#allocation5 + $0x18] sm:$0xff]   ;;  %v7249_v19 = vld [vmem:[#allocation5 + $0x50] sm:$0xff]   ;;  %s5507_s19 = sshll.u32 %s342_s17, 4  ;;  %s5494_s8 = scalar_lea.sflag [#allocation4], %s8020_s12  ;;  %s8574_s19 = int_to_ptr.vmem [resolvable:$true] %s5507_s19 }
  0x8a   : > { %6378 = vmatprep.subr.bf16.mxu1 %v7242_v4  ;;  %v364_v10 = vand.u32 15, %v8042_v7  ;;  %v358_v11 = vadd.s32 16, %v8042_v7  ;;  %v357_v12 = vadd.s32 8, %v8042_v7  ;;  %v359_v13 = vadd.s32 24, %v8042_v7  ;;  %v8053_v21 = vld [vmem:[%s8024_s16] sm:$0xff]   ;;  %v8056_v22 = vld [vmem:[%s8024_s16 + $0x8] sm:$0xff]  }
  0x8b   : > { %vm436_vm1 = vcmp.lt.s32.totalorder %v8042_v7, 1  ;;  %v7250_v23 = vld [vmem:[#allocation5 + $0x10] sm:$0xff]   ;;  %v349_v24 = vunpack.c.l.bf16 %v8053_v21  ;;  %v350_v25 = vunpack.c.h.bf16 %v8053_v21  ;;  %v352_v26 = vunpack.c.h.bf16 %v8056_v22  ;;  %6372 = vmatprep.mubr.bf16.mxu0 %v8053_v21  ;;  %v7251_v35 = vld [vmem:[#allocation5 + $0x48] sm:$0xff]   ;;  %v7253_v44 = vld [vmem:[#allocation5 + $0x40] sm:$0xff]   ;;  %s7717_s9 = scalar_lea.vmem %s8574_s19, 32  ;;  %p8653_p11 = scmp.ne.s32.totalorder %s8632_s30, 0 }
  0x8c   : > { %6359 = vmatpush3.bf16.msra.mxu0 %v7241_v3  ;;  %vm8048_vm0 = vcmp.ne.s32.totalorder %v364_v10, 0  ;;  %v378_v17 = vand.u32 15, %v358_v11  ;;  %v371_v18 = vand.u32 15, %v357_v12  ;;  %v385_v20 = vand.u32 15, %v359_v13  ;;  %v7252_v36 = vld [vmem:[#allocation5 + $0x8] sm:$0xff]   ;;  %v7254_v47 = vld [vmem:[#allocation5] sm:$0xff]   ;;  %p7718_p10 = scmp.ne.s32.totalorder %s8574_s19, %s7717_s9 }
  0x8d   : > { %6379 = vmatpush3.bf16.msra.mxu1 %v7242_v4  ;;  %6360 = vmatprep.subr.bf16.mxu0 %v7243_v5  ;;  %v8065_v28 = vsel %vm8048_vm0, 1.0, %v7805_v27  ;;  %v351_v29 = vunpack.c.l.bf16 %v8056_v22  ;;  %v432_v31 = vrot.slane %v349_v24, 7  ;;  %v433_v32 = vrot.slane %v350_v25, 7  ;;  %v7257_v54 = vld [vmem:[#allocation5 + $0xb8] sm:$0xff]   ;;  %v7258_v59 = vld [vmem:[#allocation5 + $0xb0] sm:$0xff]   ;;  %v7259_v62 = vld [vmem:[#allocation5 + $0xa8] sm:$0xff]  }
  0x8e   : > { %6380 = vmatprep.subr.bf16.mxu1 %v7244_v6  ;;  %vm8068_vm2 = vcmp.ne.s32.totalorder %v378_v17, 0  ;;  %vm8073_vm3 = vcmp.ne.s32.totalorder %v371_v18, 15  ;;  %vm8077_vm4 = vcmp.ne.s32.totalorder %v385_v20, 15  ;;  %v446_v37 = vrot.slane %v350_v25, 1  ;;  %v7260_v63 = vld [vmem:[#allocation5 + $0xa0] sm:$0xff]   ;;  %v7261_v0 = vld [vmem:[#allocation5 + $0x98] sm:$0xff]   ;;  %p7719_p13 = pnand %p7718_p10, %p8653_p11 }
  0x8f   : > { %v435_v38 = vrot.slane %v352_v26, 7  ;;  %v434_v39 = vrot.slane %v351_v29, 7  ;;  %v447_v40 = vrot.slane %v351_v29, 1  ;;  %v439_v41 = vsel %vm436_vm1, %v432_v31, %v433_v32  ;;  %v7262_v1 = vld [vmem:[#allocation5 + $0x90] sm:$0xff]   ;;  %v7263_v2 = vld [vmem:[#allocation5 + $0x88] sm:$0xff]   ;;  %v7264_v3 = vld [vmem:[#allocation5 + $0x80] sm:$0xff]  }
  0x90   : > { %6361 = vmatpush3.bf16.msra.mxu0 %v7243_v5  ;;  %v8088_v43 = vsel %vm8068_vm2, 1.0, %v7805_v27  ;;  %vm449_vm5 = vcmp.lt.s32.totalorder %v8042_v7, 7  ;;  %v8095_v46 = vsel %vm8073_vm3, 1.0, %v7805_v27  ;;  %v8102_v49 = vsel %vm8077_vm4, 1.0, %v7805_v27  ;;  %v7266_v10 = vld [vmem:[#allocation7 + $0x70] sm:$0xff]   ;;  %v7267_v11 = vld [vmem:[#allocation7 + $0x38] sm:$0xff]   ;;  %p7720_p0 = pneg %p7719_p13 }
  0x91   : > { %6381 = vmatpush3.bf16.msra.mxu1 %v7244_v6  ;;  %6362 = vmatprep.subr.bf16.mxu0 %v7245_v8  ;;  %v440_v42 = vsel %vm436_vm1, %v435_v38, %v432_v31  ;;  %v438_v48 = vsel %vm436_vm1, %v433_v32, %v434_v39  ;;  %v445_v50 = vrot.slane %v349_v24, 1  ;;  %v448_v51 = vrot.slane %v352_v26, 1  ;;  %v7269_v12 = vld [vmem:[#allocation7 + $0x30] sm:$0xff]   ;;  %v7268_v13 = vld [vmem:[#allocation7 + $0x68] sm:$0xff]   ;;  %v7273_v16 = vld [vmem:[#allocation7 + $0x20] sm:$0xff]   ;;  %s7807_s27 = smov [#allocation13]  }
  0x92   : > { %6382 = vmatprep.subr.bf16.mxu1 %v7246_v9  ;;  %v441_v45 = vmul.f32 %v8065_v28, %v440_v42  ;;  %v451_v53 = vsel %vm449_vm5, %v446_v37, %v447_v40  ;;  %v443_v55 = vmul.f32 %v8088_v43, %v438_v48  ;;  %v437_v56 = vsel %vm436_vm1, %v434_v39, %v435_v38  ;;  %v7272_v17 = vld [vmem:[#allocation7 + $0x58] sm:$0xff]   ;;  %v7274_v18 = vld [vmem:[#allocation7 + $0x50] sm:$0xff]   ;;  %v7276_v20 = vld [vmem:[#allocation7 + $0x48] sm:$0xff]   ;;  %s7721_s25 = sshll.u32 %s7807_s27, 4  ;;  %s7722_s25 = int_to_ptr.vmem [resolvable:$false] %s7721_s25 }
  0x93   : > { %v455_v57 = vmul.f32 %v8095_v46, %v451_v53  ;;  %v452_v58 = vsel %vm449_vm5, %v445_v50, %v446_v37  ;;  %v453_v4 = vsel %vm449_vm5, %v448_v51, %v445_v50  ;;  %v450_v6 = vsel %vm449_vm5, %v447_v40, %v448_v51  ;;  %v7278_v24 = vld [vmem:[#allocation7 + $0x40] sm:$0xff]   ;;  %v7279_v25 = vld [vmem:[#allocation7 + $0x8] sm:$0xff]   ;;  %v7281_v29 = vld [vmem:[#allocation7 + $0xb8] sm:$0xff]   ;;  %s7723_s15 = scalar_lea.vmem %s7722_s25, 64  ;;  %p7724_p5 = scmp.lt.s32.totalorder %s8574_s19, %s7722_s25 }
  0x94   : > { %6363 = vmatpush3.bf16.msra.mxu0 %v7245_v8  ;;  %v458_v52 = vpack.c.bf16 %v439_v41, %v441_v45  ;;  %v459_v60 = vpack.c.bf16 %v437_v56, %v443_v55  ;;  %v457_v5 = vmul.f32 %v8102_v49, %v453_v4  ;;  %v7280_v26 = vld [vmem:[#allocation7] sm:$0xff]   ;;  %v8118_v30 = vld [vmem:[#allocation8 + $0x38] sm:$0xff]   ;;  %p7725_p9 = scmp.lt.s32.totalorder %s7723_s15, %s7717_s9 }
  0x95   : > { %6383 = vmatpush3.bf16.msra.mxu1 %v7246_v9  ;;  %6364 = vmatprep.subr.bf16.mxu0 %v7247_v14  ;;  %v699_v61 = vpack.c.bf16 %v455_v57, %v452_v58  ;;  %v7265_v9 = vld [vmem:[#allocation7 + $0x78] sm:$0xff]   ;;  %v8122_v38 = vld [vmem:[#allocation10] sm:$0xff] }
  0x96   : > { %6384 = vmatprep.subr.bf16.mxu1 %v7248_v15  ;;  %6392 = vmatprep.mubr.bf16.mxu1 %v458_v52  ;;  %v700_v8 = vpack.c.bf16 %v457_v5, %v450_v6  ;;  %p7726_p1 = por %p7725_p9, %p7724_p5 }
  0x98   : > { %6365 = vmatpush3.bf16.msra.mxu0 %v7247_v14  ;;  %v7271_v14 = vld [vmem:[#allocation7 + $0x28] sm:$0xff]   ;;  %p7727_p3 = pnand %p7726_p1, %p7720_p0 }
  0x99   : > { %6385 = vmatpush3.bf16.msra.mxu1 %v7248_v15  ;;  %6366 = vmatprep.subr.bf16.mxu0 %v7249_v19  ;;  %v7270_v15 = vld [vmem:[#allocation7 + $0x60] sm:$0xff]  }
  0x9a   : > { %6386 = vmatprep.subr.bf16.mxu1 %v7250_v23 }
  0x9c   : > { %6367 = vmatpush3.bf16.msra.mxu0 %v7249_v19  ;;  %v7275_v19 = vld [vmem:[#allocation7 + $0x18] sm:$0xff]  }
  0x9d   : > { %6387 = vmatpush3.bf16.msra.mxu1 %v7250_v23  ;;  %6368 = vmatprep.subr.bf16.mxu0 %v7251_v35  ;;  %v7277_v23 = vld [vmem:[#allocation7 + $0x10] sm:$0xff]  }
  0x9e   : > { %6388 = vmatprep.subr.bf16.mxu1 %v7252_v36 }
  0xa0   : > { %6369 = vmatpush3.bf16.msra.mxu0 %v7251_v35 }
  0xa1   : > { %6389 = vmatpush3.bf16.msra.mxu1 %v7252_v36  ;;  %6370 = vmatprep.subr.bf16.mxu0 %v7253_v44  ;;  %v821_v36 = vsub.s32 0, %v8042_v7 }
  0xa2   : > { %6390 = vmatprep.subr.bf16.mxu1 %v7254_v47 }
  0xa3   : > { %v822_v45 = vrot.slane %v8122_v38, %v821_v36 }
  0xa4   : > { %6371 = vmatpush3.bf16.msra.mxu0 %v7253_v44 }
  0xa5   : > { %6391 = vmatpush3.bf16.msra.mxu1 %v7254_v47  ;;  %6396 = vmatprep.subr.bf16.mxu0 %v7257_v54 }
  0xa6   : > { %6416 = vmatprep.subr.bf16.mxu1 %v7265_v9 }
  0xa7   : > { %6373 = vmatmul.mubr.bf16.vlgmr.msra.gmra.mxu0 %v8056_v22 }
  0xa8   : > { %6393 = vmatmul.mubr.bf16.vlgmr.msra.gmra.mxu1 %v459_v60  ;;  %6397 = vmatpush3.bf16.msra.mxu0 %v7257_v54 }
  0xa9   : > { %6398 = vmatprep.subr.bf16.mxu0 %v7258_v59  ;;  %6412 = vmatprep.mubr.bf16.mxu0 %v699_v61 }
  0xaa   : > { %6417 = vmatpush3.bf16.msra.mxu1 %v7265_v9 }
  0xab   : > { %6418 = vmatprep.subr.bf16.mxu1 %v7266_v10 }
  0xac   : > { %6399 = vmatpush3.bf16.msra.mxu0 %v7258_v59 }
  0xad   : > { %6400 = vmatprep.subr.bf16.mxu0 %v7259_v62 }
  0xae   : > { %6419 = vmatpush3.bf16.msra.mxu1 %v7266_v10 }
  0xaf   : > { %6420 = vmatprep.subr.bf16.mxu1 %v7268_v13 }
  0xb0   : > { %6401 = vmatpush3.bf16.msra.mxu0 %v7259_v62 }
  0xb1   : > { %6402 = vmatprep.subr.bf16.mxu0 %v7260_v63 }
  0xb2   : > { %6421 = vmatpush3.bf16.msra.mxu1 %v7268_v13 }
  0xb3   : > { %6422 = vmatprep.subr.bf16.mxu1 %v7270_v15 }
  0xb4   : > { %6403 = vmatpush3.bf16.msra.mxu0 %v7260_v63 }
  0xb5   : > { %6404 = vmatprep.subr.bf16.mxu0 %v7261_v0 }
  0xb6   : > { %6423 = vmatpush3.bf16.msra.mxu1 %v7270_v15 }
  0xb7   : > { %6424 = vmatprep.subr.bf16.mxu1 %v7272_v17 }
  0xb8   : > { %6405 = vmatpush3.bf16.msra.mxu0 %v7261_v0 }
  0xb9   : > { %6406 = vmatprep.subr.bf16.mxu0 %v7262_v1 }
  0xba   : > { %6425 = vmatpush3.bf16.msra.mxu1 %v7272_v17 }
  0xbb   : > { %6426 = vmatprep.subr.bf16.mxu1 %v7274_v18 }
  0xbc   : > { %6407 = vmatpush3.bf16.msra.mxu0 %v7262_v1 }
  0xbd   : > { %6408 = vmatprep.subr.bf16.mxu0 %v7263_v2 }
  0xbe   : > { %6427 = vmatpush3.bf16.msra.mxu1 %v7274_v18 }
  0xbf   : > { %6428 = vmatprep.subr.bf16.mxu1 %v7276_v20 }
  0xc0   : > { %6409 = vmatpush3.bf16.msra.mxu0 %v7263_v2 }
  0xc1   : > { %6410 = vmatprep.subr.bf16.mxu0 %v7264_v3 }
  0xc2   : > { %6429 = vmatpush3.bf16.msra.mxu1 %v7276_v20 }
  0xc3   : > { %6430 = vmatprep.subr.bf16.mxu1 %v7278_v24 }
  0xc4   : > { %6411 = vmatpush3.bf16.msra.mxu0 %v7264_v3 }
  0xc5   : > { %6436 = vmatprep.subr.bf16.mxu0 %v7267_v11 }
  0xc6   : > { %6431 = vmatpush3.bf16.msra.mxu1 %v7278_v24 }
  0xc7   : > { %6413 = vmatmul.mubr.bf16.vlgmr.msra.gmra.mxu0 %v700_v8  ;;  %6456 = vmatprep.subr.bf16.mxu1 %v7281_v29 }
  0xc8   : > { %6437 = vmatpush3.bf16.msra.mxu0 %v7267_v11 }
  0xc9   : > { %6438 = vmatprep.subr.bf16.mxu0 %v7269_v12 }
  0xcc   : > { %6439 = vmatpush3.bf16.msra.mxu0 %v7269_v12  ;;  %v7282_v12 = vld [vmem:[#allocation7 + $0xb0] sm:$0xff]  }
  0xcd   : > { %6440 = vmatprep.subr.bf16.mxu0 %v7271_v14 }
  0xd0   : > { %6441 = vmatpush3.bf16.msra.mxu0 %v7271_v14 }
  0xd1   : > { %6442 = vmatprep.subr.bf16.mxu0 %v7273_v16 }
  0xd4   : > { %6443 = vmatpush3.bf16.msra.mxu0 %v7273_v16 }
  0xd5   : > { %6444 = vmatprep.subr.bf16.mxu0 %v7275_v19 }
  0xd8   : > { %6445 = vmatpush3.bf16.msra.mxu0 %v7275_v19 }
  0xd9   : > { %6446 = vmatprep.subr.bf16.mxu0 %v7277_v23 }
  0xdc   : > { %6447 = vmatpush3.bf16.msra.mxu0 %v7277_v23 }
  0xdd   : > { %6448 = vmatprep.subr.bf16.mxu0 %v7279_v25 }
  0xe0   : > { %6449 = vmatpush3.bf16.msra.mxu0 %v7279_v25 }
  0xe1   : > { %6450 = vmatprep.subr.bf16.mxu0 %v7280_v26 }
  0xe4   : > { %6451 = vmatpush3.bf16.msra.mxu0 %v7280_v26  ;;  %v7284_v26 = vld [vmem:[#allocation7 + $0xa8] sm:$0xff]  }
  0xe5   : > { %6476 = vmatprep.subr.bf16.mxu0 %v8118_v30 }
 0x167   : > { %v6374_v31 = vpop.f32.mrf.mxu0 }
 0x168   : > { %v6394_v33 = vpop.f32.mrf.mxu1 }
 0x169   : > { %v587_v32 = vpop.f32.mrf.mxu0  ;;  %v693_v39 = vadd.f32 %v6394_v33, %v6374_v31  ;;  %v7285_v31 = vld [vmem:[#allocation8 + $0x30] sm:$0xff]   ;;  %v7288_v33 = vld [vmem:[#allocation7 + $0x98] sm:$0xff]  }
 0x16a   : > { %v684_v35 = vpop.f32.mrf.mxu1 }
 0x16b   : > { %v6375_v34 = vpop.f32.mrf.mxu0  ;;  %v685_v42 = vadd.f32 %v684_v35, %v587_v32  ;;  %v7287_v32 = vld [vmem:[#allocation8 + $0x28] sm:$0xff]   ;;  %v7290_v35 = vld [vmem:[#allocation7 + $0x90] sm:$0xff]  }
 0x16c   : > { %v6395_v40 = vpop.f32.mrf.mxu1 }
 0x16d   : > { %v590_v37 = vpop.f32.mrf.mxu0  ;;  %v696_v48 = vadd.f32 %v6395_v40, %v6375_v34  ;;  %v7289_v34 = vld [vmem:[#allocation8 + $0x20] sm:$0xff]  }
 0x16e   : > { %v687_v50 = vpop.f32.mrf.mxu1  ;;  %v7294_v40 = vld [vmem:[#allocation7 + $0x80] sm:$0xff]  }
 0x16f   : > { %v688_v56 = vadd.f32 %v687_v50, %v590_v37  ;;  %v7291_v37 = vld [vmem:[#allocation8 + $0x18] sm:$0xff]  }
 0x170   : > { %v7297_v50 = vld [vmem:[#allocation5 + $0x138] sm:$0xff]  }
 0x187   : > { %v6414_v41 = vpop.f32.mrf.mxu0 }
 0x188   : > { %v817_v44 = vadd.f32 %v6414_v41, %v693_v39  ;;  %v7293_v39 = vld [vmem:[#allocation8 + $0x10] sm:$0xff]   ;;  %v7295_v41 = vld [vmem:[#allocation8 + $0x8] sm:$0xff]  }
 0x189   : > { %v800_v47 = vpop.f32.mrf.mxu0 }
 0x18a   : > { %v815_v51 = vadd.f32 %v800_v47, %v685_v42  ;;  %v825_v53 = vadd.f32 %v822_v45, %v817_v44 }
 0x18b   : > { %v6415_v52 = vpop.f32.mrf.mxu0 }
 0x18c   : > { %v823_v54 = vadd.f32 %v822_v45, %v815_v51  ;;  %v818_v55 = vadd.f32 %v6415_v52, %v696_v48  ;;  %v8129_v61 = vmax.f32 %v825_v53, 0.0  ;;  %v7298_v51 = vld [vmem:[#allocation5 + $0x130] sm:$0xff]   ;;  %v7299_v52 = vld [vmem:[#allocation5 + $0xf8] sm:$0xff]  }
 0x18d   : > { %v803_v57 = vpop.f32.mrf.mxu0  ;;  %v7301_v53 = vld [vmem:[#allocation5 + $0xf0] sm:$0xff]  }
 0x18e   : > { %v8127_v58 = vmax.f32 %v823_v54, 0.0  ;;  %v826_v59 = vadd.f32 %v822_v45, %v818_v55  ;;  %v816_v60 = vadd.f32 %v803_v57, %v688_v56  ;;  %v833_v3 = vrot.slane %v8129_v61, 7  ;;  %v7300_v54 = vld [vmem:[#allocation5 + $0x128] sm:$0xff]   ;;  %v7302_v55 = vld [vmem:[#allocation5 + $0x120] sm:$0xff]  }
 0x18f   : > { %v845_v4 = vrot.slane %v8129_v61, 1  ;;  %v7303_v56 = vld [vmem:[#allocation5 + $0xe8] sm:$0xff]   ;;  %v7305_v57 = vld [vmem:[#allocation5 + $0xe0] sm:$0xff]  }
 0x190   : > { %v8131_v62 = vmax.f32 %v826_v59, 0.0  ;;  %v824_v63 = vadd.f32 %v822_v45, %v816_v60  ;;  %v831_v0 = vrot.slane %v8127_v58, 7  ;;  %v843_v13 = vrot.slane %v8127_v58, 1  ;;  %v7296_v45 = vld [vmem:[#allocation8] sm:$0xff]   ;;  %v7307_v59 = vld [vmem:[#allocation5 + $0xd8] sm:$0xff]   ;;  %v7308_v60 = vld [vmem:[#allocation5 + $0x108] sm:$0xff]  }
 0x192   : > { %v834_v1 = vrot.slane %v8131_v62, 7  ;;  %v828_v2 = vmax.f32 %v824_v63, 0.0  ;;  %v874_v11 = vpack.c.bf16 %v8131_v62, %v8129_v61  ;;  %v7309_v61 = vld [vmem:[#allocation5 + $0xd0] sm:$0xff]   ;;  %v7311_v63 = vld [vmem:[#allocation5 + $0xc8] sm:$0xff]  }
 0x194   : > { %v838_v5 = vsel %vm436_vm1, %v834_v1, %v831_v0  ;;  %v832_v6 = vrot.slane %v828_v2, 7  ;;  %v844_v8 = vrot.slane %v828_v2, 1  ;;  %v873_v9 = vpack.c.bf16 %v828_v2, %v8127_v58  ;;  %v7306_v58 = vld [vmem:[#allocation5 + $0x110] sm:$0xff]  }
 0x195   : > { %v839_v10 = vmul.f32 %v8065_v28, %v838_v5  ;;  %v835_v20 = vsel %vm436_vm1, %v833_v3, %v834_v1  ;;  %v7313_v1 = vld [vmem:[#allocation5 + $0xc0] sm:$0xff]  }
 0x196   : > { %6432 = vmatprep.mubr.bf16.mxu1 %v873_v9  ;;  %v837_v14 = vsel %vm436_vm1, %v831_v0, %v832_v6  ;;  %v836_v15 = vsel %vm436_vm1, %v832_v6, %v833_v3  ;;  %v848_v16 = vsel %vm449_vm5, %v844_v8, %v845_v4  ;;  %v849_v23 = vsel %vm449_vm5, %v843_v13, %v844_v8  ;;  %v8169_v0 = vld [vmem:[#allocation5 + $0x178] sm:$0xff]  }
 0x197   : > { %6433 = vmatmul.mubr.bf16.vlgmr.msra.gmra.mxu1 %v874_v11  ;;  %v855_v17 = vpack.c.bf16 %v837_v14, %v839_v10  ;;  %v841_v18 = vmul.f32 %v8088_v43, %v836_v15  ;;  %v852_v19 = vmul.f32 %v8095_v46, %v848_v16  ;;  %v1232_v8 = vsub.s32 4, %v8042_v7  ;;  %v354_v11 = vld [vmem:[#allocation10 + $0x8] sm:$0xff] }
 0x198   : > { %6457 = vmatpush3.bf16.msra.mxu1 %v7281_v29  ;;  %v7286_v29 = vld [vmem:[#allocation7 + $0xa0] sm:$0xff]  }
 0x199   : > { %6452 = vmatprep.mubr.bf16.mxu0 %v855_v17  ;;  %6458 = vmatprep.subr.bf16.mxu1 %v7282_v12  ;;  %v856_v24 = vpack.c.bf16 %v835_v20, %v841_v18  ;;  %v1086_v25 = vpack.c.bf16 %v852_v19, %v849_v23  ;;  %v1233_v16 = vrot.slane %v354_v11, %v1232_v8 }
 0x19b   : > { %6453 = vmatmul.mubr.bf16.vlgmr.msra.gmra.mxu0 %v856_v24  ;;  %6472 = vmatprep.mubr.bf16.mxu1 %v1086_v25 }
 0x19c   : > { %6459 = vmatpush3.bf16.msra.mxu1 %v7282_v12  ;;  %6477 = vmatpush3.bf16.msra.mxu0 %v8118_v30  ;;  %v7292_v30 = vld [vmem:[#allocation7 + $0x88] sm:$0xff]   ;;  %v1208_v12 = vsub.s32 6, %v8042_v7 }
 0x19d   : > { %6460 = vmatprep.subr.bf16.mxu1 %v7284_v26  ;;  %6478 = vmatprep.subr.bf16.mxu0 %v7285_v31 }
 0x19e   : > { %6492 = vmatprep.mubr.bf16.mxu0 %v8053_v21  ;;  %v846_v21 = vrot.slane %v8131_v62, 1  ;;  %v7310_v62 = vld [vmem:[#allocation5 + $0x100] sm:$0xff]   ;;  %v1209_v23 = vrot.slane %v8122_v38, %v1208_v12 }
 0x1a0   : > { %6461 = vmatpush3.bf16.msra.mxu1 %v7284_v26  ;;  %6479 = vmatpush3.bf16.msra.mxu0 %v7285_v31  ;;  %v850_v42 = vsel %vm449_vm5, %v846_v21, %v843_v13  ;;  %v847_v47 = vsel %vm449_vm5, %v845_v4, %v846_v21 }
 0x1a1   : > { %6462 = vmatprep.subr.bf16.mxu1 %v7286_v29  ;;  %6480 = vmatprep.subr.bf16.mxu0 %v7287_v32  ;;  %v854_v44 = vmul.f32 %v8102_v49, %v850_v42 }
 0x1a3   : > { %v1087_v48 = vpack.c.bf16 %v854_v44, %v847_v47 }
 0x1a4   : > { %6463 = vmatpush3.bf16.msra.mxu1 %v7286_v29  ;;  %6481 = vmatpush3.bf16.msra.mxu0 %v7287_v32 }
 0x1a5   : > { %6464 = vmatprep.subr.bf16.mxu1 %v7288_v33  ;;  %6482 = vmatprep.subr.bf16.mxu0 %v7289_v34 }
 0x1a8   : > { %6465 = vmatpush3.bf16.msra.mxu1 %v7288_v33  ;;  %6483 = vmatpush3.bf16.msra.mxu0 %v7289_v34 }
 0x1a9   : > { %6466 = vmatprep.subr.bf16.mxu1 %v7290_v35  ;;  %6484 = vmatprep.subr.bf16.mxu0 %v7291_v37 }
 0x1ac   : > { %6467 = vmatpush3.bf16.msra.mxu1 %v7290_v35  ;;  %6485 = vmatpush3.bf16.msra.mxu0 %v7291_v37 }
 0x1ad   : > { %6468 = vmatprep.subr.bf16.mxu1 %v7292_v30  ;;  %6486 = vmatprep.subr.bf16.mxu0 %v7293_v39 }
 0x1b0   : > { %6469 = vmatpush3.bf16.msra.mxu1 %v7292_v30  ;;  %6487 = vmatpush3.bf16.msra.mxu0 %v7293_v39 }
 0x1b1   : > { %6470 = vmatprep.subr.bf16.mxu1 %v7294_v40  ;;  %6488 = vmatprep.subr.bf16.mxu0 %v7295_v41 }
 0x1b4   : > { %6471 = vmatpush3.bf16.msra.mxu1 %v7294_v40  ;;  %6489 = vmatpush3.bf16.msra.mxu0 %v7295_v41 }
 0x1b5   : > { %6490 = vmatprep.subr.bf16.mxu0 %v7296_v45  ;;  %6496 = vmatprep.subr.bf16.mxu1 %v7297_v50 }
 0x1b7   : > { %6473 = vmatmul.mubr.bf16.vlgmr.msra.gmra.mxu1 %v1087_v48 }
 0x1b8   : > { %6491 = vmatpush3.bf16.msra.mxu0 %v7296_v45  ;;  %6497 = vmatpush3.bf16.msra.mxu1 %v7297_v50 }
 0x1b9   : > { %6516 = vmatprep.subr.bf16.mxu0 %v7299_v52  ;;  %6498 = vmatprep.subr.bf16.mxu1 %v7298_v51 }
 0x1bb   : > { %6493 = vmatmul.mubr.bf16.vlgmr.msra.gmra.mxu0 %v8056_v22  ;;  %v7304_v22 = vld [vmem:[#allocation5 + $0x118] sm:$0xff]  }
 0x1bc   : > { %6517 = vmatpush3.bf16.msra.mxu0 %v7299_v52  ;;  %6499 = vmatpush3.bf16.msra.mxu1 %v7298_v51 }
 0x1bd   : > { %6518 = vmatprep.subr.bf16.mxu0 %v7301_v53  ;;  %6500 = vmatprep.subr.bf16.mxu1 %v7300_v54 }
 0x1c0   : > { %6519 = vmatpush3.bf16.msra.mxu0 %v7301_v53  ;;  %6501 = vmatpush3.bf16.msra.mxu1 %v7300_v54 }
 0x1c1   : > { %6502 = vmatprep.subr.bf16.mxu1 %v7302_v55  ;;  %6520 = vmatprep.subr.bf16.mxu0 %v7303_v56 }
 0x1c4   : > { %6503 = vmatpush3.bf16.msra.mxu1 %v7302_v55  ;;  %6521 = vmatpush3.bf16.msra.mxu0 %v7303_v56 }
 0x1c5   : > { %6504 = vmatprep.subr.bf16.mxu1 %v7304_v22  ;;  %6522 = vmatprep.subr.bf16.mxu0 %v7305_v57 }
 0x1c8   : > { %6505 = vmatpush3.bf16.msra.mxu1 %v7304_v22  ;;  %6523 = vmatpush3.bf16.msra.mxu0 %v7305_v57 }
 0x1c9   : > { %6506 = vmatprep.subr.bf16.mxu1 %v7306_v58  ;;  %6524 = vmatprep.subr.bf16.mxu0 %v7307_v59 }
 0x1cc   : > { %6507 = vmatpush3.bf16.msra.mxu1 %v7306_v58  ;;  %6525 = vmatpush3.bf16.msra.mxu0 %v7307_v59 }
 0x1cd   : > { %6508 = vmatprep.subr.bf16.mxu1 %v7308_v60  ;;  %6526 = vmatprep.subr.bf16.mxu0 %v7309_v61 }
 0x1d0   : > { %6509 = vmatpush3.bf16.msra.mxu1 %v7308_v60  ;;  %6527 = vmatpush3.bf16.msra.mxu0 %v7309_v61 }
 0x1d1   : > { %6510 = vmatprep.subr.bf16.mxu1 %v7310_v62  ;;  %6528 = vmatprep.subr.bf16.mxu0 %v7311_v63 }
 0x1d4   : > { %6511 = vmatpush3.bf16.msra.mxu1 %v7310_v62  ;;  %6529 = vmatpush3.bf16.msra.mxu0 %v7311_v63 }
 0x1d5   : > { %6536 = vmatprep.subr.bf16.mxu1 %v8169_v0  ;;  %6530 = vmatprep.subr.bf16.mxu0 %v7313_v1 }
 0x1d8   : > { %6531 = vmatpush3.bf16.msra.mxu0 %v7313_v1 }
 0x257   : > { %v6434_v2 = vpop.f32.mrf.mxu1 }
 0x259   : > { %v974_v3 = vpop.f32.mrf.mxu1 }
 0x25b   : > { %v6454_v4 = vpop.f32.mrf.mxu0  ;;  %v6435_v5 = vpop.f32.mrf.mxu1 }
 0x25c   : > { %v1080_v14 = vadd.f32 %v6454_v4, %v6434_v2  ;;  %v7314_v2 = vld [vmem:[#allocation5 + $0x170] sm:$0xff]  }
 0x25d   : > { %v1071_v6 = vpop.f32.mrf.mxu0  ;;  %v977_v9 = vpop.f32.mrf.mxu1 }
 0x25e   : > { %v1072_v15 = vadd.f32 %v1071_v6, %v974_v3 }
 0x25f   : > { %v6455_v10 = vpop.f32.mrf.mxu0 }
 0x260   : > { %v1083_v19 = vadd.f32 %v6455_v10, %v6435_v5 }
 0x261   : > { %v1074_v17 = vpop.f32.mrf.mxu0 }
 0x262   : > { %v1075_v32 = vadd.f32 %v1074_v17, %v977_v9  ;;  %v7315_v17 = vld [vmem:[#allocation5 + $0x168] sm:$0xff]  }
 0x277   : > { %v6474_v13 = vpop.f32.mrf.mxu1 }
 0x278   : > { %v1204_v20 = vadd.f32 %v6474_v13, %v1080_v14 }
 0x279   : > { %v1187_v18 = vpop.f32.mrf.mxu1 }
 0x27a   : > { %v1202_v24 = vadd.f32 %v1187_v18, %v1072_v15  ;;  %v1212_v35 = vadd.f32 %v1209_v23, %v1204_v20  ;;  %v7316_v18 = vld [vmem:[#allocation5 + $0x160] sm:$0xff]   ;;  %v7319_v20 = vld [vmem:[#allocation5 + $0x148] sm:$0xff]  }
 0x27b   : > { %v6475_v25 = vpop.f32.mrf.mxu1  ;;  %v6494_v26 = vpop.f32.mrf.mxu0 }
 0x27c   : > { %v1205_v31 = vadd.f32 %v6475_v25, %v1083_v19  ;;  %v1325_v29 = vadd.f32 %v6494_v26, %v1233_v16  ;;  %v1210_v37 = vadd.f32 %v1209_v23, %v1202_v24  ;;  %v7317_v19 = vld [vmem:[#allocation5 + $0x158] sm:$0xff]   ;;  %v7320_v24 = vld [vmem:[#allocation5 + $0x140] sm:$0xff]  }
 0x27d   : > { %v1190_v33 = vpop.f32.mrf.mxu1  ;;  %v1316_v34 = vpop.f32.mrf.mxu0 }
 0x27e   : > { %v1317_v30 = vadd.f32 %v1316_v34, %v1233_v16  ;;  %v1203_v39 = vadd.f32 %v1190_v33, %v1075_v32  ;;  %v1213_v40 = vadd.f32 %v1209_v23, %v1205_v31  ;;  %v1333_v41 = vadd.f32 %v1325_v29, %v1212_v35  ;;  %v7321_v32 = vld [vmem:[#allocation7 + $0x138] sm:$0xff]   ;;  %v7322_v33 = vld [vmem:[#allocation7 + $0x130] sm:$0xff]  }
 0x27f   : > { %v6495_v21 = vpop.f32.mrf.mxu0  ;;  %v7323_v34 = vld [vmem:[#allocation7 + $0xf8] sm:$0xff]   ;;  %v7325_v35 = vld [vmem:[#allocation7 + $0xf0] sm:$0xff]   ;;  %6556 = vmatprep.subr.bf16.mxu0 %v7321_v32 }
 0x280   : > { %v1331_v42 = vadd.f32 %v1317_v30, %v1210_v37  ;;  %v1328_v44 = vadd.f32 %v6495_v21, %v1233_v16  ;;  %v1211_v50 = vadd.f32 %v1209_v23, %v1203_v39  ;;  %v8181_v52 = vmax.f32 %v1333_v41, 0.0  ;;  %v7324_v37 = vld [vmem:[#allocation7 + $0x128] sm:$0xff]   ;;  %v7326_v39 = vld [vmem:[#allocation7 + $0x120] sm:$0xff]   ;;  %v7328_v21 = vld [vmem:[#allocation7 + $0x118] sm:$0xff]  }
 0x281   : > { %v1319_v45 = vpop.f32.mrf.mxu0  ;;  %v7327_v30 = vld [vmem:[#allocation7 + $0xe8] sm:$0xff]   ;;  %v7330_v41 = vld [vmem:[#allocation7 + $0x110] sm:$0xff]  }
 0x282   : > { %v8179_v47 = vmax.f32 %v1331_v42, 0.0  ;;  %v1334_v48 = vadd.f32 %v1328_v44, %v1213_v40  ;;  %v1320_v51 = vadd.f32 %v1319_v45, %v1233_v16  ;;  %v1341_v57 = vrot.slane %v8181_v52, 7  ;;  %v7329_v40 = vld [vmem:[#allocation7 + $0xe0] sm:$0xff]   ;;  %v7331_v42 = vld [vmem:[#allocation7 + $0xd8] sm:$0xff]   ;;  %v7332_v44 = vld [vmem:[#allocation7 + $0x108] sm:$0xff]  }
 0x283   : > { %v1353_v58 = vrot.slane %v8181_v52, 1  ;;  %v7333_v45 = vld [vmem:[#allocation7 + $0xd0] sm:$0xff]  }
 0x284   : > { %v8183_v53 = vmax.f32 %v1334_v48, 0.0  ;;  %v1332_v54 = vadd.f32 %v1320_v51, %v1211_v50  ;;  %v1339_v56 = vrot.slane %v8179_v47, 7  ;;  %v1351_v5 = vrot.slane %v8179_v47, 1  ;;  %v7334_v48 = vld [vmem:[#allocation7 + $0x100] sm:$0xff]   ;;  %v7335_v50 = vld [vmem:[#allocation7 + $0xc8] sm:$0xff]   ;;  %v7336_v51 = vld [vmem:[#allocation7 + $0x178] sm:$0xff]  }
 0x286   : > { %v1342_v55 = vrot.slane %v8183_v53, 7  ;;  %v8187_v22 = vmax.f32 %v1332_v54, 0.0  ;;  %v1383_v1 = vpack.c.bf16 %v8183_v53, %v8181_v52  ;;  %v1354_v23 = vrot.slane %v8183_v53, 1  ;;  %v7337_v54 = vld [vmem:[#allocation7 + $0xc0] sm:$0xff]  }
 0x288   : > { %v1346_v59 = vsel %vm436_vm1, %v1342_v55, %v1339_v56  ;;  %v1382_v60 = vpack.c.bf16 %v8187_v22, %v8179_v47  ;;  %v1340_v61 = vrot.slane %v8187_v22, 7  ;;  %v1352_v63 = vrot.slane %v8187_v22, 1 }
 0x289   : > { %v1347_v62 = vmul.f32 %v8065_v28, %v1346_v59  ;;  %v1343_v13 = vsel %vm436_vm1, %v1341_v57, %v1342_v55  ;;  %v1358_v25 = vsel %vm449_vm5, %v1354_v23, %v1351_v5  ;;  %v1355_v31 = vsel %vm449_vm5, %v1353_v58, %v1354_v23 }
 0x28a   : > { %6512 = vmatprep.mubr.bf16.mxu1 %v1382_v60  ;;  %v1345_v3 = vsel %vm436_vm1, %v1339_v56, %v1340_v61  ;;  %v1344_v4 = vsel %vm436_vm1, %v1340_v61, %v1341_v57  ;;  %v1356_v6 = vsel %vm449_vm5, %v1352_v63, %v1353_v58  ;;  %v1357_v14 = vsel %vm449_vm5, %v1351_v5, %v1352_v63 }
 0x28b   : > { %6513 = vmatmul.mubr.bf16.vlgmr.msra.gmra.mxu1 %v1383_v1  ;;  %v1363_v9 = vpack.c.bf16 %v1345_v3, %v1347_v62  ;;  %v1349_v10 = vmul.f32 %v8088_v43, %v1344_v4  ;;  %v1360_v11 = vmul.f32 %v8095_v46, %v1356_v6  ;;  %v1362_v26 = vmul.f32 %v8102_v49, %v1358_v25 }
 0x28c   : > { %6537 = vmatpush3.bf16.msra.mxu1 %v8169_v0  ;;  %v7318_v0 = vld [vmem:[#allocation5 + $0x150] sm:$0xff]   ;;  %v1717_v60 = vsub.s32 1, %v8042_v7 }
 0x28d   : > { %6532 = vmatprep.mubr.bf16.mxu0 %v1363_v9  ;;  %6538 = vmatprep.subr.bf16.mxu1 %v7314_v2  ;;  %v1364_v15 = vpack.c.bf16 %v1343_v13, %v1349_v10  ;;  %v1595_v16 = vpack.c.bf16 %v1360_v11, %v1357_v14  ;;  %v1596_v29 = vpack.c.bf16 %v1362_v26, %v1355_v31 }
 0x28e   : > { %v1718_v4 = vrot.slane %v8122_v38, %v1717_v60 }
 0x28f   : > { %6533 = vmatmul.mubr.bf16.vlgmr.msra.gmra.mxu0 %v1364_v15  ;;  %6552 = vmatprep.mubr.bf16.mxu1 %v1595_v16 }
 0x290   : > { %6539 = vmatpush3.bf16.msra.mxu1 %v7314_v2  ;;  %6557 = vmatpush3.bf16.msra.mxu0 %v7321_v32 }
 0x291   : > { %6540 = vmatprep.subr.bf16.mxu1 %v7315_v17  ;;  %6558 = vmatprep.subr.bf16.mxu0 %v7322_v33 }
 0x294   : > { %6541 = vmatpush3.bf16.msra.mxu1 %v7315_v17  ;;  %6559 = vmatpush3.bf16.msra.mxu0 %v7322_v33 }
 0x295   : > { %6542 = vmatprep.subr.bf16.mxu1 %v7316_v18  ;;  %6560 = vmatprep.subr.bf16.mxu0 %v7324_v37 }
 0x298   : > { %6543 = vmatpush3.bf16.msra.mxu1 %v7316_v18  ;;  %6561 = vmatpush3.bf16.msra.mxu0 %v7324_v37 }
 0x299   : > { %6544 = vmatprep.subr.bf16.mxu1 %v7317_v19  ;;  %6562 = vmatprep.subr.bf16.mxu0 %v7326_v39 }
 0x29c   : > { %6545 = vmatpush3.bf16.msra.mxu1 %v7317_v19  ;;  %6563 = vmatpush3.bf16.msra.mxu0 %v7326_v39 }
 0x29d   : > { %6546 = vmatprep.subr.bf16.mxu1 %v7318_v0  ;;  %6564 = vmatprep.subr.bf16.mxu0 %v7328_v21 }
 0x2a0   : > { %6547 = vmatpush3.bf16.msra.mxu1 %v7318_v0  ;;  %6565 = vmatpush3.bf16.msra.mxu0 %v7328_v21  ;;  %v7338_v21 = vld [vmem:[#allocation7 + $0x170] sm:$0xff]  }
 0x2a1   : > { %6548 = vmatprep.subr.bf16.mxu1 %v7319_v20  ;;  %6566 = vmatprep.subr.bf16.mxu0 %v7330_v41 }
 0x2a4   : > { %6549 = vmatpush3.bf16.msra.mxu1 %v7319_v20  ;;  %6567 = vmatpush3.bf16.msra.mxu0 %v7330_v41 }
 0x2a5   : > { %6550 = vmatprep.subr.bf16.mxu1 %v7320_v24  ;;  %6568 = vmatprep.subr.bf16.mxu0 %v7332_v44 }
 0x2a8   : > { %6551 = vmatpush3.bf16.msra.mxu1 %v7320_v24  ;;  %6569 = vmatpush3.bf16.msra.mxu0 %v7332_v44 }
 0x2a9   : > { %6576 = vmatprep.subr.bf16.mxu1 %v7323_v34  ;;  %6570 = vmatprep.subr.bf16.mxu0 %v7334_v48 }
 0x2ab   : > { %6553 = vmatmul.mubr.bf16.vlgmr.msra.gmra.mxu1 %v1596_v29 }
 0x2ac   : > { %6577 = vmatpush3.bf16.msra.mxu1 %v7323_v34  ;;  %6571 = vmatpush3.bf16.msra.mxu0 %v7334_v48 }
 0x2ad   : > { %6578 = vmatprep.subr.bf16.mxu1 %v7325_v35  ;;  %6596 = vmatprep.subr.bf16.mxu0 %v7336_v51 }
 0x2b0   : > { %6579 = vmatpush3.bf16.msra.mxu1 %v7325_v35 }
 0x2b1   : > { %6580 = vmatprep.subr.bf16.mxu1 %v7327_v30 }
 0x2b4   : > { %6581 = vmatpush3.bf16.msra.mxu1 %v7327_v30 }
 0x2b5   : > { %6582 = vmatprep.subr.bf16.mxu1 %v7329_v40 }
 0x2b8   : > { %6583 = vmatpush3.bf16.msra.mxu1 %v7329_v40 }
 0x2b9   : > { %6584 = vmatprep.subr.bf16.mxu1 %v7331_v42 }
 0x2bc   : > { %6585 = vmatpush3.bf16.msra.mxu1 %v7331_v42 }
 0x2bd   : > { %6586 = vmatprep.subr.bf16.mxu1 %v7333_v45 }
 0x2c0   : > { %6587 = vmatpush3.bf16.msra.mxu1 %v7333_v45 }
 0x2c1   : > { %6588 = vmatprep.subr.bf16.mxu1 %v7335_v50 }
 0x2c4   : > { %6589 = vmatpush3.bf16.msra.mxu1 %v7335_v50 }
 0x2c5   : > { %6590 = vmatprep.subr.bf16.mxu1 %v7337_v54 }
 0x2c8   : > { %6591 = vmatpush3.bf16.msra.mxu1 %v7337_v54 }
 0x34b   : > { %v6514_v55 = vpop.f32.mrf.mxu1 }
 0x34d   : > { %v1483_v56 = vpop.f32.mrf.mxu1 }
 0x34f   : > { %v6534_v57 = vpop.f32.mrf.mxu0  ;;  %v6515_v58 = vpop.f32.mrf.mxu1 }
 0x350   : > { %v1589_v62 = vadd.f32 %v6534_v57, %v6514_v55 }
 0x351   : > { %v1580_v59 = vpop.f32.mrf.mxu0  ;;  %v1486_v61 = vpop.f32.mrf.mxu1 }
 0x352   : > { %v1581_v2 = vadd.f32 %v1580_v59, %v1483_v56  ;;  %v7340_v59 = vld [vmem:[#allocation7 + $0x160] sm:$0xff]  }
 0x353   : > { %v6535_v63 = vpop.f32.mrf.mxu0 }
 0x354   : > { %v1592_v6 = vadd.f32 %v6535_v63, %v6515_v58  ;;  %v7339_v58 = vld [vmem:[#allocation7 + $0x168] sm:$0xff]  }
 0x355   : > { %v1583_v9 = vpop.f32.mrf.mxu0 }
 0x356   : > { %v1584_v16 = vadd.f32 %v1583_v9, %v1486_v61  ;;  %v7341_v61 = vld [vmem:[#allocation7 + $0x158] sm:$0xff]   ;;  %v7346_v9 = vld [vmem:[#allocation5 + $0x1f0] sm:$0xff]  }
 0x36b   : > { %v6554_v1 = vpop.f32.mrf.mxu1 }
 0x36c   : > { %v1713_v3 = vadd.f32 %v6554_v1, %v1589_v62  ;;  %v7343_v62 = vld [vmem:[#allocation7 + $0x148] sm:$0xff]   ;;  %v7344_v1 = vld [vmem:[#allocation7 + $0x140] sm:$0xff]  }
 0x36d   : > { %v1696_v5 = vpop.f32.mrf.mxu1 }
 0x36e   : > { %v1711_v10 = vadd.f32 %v1696_v5, %v1581_v2  ;;  %v1721_v13 = vadd.f32 %v1718_v4, %v1713_v3 }
 0x36f   : > { %v6555_v11 = vpop.f32.mrf.mxu1 }
 0x370   : > { %v1719_v14 = vadd.f32 %v1718_v4, %v1711_v10  ;;  %v1714_v15 = vadd.f32 %v6555_v11, %v1592_v6  ;;  %v1725_v20 = vmax.f32 %v1721_v13, 0.0  ;;  %v7345_v6 = vld [vmem:[#allocation5 + $0x1f8] sm:$0xff]   ;;  %v7349_v11 = vld [vmem:[#allocation5 + $0x1b0] sm:$0xff]   ;;  %v7348_v13 = vld [vmem:[#allocation5 + $0x1e8] sm:$0xff]  }
 0x371   : > { %v1699_v17 = vpop.f32.mrf.mxu1  ;;  %v7347_v10 = vld [vmem:[#allocation5 + $0x1b8] sm:$0xff]   ;;  %6616 = vmatprep.subr.bf16.mxu1 %v7345_v6 }
 0x372   : > { %v1723_v18 = vmax.f32 %v1719_v14, 0.0  ;;  %v1722_v19 = vadd.f32 %v1718_v4, %v1714_v15  ;;  %v1712_v0 = vadd.f32 %v1699_v17, %v1584_v16  ;;  %v1729_v29 = vrot.slane %v1725_v20, 7  ;;  %v7351_v14 = vld [vmem:[#allocation5 + $0x1a8] sm:$0xff]   ;;  %v7350_v15 = vld [vmem:[#allocation5 + $0x1e0] sm:$0xff]   ;;  %v7352_v16 = vld [vmem:[#allocation5 + $0x1d8] sm:$0xff]  }
 0x373   : > { %v1741_v32 = vrot.slane %v1725_v20, 1  ;;  %v7353_v17 = vld [vmem:[#allocation5 + $0x1a0] sm:$0xff]  }
 0x374   : > { %v1726_v23 = vmax.f32 %v1722_v19, 0.0  ;;  %v1720_v24 = vadd.f32 %v1718_v4, %v1712_v0  ;;  %v1727_v25 = vrot.slane %v1723_v18, 7  ;;  %v1739_v40 = vrot.slane %v1723_v18, 1  ;;  %v7355_v19 = vld [vmem:[#allocation5 + $0x198] sm:$0xff]   ;;  %v7356_v0 = vld [vmem:[#allocation5 + $0x1c8] sm:$0xff]  }
 0x376   : > { %v1730_v26 = vrot.slane %v1726_v23, 7  ;;  %v1724_v31 = vmax.f32 %v1720_v24, 0.0  ;;  %v1771_v39 = vpack.c.bf16 %v1726_v23, %v1725_v20  ;;  %v1742_v63 = vrot.slane %v1726_v23, 1  ;;  %v7357_v20 = vld [vmem:[#allocation5 + $0x190] sm:$0xff]   ;;  %v7358_v23 = vld [vmem:[#allocation5 + $0x1c0] sm:$0xff]   ;;  %v7359_v24 = vld [vmem:[#allocation5 + $0x188] sm:$0xff]  }
 0x378   : > { %v1734_v33 = vsel %vm436_vm1, %v1730_v26, %v1727_v25  ;;  %v1728_v34 = vrot.slane %v1724_v31, 7  ;;  %v1740_v35 = vrot.slane %v1724_v31, 1  ;;  %v1770_v37 = vpack.c.bf16 %v1724_v31, %v1723_v18  ;;  %v7354_v18 = vld [vmem:[#allocation5 + $0x1d0] sm:$0xff]  }
 0x379   : > { %v1735_v30 = vmul.f32 %v8065_v28, %v1734_v33  ;;  %v1731_v54 = vsel %vm436_vm1, %v1729_v29, %v1730_v26  ;;  %v1746_v2 = vsel %vm449_vm5, %v1742_v63, %v1739_v40  ;;  %v1743_v4 = vsel %vm449_vm5, %v1741_v32, %v1742_v63  ;;  %v7361_v26 = vld [vmem:[#allocation5 + $0x180] sm:$0xff]  }
 0x37a   : > { %6572 = vmatprep.mubr.bf16.mxu0 %v1770_v37  ;;  %v1733_v41 = vsel %vm436_vm1, %v1727_v25, %v1728_v34  ;;  %v1732_v42 = vsel %vm436_vm1, %v1728_v34, %v1729_v29  ;;  %v1744_v44 = vsel %vm449_vm5, %v1740_v35, %v1741_v32  ;;  %v1745_v55 = vsel %vm449_vm5, %v1739_v40, %v1740_v35  ;;  %v7360_v25 = vld [vmem:[#allocation5 + $0x238] sm:$0xff]  }
 0x37b   : > { %6573 = vmatmul.mubr.bf16.vlgmr.msra.gmra.mxu0 %v1771_v39  ;;  %v1751_v45 = vpack.c.bf16 %v1733_v41, %v1735_v30  ;;  %v1737_v48 = vmul.f32 %v8088_v43, %v1732_v42  ;;  %v1748_v50 = vmul.f32 %v8095_v46, %v1744_v44  ;;  %v1750_v3 = vmul.f32 %v8102_v49, %v1746_v2 }
 0x37c   : > { %6597 = vmatpush3.bf16.msra.mxu0 %v7336_v51  ;;  %v7342_v51 = vld [vmem:[#allocation7 + $0x150] sm:$0xff]   ;;  %v2105_v35 = vsub.s32 7, %v8042_v7 }
 0x37d   : > { %6592 = vmatprep.mubr.bf16.mxu1 %v1751_v45  ;;  %6598 = vmatprep.subr.bf16.mxu0 %v7338_v21  ;;  %v1752_v56 = vpack.c.bf16 %v1731_v54, %v1737_v48  ;;  %v1983_v57 = vpack.c.bf16 %v1748_v50, %v1745_v55  ;;  %v1984_v5 = vpack.c.bf16 %v1750_v3, %v1743_v4 }
 0x37f   : > { %6593 = vmatmul.mubr.bf16.vlgmr.msra.gmra.mxu1 %v1752_v56  ;;  %6612 = vmatprep.mubr.bf16.mxu0 %v1983_v57 }
 0x380   : > { %6599 = vmatpush3.bf16.msra.mxu0 %v7338_v21  ;;  %6617 = vmatpush3.bf16.msra.mxu1 %v7345_v6  ;;  %v2106_v21 = vrot.slane %v8122_v38, %v2105_v35  ;;  %v7365_v35 = vld [vmem:[#allocation5 + $0x218] sm:$0xff]  }
 0x381   : > { %6600 = vmatprep.subr.bf16.mxu0 %v7339_v58  ;;  %6618 = vmatprep.subr.bf16.mxu1 %v7346_v9 }
 0x384   : > { %6601 = vmatpush3.bf16.msra.mxu0 %v7339_v58  ;;  %6619 = vmatpush3.bf16.msra.mxu1 %v7346_v9 }
 0x385   : > { %6602 = vmatprep.subr.bf16.mxu0 %v7340_v59  ;;  %6620 = vmatprep.subr.bf16.mxu1 %v7348_v13 }
 0x388   : > { %6603 = vmatpush3.bf16.msra.mxu0 %v7340_v59  ;;  %6621 = vmatpush3.bf16.msra.mxu1 %v7348_v13 }
 0x389   : > { %6604 = vmatprep.subr.bf16.mxu0 %v7341_v61  ;;  %6622 = vmatprep.subr.bf16.mxu1 %v7350_v15 }
 0x38c   : > { %6605 = vmatpush3.bf16.msra.mxu0 %v7341_v61  ;;  %6623 = vmatpush3.bf16.msra.mxu1 %v7350_v15 }
 0x38d   : > { %6606 = vmatprep.subr.bf16.mxu0 %v7342_v51  ;;  %6624 = vmatprep.subr.bf16.mxu1 %v7352_v16 }
 0x390   : > { %6607 = vmatpush3.bf16.msra.mxu0 %v7342_v51  ;;  %6625 = vmatpush3.bf16.msra.mxu1 %v7352_v16 }
 0x391   : > { %6608 = vmatprep.subr.bf16.mxu0 %v7343_v62  ;;  %6626 = vmatprep.subr.bf16.mxu1 %v7354_v18 }
 0x394   : > { %6609 = vmatpush3.bf16.msra.mxu0 %v7343_v62  ;;  %6627 = vmatpush3.bf16.msra.mxu1 %v7354_v18 }
 0x395   : > { %6610 = vmatprep.subr.bf16.mxu0 %v7344_v1  ;;  %6628 = vmatprep.subr.bf16.mxu1 %v7356_v0 }
 0x398   : > { %6611 = vmatpush3.bf16.msra.mxu0 %v7344_v1  ;;  %6629 = vmatpush3.bf16.msra.mxu1 %v7356_v0 }
 0x399   : > { %6636 = vmatprep.subr.bf16.mxu0 %v7347_v10  ;;  %6630 = vmatprep.subr.bf16.mxu1 %v7358_v23 }
 0x39b   : > { %6613 = vmatmul.mubr.bf16.vlgmr.msra.gmra.mxu0 %v1984_v5 }
 0x39c   : > { %6637 = vmatpush3.bf16.msra.mxu0 %v7347_v10  ;;  %6631 = vmatpush3.bf16.msra.mxu1 %v7358_v23 }
 0x39d   : > { %6638 = vmatprep.subr.bf16.mxu0 %v7349_v11  ;;  %6656 = vmatprep.subr.bf16.mxu1 %v7360_v25 }
 0x3a0   : > { %6639 = vmatpush3.bf16.msra.mxu0 %v7349_v11 }
 0x3a1   : > { %6640 = vmatprep.subr.bf16.mxu0 %v7351_v14 }
 0x3a4   : > { %6641 = vmatpush3.bf16.msra.mxu0 %v7351_v14 }
 0x3a5   : > { %6642 = vmatprep.subr.bf16.mxu0 %v7353_v17 }
 0x3a8   : > { %6643 = vmatpush3.bf16.msra.mxu0 %v7353_v17  ;;  %v7362_v17 = vld [vmem:[#allocation5 + $0x230] sm:$0xff]  }
 0x3a9   : > { %6644 = vmatprep.subr.bf16.mxu0 %v7355_v19 }
 0x3ac   : > { %6645 = vmatpush3.bf16.msra.mxu0 %v7355_v19 }
 0x3ad   : > { %6646 = vmatprep.subr.bf16.mxu0 %v7357_v20 }
 0x3b0   : > { %6647 = vmatpush3.bf16.msra.mxu0 %v7357_v20 }
 0x3b1   : > { %6648 = vmatprep.subr.bf16.mxu0 %v7359_v24 }
 0x3b4   : > { %6649 = vmatpush3.bf16.msra.mxu0 %v7359_v24 }
 0x3b5   : > { %6650 = vmatprep.subr.bf16.mxu0 %v7361_v26 }
 0x3b8   : > { %6651 = vmatpush3.bf16.msra.mxu0 %v7361_v26 }
 0x43b   : > { %v6574_v31 = vpop.f32.mrf.mxu0 }
 0x43d   : > { %v1871_v29 = vpop.f32.mrf.mxu0 }
 0x43f   : > { %v6594_v32 = vpop.f32.mrf.mxu1  ;;  %v6575_v33 = vpop.f32.mrf.mxu0 }
 0x440   : > { %v1977_v39 = vadd.f32 %v6594_v32, %v6574_v31 }
 0x441   : > { %v1968_v34 = vpop.f32.mrf.mxu1  ;;  %v1874_v37 = vpop.f32.mrf.mxu0 }
 0x442   : > { %v1969_v41 = vadd.f32 %v1968_v34, %v1871_v29  ;;  %v7364_v34 = vld [vmem:[#allocation5 + $0x220] sm:$0xff]  }
 0x443   : > { %v6595_v30 = vpop.f32.mrf.mxu1 }
 0x444   : > { %v1980_v48 = vadd.f32 %v6595_v30, %v6575_v33  ;;  %v7363_v33 = vld [vmem:[#allocation5 + $0x228] sm:$0xff]  }
 0x445   : > { %v1971_v44 = vpop.f32.mrf.mxu1 }
 0x446   : > { %v1972_v56 = vadd.f32 %v1971_v44, %v1874_v37  ;;  %v7367_v37 = vld [vmem:[#allocation5 + $0x208] sm:$0xff]   ;;  %v7369_v44 = vld [vmem:[#allocation7 + $0x1f8] sm:$0xff]  }
 0x447   : > { %6676 = vmatprep.subr.bf16.mxu0 %v7369_v44 }
 0x45b   : > { %v6614_v40 = vpop.f32.mrf.mxu0 }
 0x45c   : > { %v2101_v42 = vadd.f32 %v6614_v40, %v1977_v39  ;;  %v7368_v39 = vld [vmem:[#allocation5 + $0x200] sm:$0xff]  }
 0x45d   : > { %v2084_v45 = vpop.f32.mrf.mxu0 }
 0x45e   : > { %v2109_v50 = vadd.f32 %v2106_v21, %v2101_v42  ;;  %v2099_v54 = vadd.f32 %v2084_v45, %v1969_v41  ;;  %v7370_v45 = vld [vmem:[#allocation7 + $0x1f0] sm:$0xff]  }
 0x45f   : > { %v6615_v55 = vpop.f32.mrf.mxu0 }
 0x460   : > { %v2107_v57 = vadd.f32 %v2106_v21, %v2099_v54  ;;  %v2102_v58 = vadd.f32 %v6615_v55, %v1980_v48  ;;  %v2113_v61 = vadd.f32 %v2109_v50, %v8181_v52  ;;  %v7371_v48 = vld [vmem:[#allocation7 + $0x1b8] sm:$0xff]   ;;  %v7373_v50 = vld [vmem:[#allocation7 + $0x1b0] sm:$0xff]   ;;  %v7372_v54 = vld [vmem:[#allocation7 + $0x1e8] sm:$0xff]  }
 0x461   : > { %v2087_v59 = vpop.f32.mrf.mxu0  ;;  %v7375_v55 = vld [vmem:[#allocation7 + $0x1a8] sm:$0xff]  }
 0x462   : > { %v2111_v51 = vadd.f32 %v2107_v57, %v8179_v47  ;;  %v2110_v62 = vadd.f32 %v2106_v21, %v2102_v58  ;;  %v2100_v63 = vadd.f32 %v2087_v59, %v1972_v56  ;;  %v2117_v3 = vmax.f32 %v2113_v61, 0.0  ;;  %v7374_v56 = vld [vmem:[#allocation7 + $0x1e0] sm:$0xff]   ;;  %v7376_v58 = vld [vmem:[#allocation7 + $0x1d8] sm:$0xff]   ;;  %v7378_v59 = vld [vmem:[#allocation7 + $0x1d0] sm:$0xff]  }
 0x463   : > { %v7377_v57 = vld [vmem:[#allocation7 + $0x1a0] sm:$0xff]   ;;  %v7379_v61 = vld [vmem:[#allocation7 + $0x198] sm:$0xff]  }
 0x464   : > { %v2115_v38 = vmax.f32 %v2111_v51, 0.0  ;;  %v2114_v1 = vadd.f32 %v2110_v62, %v8183_v53  ;;  %v2108_v2 = vadd.f32 %v2106_v21, %v2100_v63  ;;  %v2121_v11 = vrot.slane %v2117_v3, 7  ;;  %v7380_v51 = vld [vmem:[#allocation7 + $0x1c8] sm:$0xff]   ;;  %v7381_v62 = vld [vmem:[#allocation7 + $0x190] sm:$0xff]   ;;  %v7382_v63 = vld [vmem:[#allocation7 + $0x1c0] sm:$0xff]  }
 0x465   : > { %v2133_v13 = vrot.slane %v2117_v3, 1 }
 0x466   : > { %v2118_v4 = vmax.f32 %v2114_v1, 0.0  ;;  %v2112_v5 = vadd.f32 %v2108_v2, %v8187_v22  ;;  %v2119_v9 = vrot.slane %v2115_v38, 7  ;;  %v2131_v19 = vrot.slane %v2115_v38, 1  ;;  %v7384_v1 = vld [vmem:[#allocation7 + $0x180] sm:$0xff]   ;;  %v7385_v2 = vld [vmem:[#allocation7 + $0x238] sm:$0xff]  }
 0x468   : > { %v2122_v6 = vrot.slane %v2118_v4, 7  ;;  %v2116_v10 = vmax.f32 %v2112_v5, 0.0  ;;  %v8255_v53 = vpack.c.bf16 %v2118_v4, %v2117_v3  ;;  %v2134_v30 = vrot.slane %v2118_v4, 1  ;;  %v8276_v3 = vld [vmem:[#allocation8 + $0x78] sm:$0xff]  }
 0x46a   : > { %v2126_v52 = vsel %vm436_vm1, %v2122_v6, %v2119_v9  ;;  %v8252_v14 = vpack.c.bf16 %v2116_v10, %v2115_v38  ;;  %v2120_v47 = vrot.slane %v2116_v10, 7  ;;  %v2132_v16 = vrot.slane %v2116_v10, 1  ;;  %v7383_v38 = vld [vmem:[#allocation7 + $0x188] sm:$0xff]  }
 0x46b   : > { %v2127_v15 = vmul.f32 %v8065_v28, %v2126_v52  ;;  %v2123_v26 = vsel %vm436_vm1, %v2121_v11, %v2122_v6  ;;  %v2138_v21 = vsel %vm449_vm5, %v2134_v30, %v2131_v19  ;;  %v2135_v41 = vsel %vm449_vm5, %v2133_v13, %v2134_v30 }
 0x46c   : > { %6632 = vmatprep.mubr.bf16.mxu1 %v8252_v14  ;;  %v2125_v22 = vsel %vm436_vm1, %v2119_v9, %v2120_v47  ;;  %v2124_v18 = vsel %vm436_vm1, %v2120_v47, %v2121_v11  ;;  %v2136_v0 = vsel %vm449_vm5, %v2132_v16, %v2133_v13  ;;  %v2137_v31 = vsel %vm449_vm5, %v2131_v19, %v2132_v16 }
 0x46d   : > { %6633 = vmatmul.mubr.bf16.vlgmr.msra.gmra.mxu1 %v8255_v53  ;;  %v2143_v20 = vpack.c.bf16 %v2125_v22, %v2127_v15  ;;  %v2129_v23 = vmul.f32 %v8088_v43, %v2124_v18  ;;  %v2140_v24 = vmul.f32 %v8095_v46, %v2136_v0  ;;  %v2142_v40 = vmul.f32 %v8102_v49, %v2138_v21  ;;  %v8280_v22 = vld [vmem:[#allocation10] sm:$0xff] }
 0x46e   : > { %6657 = vmatpush3.bf16.msra.mxu1 %v7360_v25  ;;  %v7366_v25 = vld [vmem:[#allocation5 + $0x210] sm:$0xff]   ;;  %v2497_v11 = vsub.s32 2, %v8042_v7 }
 0x46f   : > { %6652 = vmatprep.mubr.bf16.mxu0 %v2143_v20  ;;  %6658 = vmatprep.subr.bf16.mxu1 %v7362_v17  ;;  %v2144_v29 = vpack.c.bf16 %v2123_v26, %v2129_v23  ;;  %v2375_v32 = vpack.c.bf16 %v2140_v24, %v2137_v31  ;;  %v2376_v42 = vpack.c.bf16 %v2142_v40, %v2135_v41 }
 0x470   : > { %v2498_v18 = vrot.slane %v8280_v22, %v2497_v11 }
 0x471   : > { %6653 = vmatmul.mubr.bf16.vlgmr.msra.gmra.mxu0 %v2144_v29  ;;  %6672 = vmatprep.mubr.bf16.mxu1 %v2375_v32 }
 0x472   : > { %6659 = vmatpush3.bf16.msra.mxu1 %v7362_v17  ;;  %6677 = vmatpush3.bf16.msra.mxu0 %v7369_v44 }
 0x473   : > { %6660 = vmatprep.subr.bf16.mxu1 %v7363_v33  ;;  %6678 = vmatprep.subr.bf16.mxu0 %v7370_v45 }
 0x476   : > { %6661 = vmatpush3.bf16.msra.mxu1 %v7363_v33  ;;  %6679 = vmatpush3.bf16.msra.mxu0 %v7370_v45 }
 0x477   : > { %6662 = vmatprep.subr.bf16.mxu1 %v7364_v34  ;;  %6680 = vmatprep.subr.bf16.mxu0 %v7372_v54 }
 0x47a   : > { %6663 = vmatpush3.bf16.msra.mxu1 %v7364_v34  ;;  %6681 = vmatpush3.bf16.msra.mxu0 %v7372_v54 }
 0x47b   : > { %6664 = vmatprep.subr.bf16.mxu1 %v7365_v35  ;;  %6682 = vmatprep.subr.bf16.mxu0 %v7374_v56 }
 0x47e   : > { %6665 = vmatpush3.bf16.msra.mxu1 %v7365_v35  ;;  %6683 = vmatpush3.bf16.msra.mxu0 %v7374_v56 }
 0x47f   : > { %6666 = vmatprep.subr.bf16.mxu1 %v7366_v25  ;;  %6684 = vmatprep.subr.bf16.mxu0 %v7376_v58 }
 0x482   : > { %6667 = vmatpush3.bf16.msra.mxu1 %v7366_v25  ;;  %6685 = vmatpush3.bf16.msra.mxu0 %v7376_v58 }
 0x483   : > { %6668 = vmatprep.subr.bf16.mxu1 %v7367_v37  ;;  %6686 = vmatprep.subr.bf16.mxu0 %v7378_v59 }
 0x486   : > { %6669 = vmatpush3.bf16.msra.mxu1 %v7367_v37  ;;  %6687 = vmatpush3.bf16.msra.mxu0 %v7378_v59 }
 0x487   : > { %6670 = vmatprep.subr.bf16.mxu1 %v7368_v39  ;;  %6688 = vmatprep.subr.bf16.mxu0 %v7380_v51 }
 0x48a   : > { %6671 = vmatpush3.bf16.msra.mxu1 %v7368_v39  ;;  %6689 = vmatpush3.bf16.msra.mxu0 %v7380_v51 }
 0x48b   : > { %6696 = vmatprep.subr.bf16.mxu1 %v7371_v48  ;;  %6690 = vmatprep.subr.bf16.mxu0 %v7382_v63 }
 0x48d   : > { %6673 = vmatmul.mubr.bf16.vlgmr.msra.gmra.mxu1 %v2376_v42 }
 0x48e   : > { %6697 = vmatpush3.bf16.msra.mxu1 %v7371_v48  ;;  %6691 = vmatpush3.bf16.msra.mxu0 %v7382_v63 }
 0x48f   : > { %6698 = vmatprep.subr.bf16.mxu1 %v7373_v50  ;;  %6716 = vmatprep.subr.bf16.mxu0 %v7385_v2 }
 0x492   : > { %6699 = vmatpush3.bf16.msra.mxu1 %v7373_v50 }
 0x493   : > { %6700 = vmatprep.subr.bf16.mxu1 %v7375_v55 }
 0x496   : > { %6701 = vmatpush3.bf16.msra.mxu1 %v7375_v55 }
 0x497   : > { %6702 = vmatprep.subr.bf16.mxu1 %v7377_v57 }
 0x49a   : > { %6703 = vmatpush3.bf16.msra.mxu1 %v7377_v57  ;;  %v7386_v57 = vld [vmem:[#allocation7 + $0x230] sm:$0xff]  }
 0x49b   : > { %6704 = vmatprep.subr.bf16.mxu1 %v7379_v61 }
 0x49e   : > { %6705 = vmatpush3.bf16.msra.mxu1 %v7379_v61 }
 0x49f   : > { %6706 = vmatprep.subr.bf16.mxu1 %v7381_v62 }
 0x4a2   : > { %6707 = vmatpush3.bf16.msra.mxu1 %v7381_v62 }
 0x4a3   : > { %6708 = vmatprep.subr.bf16.mxu1 %v7383_v38 }
 0x4a6   : > { %6709 = vmatpush3.bf16.msra.mxu1 %v7383_v38 }
 0x4a7   : > { %6710 = vmatprep.subr.bf16.mxu1 %v7384_v1 }
 0x4aa   : > { %6711 = vmatpush3.bf16.msra.mxu1 %v7384_v1 }
 0x4ab   : > { %6736 = vmatprep.subr.bf16.mxu1 %v8276_v3 }
 0x52d   : > { %v6634_v4 = vpop.f32.mrf.mxu1 }
 0x52f   : > { %v2263_v5 = vpop.f32.mrf.mxu1 }
 0x531   : > { %v6654_v6 = vpop.f32.mrf.mxu0  ;;  %v6635_v9 = vpop.f32.mrf.mxu1 }
 0x532   : > { %v2369_v52 = vadd.f32 %v6654_v6, %v6634_v4 }
 0x533   : > { %v2360_v10 = vpop.f32.mrf.mxu0  ;;  %v2266_v13 = vpop.f32.mrf.mxu1 }
 0x534   : > { %v2361_v16 = vadd.f32 %v2360_v10, %v2263_v5  ;;  %v7389_v10 = vld [vmem:[#allocation8 + $0x70] sm:$0xff]  }
 0x535   : > { %v6655_v47 = vpop.f32.mrf.mxu0 }
 0x536   : > { %v2372_v0 = vadd.f32 %v6655_v47, %v6635_v9  ;;  %v7388_v9 = vld [vmem:[#allocation7 + $0x228] sm:$0xff]   ;;  %v7393_v47 = vld [vmem:[#allocation8 + $0x60] sm:$0xff]  }
 0x537   : > { %v2363_v20 = vpop.f32.mrf.mxu0 }
 0x538   : > { %v2364_v32 = vadd.f32 %v2363_v20, %v2266_v13  ;;  %v7391_v13 = vld [vmem:[#allocation8 + $0x68] sm:$0xff]  }
 0x54d   : > { %v6674_v15 = vpop.f32.mrf.mxu1 }
 0x54e   : > { %v2493_v17 = vadd.f32 %v6674_v15, %v2369_v52  ;;  %v7392_v52 = vld [vmem:[#allocation7 + $0x218] sm:$0xff]   ;;  %v7394_v15 = vld [vmem:[#allocation7 + $0x210] sm:$0xff]  }
 0x54f   : > { %v2476_v19 = vpop.f32.mrf.mxu1 }
 0x550   : > { %v2491_v23 = vadd.f32 %v2476_v19, %v2361_v16  ;;  %v2501_v26 = vadd.f32 %v2498_v18, %v2493_v17  ;;  %v7395_v16 = vld [vmem:[#allocation8 + $0x58] sm:$0xff]   ;;  %v7399_v19 = vld [vmem:[#allocation8 + $0x48] sm:$0xff]  }
 0x551   : > { %v6675_v24 = vpop.f32.mrf.mxu1 }
 0x552   : > { %v2499_v31 = vadd.f32 %v2498_v18, %v2491_v23  ;;  %v2494_v29 = vadd.f32 %v6675_v24, %v2372_v0  ;;  %v8287_v37 = vmax.f32 %v2501_v26, 0.0  ;;  %v7400_v23 = vld [vmem:[#allocation8 + $0x40] sm:$0xff]  }
 0x553   : > { %v2479_v33 = vpop.f32.mrf.mxu1 }
 0x554   : > { %v8285_v34 = vmax.f32 %v2499_v31, 0.0  ;;  %v2502_v35 = vadd.f32 %v2498_v18, %v2494_v29  ;;  %v2492_v25 = vadd.f32 %v2479_v33, %v2364_v32  ;;  %v2509_v42 = vrot.slane %v8287_v37, 7  ;;  %v7401_v31 = vld [vmem:[#allocation5 + $0x2b8] sm:$0xff]   ;;  %v7402_v29 = vld [vmem:[#allocation5 + $0x2b0] sm:$0xff]  }
 0x555   : > { %v2521_v44 = vrot.slane %v8287_v37, 1  ;;  %v7403_v32 = vld [vmem:[#allocation5 + $0x278] sm:$0xff]   ;;  %v7405_v33 = vld [vmem:[#allocation5 + $0x270] sm:$0xff]  }
 0x556   : > { %v8289_v30 = vmax.f32 %v2502_v35, 0.0  ;;  %v2500_v39 = vadd.f32 %v2498_v18, %v2492_v25  ;;  %v2507_v21 = vrot.slane %v8285_v34, 7  ;;  %v2519_v58 = vrot.slane %v8285_v34, 1  ;;  %v7398_v18 = vld [vmem:[#allocation7 + $0x200] sm:$0xff]   ;;  %v7407_v25 = vld [vmem:[#allocation5 + $0x268] sm:$0xff]  }
 0x557   : > { %v7406_v35 = vld [vmem:[#allocation5 + $0x2a0] sm:$0xff]  }
 0x558   : > { %v2510_v40 = vrot.slane %v8289_v30, 7  ;;  %v2504_v41 = vmax.f32 %v2500_v39, 0.0  ;;  %v2551_v56 = vpack.c.bf16 %v8289_v30, %v8287_v37  ;;  %v2522_v17 = vrot.slane %v8289_v30, 1  ;;  %v7409_v37 = vld [vmem:[#allocation5 + $0x260] sm:$0xff]   ;;  %v7410_v30 = vld [vmem:[#allocation5 + $0x290] sm:$0xff]   ;;  %v7411_v39 = vld [vmem:[#allocation5 + $0x258] sm:$0xff]  }
 0x55a   : > { %v2514_v45 = vsel %vm436_vm1, %v2510_v40, %v2507_v21  ;;  %v2508_v48 = vrot.slane %v2504_v41, 7  ;;  %v2520_v50 = vrot.slane %v2504_v41, 1  ;;  %v2550_v54 = vpack.c.bf16 %v2504_v41, %v8285_v34  ;;  %v7404_v34 = vld [vmem:[#allocation5 + $0x2a8] sm:$0xff]   ;;  %v7414_v41 = vld [vmem:[#allocation5 + $0x280] sm:$0xff]  }
 0x55b   : > { %v2515_v55 = vmul.f32 %v8065_v28, %v2514_v45  ;;  %v2511_v1 = vsel %vm436_vm1, %v2509_v42, %v2510_v40  ;;  %v2526_v0 = vsel %vm449_vm5, %v2522_v17, %v2519_v58  ;;  %v2523_v24 = vsel %vm449_vm5, %v2521_v44, %v2522_v17  ;;  %v7413_v40 = vld [vmem:[#allocation5 + $0x250] sm:$0xff]   ;;  %v7417_v45 = vld [vmem:[#allocation5 + $0x240] sm:$0xff]  }
 0x55c   : > { %6692 = vmatprep.mubr.bf16.mxu0 %v2550_v54  ;;  %v2513_v59 = vsel %vm436_vm1, %v2507_v21, %v2508_v48  ;;  %v2512_v61 = vsel %vm436_vm1, %v2508_v48, %v2509_v42  ;;  %v2524_v51 = vsel %vm449_vm5, %v2520_v50, %v2521_v44  ;;  %v2525_v4 = vsel %vm449_vm5, %v2519_v58, %v2520_v50  ;;  %v7412_v21 = vld [vmem:[#allocation5 + $0x288] sm:$0xff]   ;;  %v8327_v44 = vld [vmem:[#allocation5 + $0x2f8] sm:$0xff]  }
 0x55d   : > { %6693 = vmatmul.mubr.bf16.vlgmr.msra.gmra.mxu0 %v2551_v56  ;;  %v2531_v62 = vpack.c.bf16 %v2513_v59, %v2515_v55  ;;  %v2517_v63 = vmul.f32 %v8088_v43, %v2512_v61  ;;  %v2528_v38 = vmul.f32 %v8095_v46, %v2524_v51  ;;  %v2530_v20 = vmul.f32 %v8102_v49, %v2526_v0  ;;  %v7415_v42 = vld [vmem:[#allocation5 + $0x248] sm:$0xff]  }
 0x55e   : > { %6717 = vmatpush3.bf16.msra.mxu0 %v7385_v2  ;;  %v7390_v2 = vld [vmem:[#allocation7 + $0x220] sm:$0xff]  }
 0x55f   : > { %6712 = vmatprep.mubr.bf16.mxu1 %v2531_v62  ;;  %6718 = vmatprep.subr.bf16.mxu0 %v7386_v57  ;;  %v2532_v5 = vpack.c.bf16 %v2511_v1, %v2517_v63  ;;  %v2763_v6 = vpack.c.bf16 %v2528_v38, %v2525_v4  ;;  %v2764_v26 = vpack.c.bf16 %v2530_v20, %v2523_v24  ;;  %v8331_v63 = vld [vmem:[#allocation10 + $0x8] sm:$0xff] }
 0x561   : > { %6713 = vmatmul.mubr.bf16.vlgmr.msra.gmra.mxu1 %v2532_v5  ;;  %6732 = vmatprep.mubr.bf16.mxu0 %v2763_v6 }
 0x562   : > { %6719 = vmatpush3.bf16.msra.mxu0 %v7386_v57  ;;  %6737 = vmatpush3.bf16.msra.mxu1 %v8276_v3  ;;  %v7397_v3 = vld [vmem:[#allocation8 + $0x50] sm:$0xff]   ;;  %v2910_v57 = vsub.s32 5, %v8042_v7 }
 0x563   : > { %6752 = vmatprep.mubr.bf16.mxu1 %v8252_v14  ;;  %6720 = vmatprep.subr.bf16.mxu0 %v7388_v9  ;;  %v7396_v14 = vld [vmem:[#allocation7 + $0x208] sm:$0xff]  }
 0x564   : > { %6738 = vmatprep.subr.bf16.mxu1 %v7389_v10  ;;  %v2911_v38 = vrot.slane %v8331_v63, %v2910_v57 }
 0x566   : > { %6721 = vmatpush3.bf16.msra.mxu0 %v7388_v9  ;;  %6739 = vmatpush3.bf16.msra.mxu1 %v7389_v10  ;;  %v2886_v9 = vrot.slane %v8331_v63, %v821_v36 }
 0x567   : > { %6722 = vmatprep.subr.bf16.mxu0 %v7390_v2  ;;  %6740 = vmatprep.subr.bf16.mxu1 %v7391_v13 }
 0x56a   : > { %6723 = vmatpush3.bf16.msra.mxu0 %v7390_v2  ;;  %6741 = vmatpush3.bf16.msra.mxu1 %v7391_v13 }
 0x56b   : > { %6724 = vmatprep.subr.bf16.mxu0 %v7392_v52  ;;  %6742 = vmatprep.subr.bf16.mxu1 %v7393_v47 }
 0x56e   : > { %6725 = vmatpush3.bf16.msra.mxu0 %v7392_v52  ;;  %6743 = vmatpush3.bf16.msra.mxu1 %v7393_v47 }
 0x56f   : > { %6726 = vmatprep.subr.bf16.mxu0 %v7394_v15  ;;  %6744 = vmatprep.subr.bf16.mxu1 %v7395_v16 }
 0x572   : > { %6727 = vmatpush3.bf16.msra.mxu0 %v7394_v15  ;;  %6745 = vmatpush3.bf16.msra.mxu1 %v7395_v16 }
 0x573   : > { %6728 = vmatprep.subr.bf16.mxu0 %v7396_v14  ;;  %6746 = vmatprep.subr.bf16.mxu1 %v7397_v3 }
 0x576   : > { %6729 = vmatpush3.bf16.msra.mxu0 %v7396_v14  ;;  %6747 = vmatpush3.bf16.msra.mxu1 %v7397_v3 }
 0x577   : > { %6730 = vmatprep.subr.bf16.mxu0 %v7398_v18  ;;  %6748 = vmatprep.subr.bf16.mxu1 %v7399_v19 }
 0x57a   : > { %6731 = vmatpush3.bf16.msra.mxu0 %v7398_v18  ;;  %6749 = vmatpush3.bf16.msra.mxu1 %v7399_v19 }
 0x57b   : > { %6750 = vmatprep.subr.bf16.mxu1 %v7400_v23  ;;  %6756 = vmatprep.subr.bf16.mxu0 %v7401_v31 }
 0x57d   : > { %6733 = vmatmul.mubr.bf16.vlgmr.msra.gmra.mxu0 %v2764_v26 }
 0x57e   : > { %6751 = vmatpush3.bf16.msra.mxu1 %v7400_v23  ;;  %6757 = vmatpush3.bf16.msra.mxu0 %v7401_v31 }
 0x57f   : > { %6776 = vmatprep.subr.bf16.mxu1 %v7403_v32  ;;  %6758 = vmatprep.subr.bf16.mxu0 %v7402_v29 }
 0x581   : > { %6753 = vmatmul.mubr.bf16.vlgmr.msra.gmra.mxu1 %v8255_v53  ;;  %v7408_v53 = vld [vmem:[#allocation5 + $0x298] sm:$0xff]  }
 0x582   : > { %6777 = vmatpush3.bf16.msra.mxu1 %v7403_v32  ;;  %6759 = vmatpush3.bf16.msra.mxu0 %v7402_v29 }
 0x583   : > { %6778 = vmatprep.subr.bf16.mxu1 %v7405_v33  ;;  %6760 = vmatprep.subr.bf16.mxu0 %v7404_v34 }
 0x586   : > { %6779 = vmatpush3.bf16.msra.mxu1 %v7405_v33  ;;  %6761 = vmatpush3.bf16.msra.mxu0 %v7404_v34 }
 0x587   : > { %6762 = vmatprep.subr.bf16.mxu0 %v7406_v35  ;;  %6780 = vmatprep.subr.bf16.mxu1 %v7407_v25 }
 0x58a   : > { %6763 = vmatpush3.bf16.msra.mxu0 %v7406_v35  ;;  %6781 = vmatpush3.bf16.msra.mxu1 %v7407_v25 }
 0x58b   : > { %6764 = vmatprep.subr.bf16.mxu0 %v7408_v53  ;;  %6782 = vmatprep.subr.bf16.mxu1 %v7409_v37 }
 0x58e   : > { %6765 = vmatpush3.bf16.msra.mxu0 %v7408_v53  ;;  %6783 = vmatpush3.bf16.msra.mxu1 %v7409_v37 }
 0x58f   : > { %6766 = vmatprep.subr.bf16.mxu0 %v7410_v30  ;;  %6784 = vmatprep.subr.bf16.mxu1 %v7411_v39 }
 0x592   : > { %6767 = vmatpush3.bf16.msra.mxu0 %v7410_v30  ;;  %6785 = vmatpush3.bf16.msra.mxu1 %v7411_v39 }
 0x593   : > { %6768 = vmatprep.subr.bf16.mxu0 %v7412_v21  ;;  %6786 = vmatprep.subr.bf16.mxu1 %v7413_v40 }
 0x596   : > { %6769 = vmatpush3.bf16.msra.mxu0 %v7412_v21  ;;  %6787 = vmatpush3.bf16.msra.mxu1 %v7413_v40 }
 0x597   : > { %6770 = vmatprep.subr.bf16.mxu0 %v7414_v41  ;;  %6788 = vmatprep.subr.bf16.mxu1 %v7415_v42 }
 0x59a   : > { %6771 = vmatpush3.bf16.msra.mxu0 %v7414_v41  ;;  %6789 = vmatpush3.bf16.msra.mxu1 %v7415_v42 }
 0x59b   : > { %6796 = vmatprep.subr.bf16.mxu0 %v8327_v44  ;;  %6790 = vmatprep.subr.bf16.mxu1 %v7417_v45 }
 0x59e   : > { %6791 = vmatpush3.bf16.msra.mxu1 %v7417_v45 }
 0x61d   : > { %v6694_v48 = vpop.f32.mrf.mxu0 }
 0x61f   : > { %v2651_v50 = vpop.f32.mrf.mxu0 }
 0x621   : > { %v6714_v54 = vpop.f32.mrf.mxu1  ;;  %v6695_v55 = vpop.f32.mrf.mxu0 }
 0x622   : > { %v2757_v51 = vadd.f32 %v6714_v54, %v6694_v48  ;;  %v7418_v54 = vld [vmem:[#allocation5 + $0x2f0] sm:$0xff]  }
 0x623   : > { %v2748_v56 = vpop.f32.mrf.mxu1  ;;  %v2654_v58 = vpop.f32.mrf.mxu0 }
 0x624   : > { %v2749_v62 = vadd.f32 %v2748_v56, %v2651_v50 }
 0x625   : > { %v6715_v59 = vpop.f32.mrf.mxu1 }
 0x626   : > { %v2760_v5 = vadd.f32 %v6715_v59, %v6695_v55 }
 0x627   : > { %v2751_v1 = vpop.f32.mrf.mxu1 }
 0x628   : > { %v2752_v15 = vadd.f32 %v2751_v1, %v2654_v58 }
 0x63d   : > { %v6734_v61 = vpop.f32.mrf.mxu0 }
 0x63e   : > { %v2881_v6 = vadd.f32 %v6734_v61, %v2757_v51 }
 0x63f   : > { %v2864_v4 = vpop.f32.mrf.mxu0 }
 0x640   : > { %v2879_v10 = vadd.f32 %v2864_v4, %v2749_v62  ;;  %v2889_v3 = vadd.f32 %v2886_v9, %v2881_v6  ;;  %v7419_v6 = vld [vmem:[#allocation5 + $0x2e8] sm:$0xff]  }
 0x641   : > { %v6735_v2 = vpop.f32.mrf.mxu0  ;;  %v6754_v13 = vpop.f32.mrf.mxu1 }
 0x642   : > { %v2882_v52 = vadd.f32 %v6735_v2, %v2760_v5  ;;  %v3003_v47 = vadd.f32 %v6754_v13, %v2911_v38  ;;  %v2887_v17 = vadd.f32 %v2886_v9, %v2879_v10  ;;  %v7421_v10 = vld [vmem:[#allocation5 + $0x2d8] sm:$0xff]   ;;  %v7423_v2 = vld [vmem:[#allocation5 + $0x2c8] sm:$0xff]  }
 0x643   : > { %v2867_v16 = vpop.f32.mrf.mxu0  ;;  %v2994_v14 = vpop.f32.mrf.mxu1 }
 0x644   : > { %v2995_v18 = vadd.f32 %v2994_v14, %v2911_v38  ;;  %v2880_v19 = vadd.f32 %v2867_v16, %v2752_v15  ;;  %v2890_v20 = vadd.f32 %v2886_v9, %v2882_v52  ;;  %v3011_v23 = vadd.f32 %v3003_v47, %v2889_v3  ;;  %v7424_v52 = vld [vmem:[#allocation5 + $0x2c0] sm:$0xff]   ;;  %v7425_v3 = vld [vmem:[#allocation7 + $0x2b8] sm:$0xff]  }
 0x645   : > { %v6755_v0 = vpop.f32.mrf.mxu1  ;;  %6816 = vmatprep.subr.bf16.mxu1 %v7425_v3 }
 0x646   : > { %v3009_v24 = vadd.f32 %v2995_v18, %v2887_v17  ;;  %v3006_v26 = vadd.f32 %v6755_v0, %v2911_v38  ;;  %v2888_v32 = vadd.f32 %v2886_v9, %v2880_v19  ;;  %v8341_v34 = vmax.f32 %v3011_v23, 0.0  ;;  %v7420_v9 = vld [vmem:[#allocation5 + $0x2e0] sm:$0xff]   ;;  %v7426_v17 = vld [vmem:[#allocation7 + $0x2b0] sm:$0xff]   ;;  %v7427_v18 = vld [vmem:[#allocation7 + $0x278] sm:$0xff]  }
 0x647   : > { %v2997_v31 = vpop.f32.mrf.mxu1  ;;  %v7429_v19 = vld [vmem:[#allocation7 + $0x270] sm:$0xff]   ;;  %v7428_v0 = vld [vmem:[#allocation7 + $0x2a8] sm:$0xff]   ;;  %v7430_v23 = vld [vmem:[#allocation7 + $0x2a0] sm:$0xff]  }
 0x648   : > { %v8339_v29 = vmax.f32 %v3009_v24, 0.0  ;;  %v3012_v36 = vadd.f32 %v3006_v26, %v2890_v20  ;;  %v2998_v33 = vadd.f32 %v2997_v31, %v2911_v38  ;;  %v3019_v39 = vrot.slane %v8341_v34, 7  ;;  %v7431_v20 = vld [vmem:[#allocation7 + $0x268] sm:$0xff]   ;;  %v7432_v24 = vld [vmem:[#allocation7 + $0x298] sm:$0xff]   ;;  %v7433_v26 = vld [vmem:[#allocation7 + $0x260] sm:$0xff]  }
 0x649   : > { %v3031_v21 = vrot.slane %v8341_v34, 1  ;;  %v7434_v31 = vld [vmem:[#allocation7 + $0x290] sm:$0xff]  }
 0x64a   : > { %v8343_v35 = vmax.f32 %v3012_v36, 0.0  ;;  %v3010_v25 = vadd.f32 %v2998_v33, %v2888_v32  ;;  %v3017_v37 = vrot.slane %v8339_v29, 7  ;;  %v3029_v58 = vrot.slane %v8339_v29, 1  ;;  %v7435_v36 = vld [vmem:[#allocation7 + $0x258] sm:$0xff]   ;;  %v7436_v32 = vld [vmem:[#allocation7 + $0x288] sm:$0xff]   ;;  %v7437_v33 = vld [vmem:[#allocation7 + $0x250] sm:$0xff]  }
 0x64c   : > { %v3020_v53 = vrot.slane %v8343_v35, 7  ;;  %v8347_v30 = vmax.f32 %v3010_v25, 0.0  ;;  %v3061_v50 = vpack.c.bf16 %v8343_v35, %v8341_v34  ;;  %v3032_v13 = vrot.slane %v8343_v35, 1  ;;  %v7438_v25 = vld [vmem:[#allocation7 + $0x280] sm:$0xff]  }
 0x64e   : > { %v3024_v40 = vsel %vm436_vm1, %v3020_v53, %v3017_v37  ;;  %v3060_v41 = vpack.c.bf16 %v8347_v30, %v8339_v29  ;;  %v3018_v42 = vrot.slane %v8347_v30, 7  ;;  %v3030_v48 = vrot.slane %v8347_v30, 1 }
 0x64f   : > { %v3025_v45 = vmul.f32 %v8065_v28, %v3024_v40  ;;  %v3021_v38 = vsel %vm436_vm1, %v3019_v39, %v3020_v53  ;;  %v3036_v47 = vsel %vm449_vm5, %v3032_v13, %v3029_v58  ;;  %v3033_v16 = vsel %vm449_vm5, %v3031_v21, %v3032_v13  ;;  %v7439_v53 = vld [vmem:[#allocation7 + $0x248] sm:$0xff]  }
 0x650   : > { %6772 = vmatprep.mubr.bf16.mxu0 %v3060_v41  ;;  %v3023_v55 = vsel %vm436_vm1, %v3017_v37, %v3018_v42  ;;  %v3022_v56 = vsel %vm436_vm1, %v3018_v42, %v3019_v39  ;;  %v3034_v59 = vsel %vm449_vm5, %v3030_v48, %v3031_v21  ;;  %v3035_v1 = vsel %vm449_vm5, %v3029_v58, %v3030_v48  ;;  %v7440_v37 = vld [vmem:[#allocation7 + $0x2f8] sm:$0xff]   ;;  %v7441_v39 = vld [vmem:[#allocation7 + $0x240] sm:$0xff]  }
 0x651   : > { %6773 = vmatmul.mubr.bf16.vlgmr.msra.gmra.mxu0 %v3061_v50  ;;  %v3041_v61 = vpack.c.bf16 %v3023_v55, %v3025_v45  ;;  %v3027_v51 = vmul.f32 %v8088_v43, %v3022_v56  ;;  %v3038_v62 = vmul.f32 %v8095_v46, %v3034_v59  ;;  %v3040_v15 = vmul.f32 %v8102_v49, %v3036_v47 }
 0x652   : > { %6797 = vmatpush3.bf16.msra.mxu0 %v8327_v44  ;;  %v7422_v44 = vld [vmem:[#allocation5 + $0x2d0] sm:$0xff]   ;;  %v3395_v48 = vsub.s32 3, %v8042_v7 }
 0x653   : > { %6792 = vmatprep.mubr.bf16.mxu1 %v3041_v61  ;;  %6798 = vmatprep.subr.bf16.mxu0 %v7418_v54  ;;  %v3042_v4 = vpack.c.bf16 %v3021_v38, %v3027_v51  ;;  %v3273_v5 = vpack.c.bf16 %v3038_v62, %v3035_v1  ;;  %v3274_v14 = vpack.c.bf16 %v3040_v15, %v3033_v16 }
 0x654   : > { %v3396_v61 = vrot.slane %v8280_v22, %v3395_v48 }
 0x655   : > { %6793 = vmatmul.mubr.bf16.vlgmr.msra.gmra.mxu1 %v3042_v4  ;;  %6812 = vmatprep.mubr.bf16.mxu0 %v3273_v5 }
 0x656   : > { %6799 = vmatpush3.bf16.msra.mxu0 %v7418_v54  ;;  %6817 = vmatpush3.bf16.msra.mxu1 %v7425_v3 }
 0x657   : > { %6800 = vmatprep.subr.bf16.mxu0 %v7419_v6  ;;  %6818 = vmatprep.subr.bf16.mxu1 %v7426_v17 }
 0x65a   : > { %6801 = vmatpush3.bf16.msra.mxu0 %v7419_v6  ;;  %6819 = vmatpush3.bf16.msra.mxu1 %v7426_v17 }
 0x65b   : > { %6802 = vmatprep.subr.bf16.mxu0 %v7420_v9  ;;  %6820 = vmatprep.subr.bf16.mxu1 %v7428_v0 }
 0x65e   : > { %6803 = vmatpush3.bf16.msra.mxu0 %v7420_v9  ;;  %6821 = vmatpush3.bf16.msra.mxu1 %v7428_v0 }
 0x65f   : > { %6804 = vmatprep.subr.bf16.mxu0 %v7421_v10  ;;  %6822 = vmatprep.subr.bf16.mxu1 %v7430_v23 }
 0x662   : > { %6805 = vmatpush3.bf16.msra.mxu0 %v7421_v10  ;;  %6823 = vmatpush3.bf16.msra.mxu1 %v7430_v23 }
 0x663   : > { %6806 = vmatprep.subr.bf16.mxu0 %v7422_v44  ;;  %6824 = vmatprep.subr.bf16.mxu1 %v7432_v24 }
 0x666   : > { %6807 = vmatpush3.bf16.msra.mxu0 %v7422_v44  ;;  %6825 = vmatpush3.bf16.msra.mxu1 %v7432_v24 }
 0x667   : > { %6808 = vmatprep.subr.bf16.mxu0 %v7423_v2  ;;  %6826 = vmatprep.subr.bf16.mxu1 %v7434_v31 }
 0x66a   : > { %6809 = vmatpush3.bf16.msra.mxu0 %v7423_v2  ;;  %6827 = vmatpush3.bf16.msra.mxu1 %v7434_v31  ;;  %v7442_v31 = vld [vmem:[#allocation7 + $0x2f0] sm:$0xff]  }
 0x66b   : > { %6810 = vmatprep.subr.bf16.mxu0 %v7424_v52  ;;  %6828 = vmatprep.subr.bf16.mxu1 %v7436_v32 }
 0x66e   : > { %6811 = vmatpush3.bf16.msra.mxu0 %v7424_v52  ;;  %6829 = vmatpush3.bf16.msra.mxu1 %v7436_v32 }
 0x66f   : > { %6836 = vmatprep.subr.bf16.mxu0 %v7427_v18  ;;  %6830 = vmatprep.subr.bf16.mxu1 %v7438_v25 }
 0x671   : > { %6813 = vmatmul.mubr.bf16.vlgmr.msra.gmra.mxu0 %v3274_v14 }
 0x672   : > { %6837 = vmatpush3.bf16.msra.mxu0 %v7427_v18  ;;  %6831 = vmatpush3.bf16.msra.mxu1 %v7438_v25 }
 0x673   : > { %6838 = vmatprep.subr.bf16.mxu0 %v7429_v19  ;;  %6856 = vmatprep.subr.bf16.mxu1 %v7440_v37 }
 0x676   : > { %6839 = vmatpush3.bf16.msra.mxu0 %v7429_v19 }
 0x677   : > { %6840 = vmatprep.subr.bf16.mxu0 %v7431_v20 }
 0x67a   : > { %6841 = vmatpush3.bf16.msra.mxu0 %v7431_v20 }
 0x67b   : > { %6842 = vmatprep.subr.bf16.mxu0 %v7433_v26 }
 0x67e   : > { %6843 = vmatpush3.bf16.msra.mxu0 %v7433_v26 }
 0x67f   : > { %6844 = vmatprep.subr.bf16.mxu0 %v7435_v36 }
 0x682   : > { %6845 = vmatpush3.bf16.msra.mxu0 %v7435_v36 }
 0x683   : > { %6846 = vmatprep.subr.bf16.mxu0 %v7437_v33 }
 0x686   : > { %6847 = vmatpush3.bf16.msra.mxu0 %v7437_v33 }
 0x687   : > { %6848 = vmatprep.subr.bf16.mxu0 %v7439_v53 }
 0x68a   : > { %6849 = vmatpush3.bf16.msra.mxu0 %v7439_v53 }
 0x68b   : > { %6850 = vmatprep.subr.bf16.mxu0 %v7441_v39 }
 0x68e   : > { %6851 = vmatpush3.bf16.msra.mxu0 %v7441_v39 }
 0x711   : > { %v6774_v21 = vpop.f32.mrf.mxu0 }
 0x713   : > { %v3161_v40 = vpop.f32.mrf.mxu0 }
 0x715   : > { %v6794_v41 = vpop.f32.mrf.mxu1  ;;  %v6775_v42 = vpop.f32.mrf.mxu0 }
 0x716   : > { %v3267_v54 = vadd.f32 %v6794_v41, %v6774_v21 }
 0x717   : > { %v3258_v45 = vpop.f32.mrf.mxu1  ;;  %v3164_v50 = vpop.f32.mrf.mxu0 }
 0x718   : > { %v3259_v58 = vadd.f32 %v3258_v45, %v3161_v40 }
 0x719   : > { %v6795_v55 = vpop.f32.mrf.mxu1 }
 0x71a   : > { %v3270_v62 = vadd.f32 %v6795_v55, %v6775_v42  ;;  %v7445_v55 = vld [vmem:[#allocation7 + $0x2d8] sm:$0xff]  }
 0x71b   : > { %v3261_v38 = vpop.f32.mrf.mxu1 }
 0x71c   : > { %v3262_v10 = vadd.f32 %v3261_v38, %v3164_v50  ;;  %v7443_v50 = vld [vmem:[#allocation7 + $0x2e8] sm:$0xff]  }
 0x731   : > { %v6814_v56 = vpop.f32.mrf.mxu0 }
 0x732   : > { %v3391_v59 = vadd.f32 %v6814_v56, %v3267_v54  ;;  %v7444_v54 = vld [vmem:[#allocation7 + $0x2e0] sm:$0xff]   ;;  %v7447_v56 = vld [vmem:[#allocation7 + $0x2c8] sm:$0xff]  }
 0x733   : > { %v3374_v51 = vpop.f32.mrf.mxu0 }
 0x734   : > { %v3389_v1 = vadd.f32 %v3374_v51, %v3259_v58  ;;  %v3399_v5 = vadd.f32 %v3396_v61, %v3391_v59  ;;  %v7448_v59 = vld [vmem:[#allocation7 + $0x2c0] sm:$0xff]  }
 0x735   : > { %v6815_v4 = vpop.f32.mrf.mxu0 }
 0x736   : > { %v3397_v6 = vadd.f32 %v3396_v61, %v3389_v1  ;;  %v3392_v9 = vadd.f32 %v6815_v4, %v3270_v62  ;;  %v3403_v47 = vmax.f32 %v3399_v5, 0.0  ;;  %v7449_v1 = vld [vmem:[#allocation5 + $0x378] sm:$0xff]   ;;  %v7450_v4 = vld [vmem:[#allocation5 + $0x370] sm:$0xff]  }
 0x737   : > { %v3377_v44 = vpop.f32.mrf.mxu0  ;;  %v7451_v5 = vld [vmem:[#allocation5 + $0x338] sm:$0xff]   ;;  %6876 = vmatprep.subr.bf16.mxu0 %v7449_v1 }
 0x738   : > { %v3401_v2 = vmax.f32 %v3397_v6, 0.0  ;;  %v3400_v13 = vadd.f32 %v3396_v61, %v3392_v9  ;;  %v3390_v52 = vadd.f32 %v3377_v44, %v3262_v10  ;;  %v3407_v22 = vrot.slane %v3403_v47, 7  ;;  %v7453_v6 = vld [vmem:[#allocation5 + $0x330] sm:$0xff]   ;;  %v7452_v9 = vld [vmem:[#allocation5 + $0x368] sm:$0xff]   ;;  %v7454_v44 = vld [vmem:[#allocation5 + $0x360] sm:$0xff]  }
 0x739   : > { %v3419_v18 = vrot.slane %v3403_v47, 1  ;;  %v7455_v10 = vld [vmem:[#allocation5 + $0x328] sm:$0xff]  }
 0x73a   : > { %v3404_v15 = vmax.f32 %v3400_v13, 0.0  ;;  %v3398_v16 = vadd.f32 %v3396_v61, %v3390_v52  ;;  %v3405_v14 = vrot.slane %v3401_v2, 7  ;;  %v3417_v36 = vrot.slane %v3401_v2, 1  ;;  %v7457_v13 = vld [vmem:[#allocation5 + $0x320] sm:$0xff]   ;;  %v7458_v52 = vld [vmem:[#allocation5 + $0x350] sm:$0xff]  }
 0x73c   : > { %v3408_v3 = vrot.slane %v3404_v15, 7  ;;  %v3402_v17 = vmax.f32 %v3398_v16, 0.0  ;;  %v3449_v26 = vpack.c.bf16 %v3404_v15, %v3403_v47  ;;  %v3420_v58 = vrot.slane %v3404_v15, 1  ;;  %v7459_v47 = vld [vmem:[#allocation5 + $0x318] sm:$0xff]   ;;  %v7460_v15 = vld [vmem:[#allocation5 + $0x348] sm:$0xff]   ;;  %v7461_v16 = vld [vmem:[#allocation5 + $0x310] sm:$0xff]  }
 0x73e   : > { %v3412_v19 = vsel %vm436_vm1, %v3408_v3, %v3405_v14  ;;  %v3406_v0 = vrot.slane %v3402_v17, 7  ;;  %v3418_v20 = vrot.slane %v3402_v17, 1  ;;  %v3448_v23 = vpack.c.bf16 %v3402_v17, %v3401_v2  ;;  %v7456_v2 = vld [vmem:[#allocation5 + $0x358] sm:$0xff]  }
 0x73f   : > { %v3413_v24 = vmul.f32 %v8065_v28, %v3412_v19  ;;  %v3409_v40 = vsel %vm436_vm1, %v3407_v22, %v3408_v3  ;;  %v3424_v61 = vsel %vm449_vm5, %v3420_v58, %v3417_v36  ;;  %v3421_v62 = vsel %vm449_vm5, %v3419_v18, %v3420_v58  ;;  %v7463_v3 = vld [vmem:[#allocation5 + $0x308] sm:$0xff]   ;;  %v7464_v17 = vld [vmem:[#allocation5 + $0x3b8] sm:$0xff]  }
 0x740   : > { %6832 = vmatprep.mubr.bf16.mxu1 %v3448_v23  ;;  %v3411_v32 = vsel %vm436_vm1, %v3405_v14, %v3406_v0  ;;  %v3410_v33 = vsel %vm436_vm1, %v3406_v0, %v3407_v22  ;;  %v3422_v25 = vsel %vm449_vm5, %v3418_v20, %v3419_v18  ;;  %v3423_v41 = vsel %vm449_vm5, %v3417_v36, %v3418_v20  ;;  %v7462_v14 = vld [vmem:[#allocation5 + $0x340] sm:$0xff]  }
 0x741   : > { %6833 = vmatmul.mubr.bf16.vlgmr.msra.gmra.mxu1 %v3449_v26  ;;  %v3429_v53 = vpack.c.bf16 %v3411_v32, %v3413_v24  ;;  %v3415_v39 = vmul.f32 %v8088_v43, %v3410_v33  ;;  %v3426_v21 = vmul.f32 %v8095_v46, %v3422_v25  ;;  %v3428_v51 = vmul.f32 %v8102_v49, %v3424_v61  ;;  %v7465_v22 = vld [vmem:[#allocation5 + $0x300] sm:$0xff]  }
 0x742   : > { %6857 = vmatpush3.bf16.msra.mxu1 %v7440_v37  ;;  %v7446_v37 = vld [vmem:[#allocation7 + $0x2d0] sm:$0xff]   ;;  %v3784_v36 = vrot.slane %v8331_v63, %v1717_v60 }
 0x743   : > { %6852 = vmatprep.mubr.bf16.mxu0 %v3429_v53  ;;  %6858 = vmatprep.subr.bf16.mxu1 %v7442_v31  ;;  %v3430_v42 = vpack.c.bf16 %v3409_v40, %v3415_v39  ;;  %v3661_v45 = vpack.c.bf16 %v3426_v21, %v3423_v41  ;;  %v3662_v38 = vpack.c.bf16 %v3428_v51, %v3421_v62 }
 0x745   : > { %6853 = vmatmul.mubr.bf16.vlgmr.msra.gmra.mxu0 %v3430_v42  ;;  %6872 = vmatprep.mubr.bf16.mxu1 %v3661_v45 }
 0x746   : > { %6859 = vmatpush3.bf16.msra.mxu1 %v7442_v31  ;;  %6877 = vmatpush3.bf16.msra.mxu0 %v7449_v1 }
 0x747   : > { %6860 = vmatprep.subr.bf16.mxu1 %v7443_v50  ;;  %6878 = vmatprep.subr.bf16.mxu0 %v7450_v4 }
 0x74a   : > { %6861 = vmatpush3.bf16.msra.mxu1 %v7443_v50  ;;  %6879 = vmatpush3.bf16.msra.mxu0 %v7450_v4 }
 0x74b   : > { %6862 = vmatprep.subr.bf16.mxu1 %v7444_v54  ;;  %6880 = vmatprep.subr.bf16.mxu0 %v7452_v9 }
 0x74e   : > { %6863 = vmatpush3.bf16.msra.mxu1 %v7444_v54  ;;  %6881 = vmatpush3.bf16.msra.mxu0 %v7452_v9 }
 0x74f   : > { %6864 = vmatprep.subr.bf16.mxu1 %v7445_v55  ;;  %6882 = vmatprep.subr.bf16.mxu0 %v7454_v44 }
 0x752   : > { %6865 = vmatpush3.bf16.msra.mxu1 %v7445_v55  ;;  %6883 = vmatpush3.bf16.msra.mxu0 %v7454_v44 }
 0x753   : > { %6866 = vmatprep.subr.bf16.mxu1 %v7446_v37  ;;  %6884 = vmatprep.subr.bf16.mxu0 %v7456_v2 }
 0x756   : > { %6867 = vmatpush3.bf16.msra.mxu1 %v7446_v37  ;;  %6885 = vmatpush3.bf16.msra.mxu0 %v7456_v2 }
 0x757   : > { %6868 = vmatprep.subr.bf16.mxu1 %v7447_v56  ;;  %6886 = vmatprep.subr.bf16.mxu0 %v7458_v52 }
 0x75a   : > { %6869 = vmatpush3.bf16.msra.mxu1 %v7447_v56  ;;  %6887 = vmatpush3.bf16.msra.mxu0 %v7458_v52 }
 0x75b   : > { %6870 = vmatprep.subr.bf16.mxu1 %v7448_v59  ;;  %6888 = vmatprep.subr.bf16.mxu0 %v7460_v15 }
 0x75e   : > { %6871 = vmatpush3.bf16.msra.mxu1 %v7448_v59  ;;  %6889 = vmatpush3.bf16.msra.mxu0 %v7460_v15 }
 0x75f   : > { %6896 = vmatprep.subr.bf16.mxu1 %v7451_v5  ;;  %6890 = vmatprep.subr.bf16.mxu0 %v7462_v14 }
 0x761   : > { %6873 = vmatmul.mubr.bf16.vlgmr.msra.gmra.mxu1 %v3662_v38 }
 0x762   : > { %6897 = vmatpush3.bf16.msra.mxu1 %v7451_v5  ;;  %6891 = vmatpush3.bf16.msra.mxu0 %v7462_v14 }
 0x763   : > { %6898 = vmatprep.subr.bf16.mxu1 %v7453_v6  ;;  %6916 = vmatprep.subr.bf16.mxu0 %v7464_v17 }
 0x766   : > { %6899 = vmatpush3.bf16.msra.mxu1 %v7453_v6 }
 0x767   : > { %6900 = vmatprep.subr.bf16.mxu1 %v7455_v10 }
 0x76a   : > { %6901 = vmatpush3.bf16.msra.mxu1 %v7455_v10  ;;  %v7466_v10 = vld [vmem:[#allocation5 + $0x3b0] sm:$0xff]  }
 0x76b   : > { %6902 = vmatprep.subr.bf16.mxu1 %v7457_v13 }
 0x76e   : > { %6903 = vmatpush3.bf16.msra.mxu1 %v7457_v13 }
 0x76f   : > { %6904 = vmatprep.subr.bf16.mxu1 %v7459_v47 }
 0x772   : > { %6905 = vmatpush3.bf16.msra.mxu1 %v7459_v47 }
 0x773   : > { %6906 = vmatprep.subr.bf16.mxu1 %v7461_v16 }
 0x776   : > { %6907 = vmatpush3.bf16.msra.mxu1 %v7461_v16 }
 0x777   : > { %6908 = vmatprep.subr.bf16.mxu1 %v7463_v3 }
 0x77a   : > { %6909 = vmatpush3.bf16.msra.mxu1 %v7463_v3 }
 0x77b   : > { %6910 = vmatprep.subr.bf16.mxu1 %v7465_v22 }
 0x77e   : > { %6911 = vmatpush3.bf16.msra.mxu1 %v7465_v22 }
 0x801   : > { %v6834_v18 = vpop.f32.mrf.mxu1 }
 0x803   : > { %v3549_v19 = vpop.f32.mrf.mxu1 }
 0x805   : > { %v6854_v0 = vpop.f32.mrf.mxu0  ;;  %v6835_v20 = vpop.f32.mrf.mxu1 }
 0x806   : > { %v3655_v31 = vadd.f32 %v6854_v0, %v6834_v18  ;;  %v7467_v0 = vld [vmem:[#allocation5 + $0x3a8] sm:$0xff]  }
 0x807   : > { %v3646_v23 = vpop.f32.mrf.mxu0  ;;  %v3552_v24 = vpop.f32.mrf.mxu1 }
 0x808   : > { %v3647_v33 = vadd.f32 %v3646_v23, %v3549_v19  ;;  %v7468_v23 = vld [vmem:[#allocation5 + $0x3a0] sm:$0xff]  }
 0x809   : > { %v6855_v26 = vpop.f32.mrf.mxu0 }
 0x80a   : > { %v3658_v21 = vadd.f32 %v6855_v26, %v6835_v20  ;;  %v7471_v26 = vld [vmem:[#allocation5 + $0x388] sm:$0xff]  }
 0x80b   : > { %v3649_v53 = vpop.f32.mrf.mxu0 }
 0x80c   : > { %v3650_v45 = vadd.f32 %v3649_v53, %v3552_v24  ;;  %v7470_v24 = vld [vmem:[#allocation5 + $0x390] sm:$0xff]  }
 0x821   : > { %v6874_v32 = vpop.f32.mrf.mxu1 }
 0x822   : > { %v3779_v25 = vadd.f32 %v6874_v32, %v3655_v31 }
 0x823   : > { %v3762_v39 = vpop.f32.mrf.mxu1 }
 0x824   : > { %v3787_v40 = vadd.f32 %v3784_v36, %v3779_v25  ;;  %v3777_v41 = vadd.f32 %v3762_v39, %v3647_v33  ;;  %v7473_v39 = vld [vmem:[#allocation7 + $0x378] sm:$0xff]  }
 0x825   : > { %v6875_v42 = vpop.f32.mrf.mxu1  ;;  %6936 = vmatprep.subr.bf16.mxu1 %v7473_v39 }
 0x826   : > { %v3785_v50 = vadd.f32 %v3784_v36, %v3777_v41  ;;  %v3780_v54 = vadd.f32 %v6875_v42, %v3658_v21  ;;  %v3791_v37 = vadd.f32 %v3787_v40, %v8341_v34  ;;  %v7474_v21 = vld [vmem:[#allocation7 + $0x370] sm:$0xff]   ;;  %v7475_v40 = vld [vmem:[#allocation7 + $0x338] sm:$0xff]   ;;  %v7476_v42 = vld [vmem:[#allocation7 + $0x368] sm:$0xff]  }
 0x827   : > { %v3765_v55 = vpop.f32.mrf.mxu1  ;;  %v7477_v41 = vld [vmem:[#allocation7 + $0x330] sm:$0xff]  }
 0x828   : > { %v3789_v56 = vadd.f32 %v3785_v50, %v8339_v29  ;;  %v3788_v58 = vadd.f32 %v3784_v36, %v3780_v54  ;;  %v3778_v59 = vadd.f32 %v3765_v55, %v3650_v45  ;;  %v8412_v51 = vmax.f32 %v3791_v37, 0.0  ;;  %v7479_v45 = vld [vmem:[#allocation7 + $0x328] sm:$0xff]   ;;  %v7478_v50 = vld [vmem:[#allocation7 + $0x360] sm:$0xff]   ;;  %v7480_v54 = vld [vmem:[#allocation7 + $0x358] sm:$0xff]  }
 0x829   : > { %v7481_v55 = vld [vmem:[#allocation7 + $0x320] sm:$0xff]   ;;  %v7482_v37 = vld [vmem:[#allocation7 + $0x350] sm:$0xff]  }
 0x82a   : > { %v8409_v60 = vmax.f32 %v3789_v56, 0.0  ;;  %v3792_v63 = vadd.f32 %v3788_v58, %v8343_v35  ;;  %v3786_v61 = vadd.f32 %v3784_v36, %v3778_v59  ;;  %v3799_v6 = vrot.slane %v8412_v51, 7  ;;  %v7472_v36 = vld [vmem:[#allocation5 + $0x380] sm:$0xff]   ;;  %v7483_v56 = vld [vmem:[#allocation7 + $0x318] sm:$0xff]   ;;  %v7484_v58 = vld [vmem:[#allocation7 + $0x348] sm:$0xff]  }
 0x82b   : > { %v3811_v2 = vrot.slane %v8412_v51, 1  ;;  %v7485_v59 = vld [vmem:[#allocation7 + $0x310] sm:$0xff]  }
 0x82c   : > { %v8414_v62 = vmax.f32 %v3792_v63, 0.0  ;;  %v3790_v38 = vadd.f32 %v3786_v61, %v8347_v30  ;;  %v3797_v4 = vrot.slane %v8409_v60, 7  ;;  %v3809_v16 = vrot.slane %v8409_v60, 1  ;;  %v7486_v63 = vld [vmem:[#allocation7 + $0x340] sm:$0xff]   ;;  %v7487_v61 = vld [vmem:[#allocation7 + $0x308] sm:$0xff]  }
 0x82e   : > { %v8417_v1 = vmax.f32 %v3790_v38, 0.0  ;;  %v3800_v34 = vrot.slane %v8414_v62, 7  ;;  %v3841_v9 = vpack.c.bf16 %v8414_v62, %v8412_v51  ;;  %v3812_v31 = vrot.slane %v8414_v62, 1  ;;  %v7488_v38 = vld [vmem:[#allocation7 + $0x3b8] sm:$0xff]  }
 0x830   : > { %v3840_v29 = vpack.c.bf16 %v8417_v1, %v8409_v60  ;;  %v3798_v5 = vrot.slane %v8417_v1, 7  ;;  %v3804_v35 = vsel %vm436_vm1, %v3800_v34, %v3797_v4  ;;  %v3810_v44 = vrot.slane %v8417_v1, 1 }
 0x831   : > { %v3805_v30 = vmul.f32 %v8065_v28, %v3804_v35  ;;  %v3801_v3 = vsel %vm436_vm1, %v3799_v6, %v3800_v34  ;;  %v3816_v32 = vsel %vm449_vm5, %v3812_v31, %v3809_v16  ;;  %v3813_v25 = vsel %vm449_vm5, %v3811_v2, %v3812_v31 }
 0x832   : > { %6892 = vmatprep.mubr.bf16.mxu0 %v3840_v29  ;;  %v3803_v13 = vsel %vm436_vm1, %v3797_v4, %v3798_v5  ;;  %v3802_v52 = vsel %vm436_vm1, %v3798_v5, %v3799_v6  ;;  %v3814_v14 = vsel %vm449_vm5, %v3810_v44, %v3811_v2  ;;  %v3815_v19 = vsel %vm449_vm5, %v3809_v16, %v3810_v44  ;;  %v7489_v4 = vld [vmem:[#allocation7 + $0x300] sm:$0xff]  }
 0x833   : > { %6893 = vmatmul.mubr.bf16.vlgmr.msra.gmra.mxu0 %v3841_v9  ;;  %v3821_v47 = vpack.c.bf16 %v3803_v13, %v3805_v30  ;;  %v3807_v15 = vmul.f32 %v8088_v43, %v3802_v52  ;;  %v3818_v22 = vmul.f32 %v8095_v46, %v3814_v14  ;;  %v3820_v33 = vmul.f32 %v8102_v49, %v3816_v32  ;;  %v8451_v52 = vld [vmem:[#allocation10] sm:$0xff] }
 0x834   : > { %6917 = vmatpush3.bf16.msra.mxu0 %v7464_v17  ;;  %v7469_v17 = vld [vmem:[#allocation5 + $0x398] sm:$0xff]  }
 0x835   : > { %6912 = vmatprep.mubr.bf16.mxu1 %v3821_v47  ;;  %6918 = vmatprep.subr.bf16.mxu0 %v7466_v10  ;;  %v3822_v18 = vpack.c.bf16 %v3801_v3, %v3807_v15  ;;  %v4053_v20 = vpack.c.bf16 %v3818_v22, %v3815_v19  ;;  %v4054_v53 = vpack.c.bf16 %v3820_v33, %v3813_v25 }
 0x836   : > { %v4176_v47 = vrot.slane %v8451_v52, %v1232_v8 }
 0x837   : > { %6913 = vmatmul.mubr.bf16.vlgmr.msra.gmra.mxu1 %v3822_v18  ;;  %6932 = vmatprep.mubr.bf16.mxu0 %v4053_v20 }
 0x838   : > { %6919 = vmatpush3.bf16.msra.mxu0 %v7466_v10  ;;  %6937 = vmatpush3.bf16.msra.mxu1 %v7473_v39 }
 0x839   : > { %6920 = vmatprep.subr.bf16.mxu0 %v7467_v0  ;;  %6938 = vmatprep.subr.bf16.mxu1 %v7474_v21 }
 0x83c   : > { %6921 = vmatpush3.bf16.msra.mxu0 %v7467_v0  ;;  %6939 = vmatpush3.bf16.msra.mxu1 %v7474_v21 }
 0x83d   : > { %6922 = vmatprep.subr.bf16.mxu0 %v7468_v23  ;;  %6940 = vmatprep.subr.bf16.mxu1 %v7476_v42 }
 0x840   : > { %6923 = vmatpush3.bf16.msra.mxu0 %v7468_v23  ;;  %6941 = vmatpush3.bf16.msra.mxu1 %v7476_v42 }
 0x841   : > { %6924 = vmatprep.subr.bf16.mxu0 %v7469_v17  ;;  %6942 = vmatprep.subr.bf16.mxu1 %v7478_v50 }
 0x844   : > { %6925 = vmatpush3.bf16.msra.mxu0 %v7469_v17  ;;  %6943 = vmatpush3.bf16.msra.mxu1 %v7478_v50 }
 0x845   : > { %6926 = vmatprep.subr.bf16.mxu0 %v7470_v24  ;;  %6944 = vmatprep.subr.bf16.mxu1 %v7480_v54 }
 0x848   : > { %6927 = vmatpush3.bf16.msra.mxu0 %v7470_v24  ;;  %6945 = vmatpush3.bf16.msra.mxu1 %v7480_v54  ;;  %v7490_v54 = vld [vmem:[#allocation7 + $0x3b0] sm:$0xff]  }
 0x849   : > { %6928 = vmatprep.subr.bf16.mxu0 %v7471_v26  ;;  %6946 = vmatprep.subr.bf16.mxu1 %v7482_v37 }
 0x84c   : > { %6929 = vmatpush3.bf16.msra.mxu0 %v7471_v26  ;;  %6947 = vmatpush3.bf16.msra.mxu1 %v7482_v37 }
 0x84d   : > { %6930 = vmatprep.subr.bf16.mxu0 %v7472_v36  ;;  %6948 = vmatprep.subr.bf16.mxu1 %v7484_v58 }
 0x850   : > { %6931 = vmatpush3.bf16.msra.mxu0 %v7472_v36  ;;  %6949 = vmatpush3.bf16.msra.mxu1 %v7484_v58 }
 0x851   : > { %6956 = vmatprep.subr.bf16.mxu0 %v7475_v40  ;;  %6950 = vmatprep.subr.bf16.mxu1 %v7486_v63 }
 0x853   : > { %6933 = vmatmul.mubr.bf16.vlgmr.msra.gmra.mxu0 %v4054_v53 }
 0x854   : > { %6957 = vmatpush3.bf16.msra.mxu0 %v7475_v40  ;;  %6951 = vmatpush3.bf16.msra.mxu1 %v7486_v63 }
 0x855   : > { %6958 = vmatprep.subr.bf16.mxu0 %v7477_v41  ;;  %6976 = vmatprep.subr.bf16.mxu1 %v7488_v38 }
 0x858   : > { %6959 = vmatpush3.bf16.msra.mxu0 %v7477_v41 }
 0x859   : > { %6960 = vmatprep.subr.bf16.mxu0 %v7479_v45 }
 0x85c   : > { %6961 = vmatpush3.bf16.msra.mxu0 %v7479_v45 }
 0x85d   : > { %6962 = vmatprep.subr.bf16.mxu0 %v7481_v55 }
 0x860   : > { %6963 = vmatpush3.bf16.msra.mxu0 %v7481_v55 }
 0x861   : > { %6964 = vmatprep.subr.bf16.mxu0 %v7483_v56 }
 0x864   : > { %6965 = vmatpush3.bf16.msra.mxu0 %v7483_v56 }
 0x865   : > { %6966 = vmatprep.subr.bf16.mxu0 %v7485_v59 }
 0x868   : > { %6967 = vmatpush3.bf16.msra.mxu0 %v7485_v59 }
 0x869   : > { %6968 = vmatprep.subr.bf16.mxu0 %v7487_v61 }
 0x86c   : > { %6969 = vmatpush3.bf16.msra.mxu0 %v7487_v61 }
 0x86d   : > { %6970 = vmatprep.subr.bf16.mxu0 %v7489_v4 }
 0x870   : > { %6971 = vmatpush3.bf16.msra.mxu0 %v7489_v4 }
 0x8f3   : > { %v6894_v34 = vpop.f32.mrf.mxu0 }
 0x8f5   : > { %v3941_v29 = vpop.f32.mrf.mxu0 }
 0x8f7   : > { %v6914_v5 = vpop.f32.mrf.mxu1  ;;  %v6895_v35 = vpop.f32.mrf.mxu0 }
 0x8f8   : > { %v4047_v30 = vadd.f32 %v6914_v5, %v6894_v34 }
 0x8f9   : > { %v4038_v6 = vpop.f32.mrf.mxu1  ;;  %v3944_v9 = vpop.f32.mrf.mxu0 }
 0x8fa   : > { %v4039_v2 = vadd.f32 %v4038_v6, %v3941_v29  ;;  %v7492_v6 = vld [vmem:[#allocation7 + $0x3a0] sm:$0xff]  }
 0x8fb   : > { %v6915_v10 = vpop.f32.mrf.mxu1 }
 0x8fc   : > { %v4050_v16 = vadd.f32 %v6915_v10, %v6895_v35  ;;  %v7491_v35 = vld [vmem:[#allocation7 + $0x3a8] sm:$0xff]  }
 0x8fd   : > { %v4041_v14 = vpop.f32.mrf.mxu1 }
 0x8fe   : > { %v4042_v20 = vadd.f32 %v4041_v14, %v3944_v9  ;;  %v7493_v9 = vld [vmem:[#allocation7 + $0x398] sm:$0xff]   ;;  %v7498_v14 = vld [vmem:[#allocation5 + $0x430] sm:$0xff]  }
 0x913   : > { %v6934_v44 = vpop.f32.mrf.mxu0 }
 0x914   : > { %v4171_v13 = vadd.f32 %v6934_v44, %v4047_v30  ;;  %v7495_v30 = vld [vmem:[#allocation7 + $0x388] sm:$0xff]   ;;  %v7496_v44 = vld [vmem:[#allocation7 + $0x380] sm:$0xff]  }
 0x915   : > { %v4154_v15 = vpop.f32.mrf.mxu0 }
 0x916   : > { %v4169_v3 = vadd.f32 %v4154_v15, %v4039_v2  ;;  %v4179_v18 = vadd.f32 %v4176_v47, %v4171_v13 }
 0x917   : > { %v6935_v22 = vpop.f32.mrf.mxu0 }
 0x918   : > { %v4177_v19 = vadd.f32 %v4176_v47, %v4169_v3  ;;  %v4172_v0 = vadd.f32 %v6935_v22, %v4050_v16  ;;  %v4183_v31 = vmax.f32 %v4179_v18, 0.0  ;;  %v7497_v16 = vld [vmem:[#allocation5 + $0x438] sm:$0xff]   ;;  %v7501_v22 = vld [vmem:[#allocation5 + $0x3f0] sm:$0xff]   ;;  %v7500_v18 = vld [vmem:[#allocation5 + $0x428] sm:$0xff]  }
 0x919   : > { %v4157_v23 = vpop.f32.mrf.mxu0  ;;  %v7499_v3 = vld [vmem:[#allocation5 + $0x3f8] sm:$0xff]   ;;  %6996 = vmatprep.subr.bf16.mxu0 %v7497_v16 }
 0x91a   : > { %v4181_v17 = vmax.f32 %v4177_v19, 0.0  ;;  %v4180_v24 = vadd.f32 %v4176_v47, %v4172_v0  ;;  %v4170_v26 = vadd.f32 %v4157_v23, %v4042_v20  ;;  %v4187_v8 = vrot.slane %v4183_v31, 7  ;;  %v7503_v19 = vld [vmem:[#allocation5 + $0x3e8] sm:$0xff]   ;;  %v7502_v0 = vld [vmem:[#allocation5 + $0x420] sm:$0xff]   ;;  %v7504_v20 = vld [vmem:[#allocation5 + $0x418] sm:$0xff]  }
 0x91b   : > { %v4199_v39 = vrot.slane %v4183_v31, 1  ;;  %v7505_v23 = vld [vmem:[#allocation5 + $0x3e0] sm:$0xff]  }
 0x91c   : > { %v4184_v36 = vmax.f32 %v4180_v24, 0.0  ;;  %v4178_v32 = vadd.f32 %v4176_v47, %v4170_v26  ;;  %v4185_v33 = vrot.slane %v4181_v17, 7  ;;  %v4197_v55 = vrot.slane %v4181_v17, 1  ;;  %v7507_v24 = vld [vmem:[#allocation5 + $0x3d8] sm:$0xff]   ;;  %v7508_v26 = vld [vmem:[#allocation5 + $0x408] sm:$0xff]  }
 0x91e   : > { %v4188_v25 = vrot.slane %v4184_v36, 7  ;;  %v4182_v53 = vmax.f32 %v4178_v32, 0.0  ;;  %v4229_v50 = vpack.c.bf16 %v4184_v36, %v4183_v31  ;;  %v4200_v10 = vrot.slane %v4184_v36, 1  ;;  %v7509_v31 = vld [vmem:[#allocation5 + $0x3d0] sm:$0xff]   ;;  %v7510_v36 = vld [vmem:[#allocation5 + $0x400] sm:$0xff]   ;;  %v7511_v32 = vld [vmem:[#allocation5 + $0x3c8] sm:$0xff]  }
 0x920   : > { %v4192_v21 = vsel %vm436_vm1, %v4188_v25, %v4185_v33  ;;  %v4186_v40 = vrot.slane %v4182_v53, 7  ;;  %v4198_v41 = vrot.slane %v4182_v53, 1  ;;  %v4228_v42 = vpack.c.bf16 %v4182_v53, %v4181_v17  ;;  %v7506_v17 = vld [vmem:[#allocation5 + $0x410] sm:$0xff]  }
 0x921   : > { %v4193_v45 = vmul.f32 %v8065_v28, %v4192_v21  ;;  %v4189_v4 = vsel %vm436_vm1, %v4187_v8, %v4188_v25  ;;  %v4204_v2 = vsel %vm449_vm5, %v4200_v10, %v4197_v55  ;;  %v4201_v47 = vsel %vm449_vm5, %v4199_v39, %v4200_v10  ;;  %v7513_v25 = vld [vmem:[#allocation5 + $0x3c0] sm:$0xff]  }
 0x922   : > { %6952 = vmatprep.mubr.bf16.mxu1 %v4228_v42  ;;  %v4191_v37 = vsel %vm436_vm1, %v4185_v33, %v4186_v40  ;;  %v4190_v56 = vsel %vm436_vm1, %v4186_v40, %v4187_v8  ;;  %v4202_v58 = vsel %vm449_vm5, %v4198_v41, %v4199_v39  ;;  %v4203_v34 = vsel %vm449_vm5, %v4197_v55, %v4198_v41  ;;  %v7512_v33 = vld [vmem:[#allocation5 + $0x478] sm:$0xff]  }
 0x923   : > { %6953 = vmatmul.mubr.bf16.vlgmr.msra.gmra.mxu1 %v4229_v50  ;;  %v4209_v59 = vpack.c.bf16 %v4191_v37, %v4193_v45  ;;  %v4195_v63 = vmul.f32 %v8088_v43, %v4190_v56  ;;  %v4206_v61 = vmul.f32 %v8095_v46, %v4202_v58  ;;  %v4208_v13 = vmul.f32 %v8102_v49, %v4204_v2  ;;  %v8476_v50 = vld [vmem:[#allocation10 + $0x8] sm:$0xff] }
 0x924   : > { %6977 = vmatpush3.bf16.msra.mxu1 %v7488_v38  ;;  %v7494_v38 = vld [vmem:[#allocation7 + $0x390] sm:$0xff]  }
 0x925   : > { %6972 = vmatprep.mubr.bf16.mxu0 %v4209_v59  ;;  %6978 = vmatprep.subr.bf16.mxu1 %v7490_v54  ;;  %v4210_v29 = vpack.c.bf16 %v4189_v4, %v4195_v63  ;;  %v4441_v5 = vpack.c.bf16 %v4206_v61, %v4203_v34  ;;  %v4442_v15 = vpack.c.bf16 %v4208_v13, %v4201_v47 }
 0x927   : > { %6973 = vmatmul.mubr.bf16.vlgmr.msra.gmra.mxu0 %v4210_v29  ;;  %6992 = vmatprep.mubr.bf16.mxu1 %v4441_v5 }
 0x928   : > { %6979 = vmatpush3.bf16.msra.mxu1 %v7490_v54  ;;  %6997 = vmatpush3.bf16.msra.mxu0 %v7497_v16  ;;  %v4564_v54 = vrot.slane %v8476_v50, %v2497_v11 }
 0x929   : > { %6980 = vmatprep.subr.bf16.mxu1 %v7491_v35  ;;  %6998 = vmatprep.subr.bf16.mxu0 %v7498_v14 }
 0x92c   : > { %6981 = vmatpush3.bf16.msra.mxu1 %v7491_v35  ;;  %6999 = vmatpush3.bf16.msra.mxu0 %v7498_v14 }
 0x92d   : > { %6982 = vmatprep.subr.bf16.mxu1 %v7492_v6  ;;  %7000 = vmatprep.subr.bf16.mxu0 %v7500_v18 }
 0x930   : > { %6983 = vmatpush3.bf16.msra.mxu1 %v7492_v6  ;;  %7001 = vmatpush3.bf16.msra.mxu0 %v7500_v18 }
 0x931   : > { %6984 = vmatprep.subr.bf16.mxu1 %v7493_v9  ;;  %7002 = vmatprep.subr.bf16.mxu0 %v7502_v0 }
 0x934   : > { %6985 = vmatpush3.bf16.msra.mxu1 %v7493_v9  ;;  %7003 = vmatpush3.bf16.msra.mxu0 %v7502_v0 }
 0x935   : > { %6986 = vmatprep.subr.bf16.mxu1 %v7494_v38  ;;  %7004 = vmatprep.subr.bf16.mxu0 %v7504_v20 }
 0x938   : > { %6987 = vmatpush3.bf16.msra.mxu1 %v7494_v38  ;;  %7005 = vmatpush3.bf16.msra.mxu0 %v7504_v20 }
 0x939   : > { %6988 = vmatprep.subr.bf16.mxu1 %v7495_v30  ;;  %7006 = vmatprep.subr.bf16.mxu0 %v7506_v17 }
 0x93c   : > { %6989 = vmatpush3.bf16.msra.mxu1 %v7495_v30  ;;  %7007 = vmatpush3.bf16.msra.mxu0 %v7506_v17 }
 0x93d   : > { %6990 = vmatprep.subr.bf16.mxu1 %v7496_v44  ;;  %7008 = vmatprep.subr.bf16.mxu0 %v7508_v26 }
 0x940   : > { %6991 = vmatpush3.bf16.msra.mxu1 %v7496_v44  ;;  %7009 = vmatpush3.bf16.msra.mxu0 %v7508_v26 }
 0x941   : > { %7016 = vmatprep.subr.bf16.mxu1 %v7499_v3  ;;  %7010 = vmatprep.subr.bf16.mxu0 %v7510_v36 }
 0x943   : > { %6993 = vmatmul.mubr.bf16.vlgmr.msra.gmra.mxu1 %v4442_v15 }
 0x944   : > { %7017 = vmatpush3.bf16.msra.mxu1 %v7499_v3  ;;  %7011 = vmatpush3.bf16.msra.mxu0 %v7510_v36 }
 0x945   : > { %7018 = vmatprep.subr.bf16.mxu1 %v7501_v22  ;;  %7036 = vmatprep.subr.bf16.mxu0 %v7512_v33 }
 0x948   : > { %7019 = vmatpush3.bf16.msra.mxu1 %v7501_v22 }
 0x949   : > { %7020 = vmatprep.subr.bf16.mxu1 %v7503_v19 }
 0x94c   : > { %7021 = vmatpush3.bf16.msra.mxu1 %v7503_v19  ;;  %v7514_v19 = vld [vmem:[#allocation5 + $0x470] sm:$0xff]  }
 0x94d   : > { %7022 = vmatprep.subr.bf16.mxu1 %v7505_v23 }
 0x950   : > { %7023 = vmatpush3.bf16.msra.mxu1 %v7505_v23 }
 0x951   : > { %7024 = vmatprep.subr.bf16.mxu1 %v7507_v24 }
 0x954   : > { %7025 = vmatpush3.bf16.msra.mxu1 %v7507_v24 }
 0x955   : > { %7026 = vmatprep.subr.bf16.mxu1 %v7509_v31 }
 0x958   : > { %7027 = vmatpush3.bf16.msra.mxu1 %v7509_v31 }
 0x959   : > { %7028 = vmatprep.subr.bf16.mxu1 %v7511_v32 }
 0x95c   : > { %7029 = vmatpush3.bf16.msra.mxu1 %v7511_v32 }
 0x95d   : > { %7030 = vmatprep.subr.bf16.mxu1 %v7513_v25 }
 0x960   : > { %7031 = vmatpush3.bf16.msra.mxu1 %v7513_v25 }
 0x9e3   : > { %v6954_v53 = vpop.f32.mrf.mxu1 }
 0x9e5   : > { %v4329_v8 = vpop.f32.mrf.mxu1 }
 0x9e7   : > { %v6974_v39 = vpop.f32.mrf.mxu0  ;;  %v6955_v21 = vpop.f32.mrf.mxu1 }
 0x9e8   : > { %v4435_v45 = vadd.f32 %v6974_v39, %v6954_v53  ;;  %v7515_v39 = vld [vmem:[#allocation5 + $0x468] sm:$0xff]  }
 0x9e9   : > { %v4426_v40 = vpop.f32.mrf.mxu0  ;;  %v4332_v41 = vpop.f32.mrf.mxu1 }
 0x9ea   : > { %v4427_v37 = vadd.f32 %v4426_v40, %v4329_v8  ;;  %v7516_v40 = vld [vmem:[#allocation5 + $0x460] sm:$0xff]  }
 0x9eb   : > { %v6975_v42 = vpop.f32.mrf.mxu0 }
 0x9ec   : > { %v4438_v63 = vadd.f32 %v6975_v42, %v6955_v21  ;;  %v7519_v42 = vld [vmem:[#allocation5 + $0x448] sm:$0xff]  }
 0x9ed   : > { %v4429_v58 = vpop.f32.mrf.mxu0 }
 0x9ee   : > { %v4430_v29 = vadd.f32 %v4429_v58, %v4332_v41  ;;  %v7518_v41 = vld [vmem:[#allocation5 + $0x450] sm:$0xff]  }
 0xa03   : > { %v6994_v55 = vpop.f32.mrf.mxu1 }
 0xa04   : > { %v4559_v56 = vadd.f32 %v6994_v55, %v4435_v45 }
 0xa05   : > { %v4542_v59 = vpop.f32.mrf.mxu1 }
 0xa06   : > { %v4567_v61 = vadd.f32 %v4564_v54, %v4559_v56  ;;  %v4557_v4 = vadd.f32 %v4542_v59, %v4427_v37  ;;  %v7521_v59 = vld [vmem:[#allocation7 + $0x438] sm:$0xff]  }
 0xa07   : > { %v6995_v34 = vpop.f32.mrf.mxu1  ;;  %7056 = vmatprep.subr.bf16.mxu1 %v7521_v59 }
 0xa08   : > { %v4565_v5 = vadd.f32 %v4564_v54, %v4557_v4  ;;  %v4560_v35 = vadd.f32 %v6995_v34, %v4438_v63  ;;  %v4571_v9 = vadd.f32 %v4567_v61, %v8412_v51  ;;  %v7522_v63 = vld [vmem:[#allocation7 + $0x430] sm:$0xff]   ;;  %v7523_v61 = vld [vmem:[#allocation7 + $0x3f8] sm:$0xff]   ;;  %v7524_v34 = vld [vmem:[#allocation7 + $0x428] sm:$0xff]  }
 0xa09   : > { %v4545_v6 = vpop.f32.mrf.mxu1  ;;  %v7525_v4 = vld [vmem:[#allocation7 + $0x3f0] sm:$0xff]  }
 0xa0a   : > { %v4569_v38 = vadd.f32 %v4565_v5, %v8409_v60  ;;  %v4568_v30 = vadd.f32 %v4564_v54, %v4560_v35  ;;  %v4558_v10 = vadd.f32 %v4545_v6, %v4430_v29  ;;  %v8486_v13 = vmax.f32 %v4571_v9, 0.0  ;;  %v7527_v29 = vld [vmem:[#allocation7 + $0x3e8] sm:$0xff]   ;;  %v7526_v5 = vld [vmem:[#allocation7 + $0x420] sm:$0xff]   ;;  %v7528_v35 = vld [vmem:[#allocation7 + $0x418] sm:$0xff]  }
 0xa0b   : > { %v7529_v6 = vld [vmem:[#allocation7 + $0x3e0] sm:$0xff]   ;;  %v7530_v9 = vld [vmem:[#allocation7 + $0x410] sm:$0xff]  }
 0xa0c   : > { %v8483_v11 = vmax.f32 %v4569_v38, 0.0  ;;  %v4572_v44 = vadd.f32 %v4568_v30, %v8414_v62  ;;  %v4566_v2 = vadd.f32 %v4564_v54, %v4558_v10  ;;  %v4579_v22 = vrot.slane %v8486_v13, 7  ;;  %v7520_v54 = vld [vmem:[#allocation5 + $0x440] sm:$0xff]   ;;  %v7531_v38 = vld [vmem:[#allocation7 + $0x3d8] sm:$0xff]   ;;  %v7532_v30 = vld [vmem:[#allocation7 + $0x408] sm:$0xff]  }
 0xa0d   : > { %v4591_v20 = vrot.slane %v8486_v13, 1  ;;  %v7533_v10 = vld [vmem:[#allocation7 + $0x3d0] sm:$0xff]  }
 0xa0e   : > { %v8488_v47 = vmax.f32 %v4572_v44, 0.0  ;;  %v4570_v15 = vadd.f32 %v4566_v2, %v8417_v1  ;;  %v4577_v14 = vrot.slane %v8483_v11, 7  ;;  %v4589_v31 = vrot.slane %v8483_v11, 1  ;;  %v7534_v44 = vld [vmem:[#allocation7 + $0x400] sm:$0xff]   ;;  %v7535_v2 = vld [vmem:[#allocation7 + $0x3c8] sm:$0xff]  }
 0xa10   : > { %v8491_v16 = vmax.f32 %v4570_v15, 0.0  ;;  %v4580_v51 = vrot.slane %v8488_v47, 7  ;;  %v4621_v18 = vpack.c.bf16 %v8488_v47, %v8486_v13  ;;  %v4592_v45 = vrot.slane %v8488_v47, 1  ;;  %v7536_v15 = vld [vmem:[#allocation7 + $0x478] sm:$0xff]  }
 0xa12   : > { %v4620_v60 = vpack.c.bf16 %v8491_v16, %v8483_v11  ;;  %v4578_v3 = vrot.slane %v8491_v16, 7  ;;  %v4584_v62 = vsel %vm436_vm1, %v4580_v51, %v4577_v14  ;;  %v4590_v0 = vrot.slane %v8491_v16, 1 }
 0xa13   : > { %v4585_v1 = vmul.f32 %v8065_v28, %v4584_v62  ;;  %v4581_v32 = vsel %vm436_vm1, %v4579_v22, %v4580_v51  ;;  %v4596_v55 = vsel %vm449_vm5, %v4592_v45, %v4589_v31  ;;  %v4593_v56 = vsel %vm449_vm5, %v4591_v20, %v4592_v45 }
 0xa14   : > { %7012 = vmatprep.mubr.bf16.mxu0 %v4620_v60  ;;  %v4583_v23 = vsel %vm436_vm1, %v4577_v14, %v4578_v3  ;;  %v4582_v17 = vsel %vm436_vm1, %v4578_v3, %v4579_v22  ;;  %v4594_v36 = vsel %vm449_vm5, %v4590_v0, %v4591_v20  ;;  %v4595_v8 = vsel %vm449_vm5, %v4589_v31, %v4590_v0  ;;  %v7537_v14 = vld [vmem:[#allocation7 + $0x3c0] sm:$0xff]  }
 0xa15   : > { %7013 = vmatmul.mubr.bf16.vlgmr.msra.gmra.mxu0 %v4621_v18  ;;  %v4601_v24 = vpack.c.bf16 %v4583_v23, %v4585_v1  ;;  %v4587_v26 = vmul.f32 %v8088_v43, %v4582_v17  ;;  %v4598_v25 = vmul.f32 %v8095_v46, %v4594_v36  ;;  %v4600_v37 = vmul.f32 %v8102_v49, %v4596_v55 }
 0xa16   : > { %7037 = vmatpush3.bf16.msra.mxu0 %v7512_v33  ;;  %v7517_v33 = vld [vmem:[#allocation5 + $0x458] sm:$0xff]   ;;  %v4956_v17 = vrot.slane %v8451_v52, %v2910_v57 }
 0xa17   : > { %7032 = vmatprep.mubr.bf16.mxu1 %v4601_v24  ;;  %7038 = vmatprep.subr.bf16.mxu0 %v7514_v19  ;;  %v4602_v53 = vpack.c.bf16 %v4581_v32, %v4587_v26  ;;  %v4833_v21 = vpack.c.bf16 %v4598_v25, %v4595_v8  ;;  %v4834_v58 = vpack.c.bf16 %v4600_v37, %v4593_v56 }
 0xa19   : > { %7033 = vmatmul.mubr.bf16.vlgmr.msra.gmra.mxu1 %v4602_v53  ;;  %7052 = vmatprep.mubr.bf16.mxu0 %v4833_v21 }
 0xa1a   : > { %7039 = vmatpush3.bf16.msra.mxu0 %v7514_v19  ;;  %7057 = vmatpush3.bf16.msra.mxu1 %v7521_v59 }
 0xa1b   : > { %7040 = vmatprep.subr.bf16.mxu0 %v7515_v39  ;;  %7058 = vmatprep.subr.bf16.mxu1 %v7522_v63 }
 0xa1e   : > { %7041 = vmatpush3.bf16.msra.mxu0 %v7515_v39  ;;  %7059 = vmatpush3.bf16.msra.mxu1 %v7522_v63 }
 0xa1f   : > { %7042 = vmatprep.subr.bf16.mxu0 %v7516_v40  ;;  %7060 = vmatprep.subr.bf16.mxu1 %v7524_v34 }
 0xa22   : > { %7043 = vmatpush3.bf16.msra.mxu0 %v7516_v40  ;;  %7061 = vmatpush3.bf16.msra.mxu1 %v7524_v34 }
 0xa23   : > { %7044 = vmatprep.subr.bf16.mxu0 %v7517_v33  ;;  %7062 = vmatprep.subr.bf16.mxu1 %v7526_v5 }
 0xa26   : > { %7045 = vmatpush3.bf16.msra.mxu0 %v7517_v33  ;;  %7063 = vmatpush3.bf16.msra.mxu1 %v7526_v5 }
 0xa27   : > { %7046 = vmatprep.subr.bf16.mxu0 %v7518_v41  ;;  %7064 = vmatprep.subr.bf16.mxu1 %v7528_v35 }
 0xa2a   : > { %7047 = vmatpush3.bf16.msra.mxu0 %v7518_v41  ;;  %7065 = vmatpush3.bf16.msra.mxu1 %v7528_v35 }
 0xa2b   : > { %7048 = vmatprep.subr.bf16.mxu0 %v7519_v42  ;;  %7066 = vmatprep.subr.bf16.mxu1 %v7530_v9 }
 0xa2e   : > { %7049 = vmatpush3.bf16.msra.mxu0 %v7519_v42  ;;  %7067 = vmatpush3.bf16.msra.mxu1 %v7530_v9 }
 0xa2f   : > { %7050 = vmatprep.subr.bf16.mxu0 %v7520_v54  ;;  %7068 = vmatprep.subr.bf16.mxu1 %v7532_v30 }
 0xa32   : > { %7051 = vmatpush3.bf16.msra.mxu0 %v7520_v54  ;;  %7069 = vmatpush3.bf16.msra.mxu1 %v7532_v30 }
 0xa33   : > { %7076 = vmatprep.subr.bf16.mxu0 %v7523_v61  ;;  %7070 = vmatprep.subr.bf16.mxu1 %v7534_v44 }
 0xa35   : > { %7053 = vmatmul.mubr.bf16.vlgmr.msra.gmra.mxu0 %v4834_v58 }
 0xa36   : > { %7077 = vmatpush3.bf16.msra.mxu0 %v7523_v61  ;;  %7071 = vmatpush3.bf16.msra.mxu1 %v7534_v44 }
 0xa37   : > { %7078 = vmatprep.subr.bf16.mxu0 %v7525_v4  ;;  %7096 = vmatprep.subr.bf16.mxu1 %v7536_v15 }
 0xa3a   : > { %7079 = vmatpush3.bf16.msra.mxu0 %v7525_v4 }
 0xa3b   : > { %7080 = vmatprep.subr.bf16.mxu0 %v7527_v29 }
 0xa3e   : > { %7081 = vmatpush3.bf16.msra.mxu0 %v7527_v29  ;;  %v7538_v29 = vld [vmem:[#allocation7 + $0x470] sm:$0xff]  }
 0xa3f   : > { %7082 = vmatprep.subr.bf16.mxu0 %v7529_v6 }
 0xa42   : > { %7083 = vmatpush3.bf16.msra.mxu0 %v7529_v6 }
 0xa43   : > { %7084 = vmatprep.subr.bf16.mxu0 %v7531_v38 }
 0xa46   : > { %7085 = vmatpush3.bf16.msra.mxu0 %v7531_v38 }
 0xa47   : > { %7086 = vmatprep.subr.bf16.mxu0 %v7533_v10 }
 0xa4a   : > { %7087 = vmatpush3.bf16.msra.mxu0 %v7533_v10 }
 0xa4b   : > { %7088 = vmatprep.subr.bf16.mxu0 %v7535_v2 }
 0xa4e   : > { %7089 = vmatpush3.bf16.msra.mxu0 %v7535_v2 }
 0xa4f   : > { %7090 = vmatprep.subr.bf16.mxu0 %v7537_v14 }
 0xa52   : > { %7091 = vmatpush3.bf16.msra.mxu0 %v7537_v14 }
 0xa53   : > { %7116 = vmatprep.subr.bf16.mxu0 %v7805_v27 }
 0xad5   : > { %v7014_v51 = vpop.f32.mrf.mxu0 }
 0xad7   : > { %v4721_v60 = vpop.f32.mrf.mxu0 }
 0xad9   : > { %v7034_v3 = vpop.f32.mrf.mxu1  ;;  %v7015_v62 = vpop.f32.mrf.mxu0 }
 0xada   : > { %v4827_v1 = vadd.f32 %v7034_v3, %v7014_v51  ;;  %v7539_v51 = vld [vmem:[#allocation7 + $0x468] sm:$0xff]  }
 0xadb   : > { %v4818_v22 = vpop.f32.mrf.mxu1  ;;  %v4724_v18 = vpop.f32.mrf.mxu0 }
 0xadc   : > { %v4819_v20 = vadd.f32 %v4818_v22, %v4721_v60  ;;  %v7540_v60 = vld [vmem:[#allocation7 + $0x460] sm:$0xff]  }
 0xadd   : > { %v7035_v19 = vpop.f32.mrf.mxu1 }
 0xade   : > { %v4830_v26 = vadd.f32 %v7035_v19, %v7015_v62  ;;  %v7544_v62 = vld [vmem:[#allocation7 + $0x440] sm:$0xff]  }
 0xadf   : > { %v4821_v31 = vpop.f32.mrf.mxu1 }
 0xae0   : > { %v4822_v39 = vadd.f32 %v4821_v31, %v4724_v18  ;;  %v7552_v31 = vld [vmem:[#allocation11] sm:$0xff]  }
 0xaf5   : > { %v7054_v0 = vpop.f32.mrf.mxu0 }
 0xaf6   : > { %v4951_v23 = vadd.f32 %v7054_v0, %v4827_v1  ;;  %v7545_v0 = vld [vmem:[#allocation11 + $0x38] sm:$0xff]  }
 0xaf7   : > { %v4934_v24 = vpop.f32.mrf.mxu0 }
 0xaf8   : > { %v4949_v36 = vadd.f32 %v4934_v24, %v4819_v20  ;;  %v4959_v25 = vadd.f32 %v4956_v17, %v4951_v23  ;;  %v7546_v20 = vld [vmem:[#allocation11 + $0x30] sm:$0xff]   ;;  %v7547_v23 = vld [vmem:[#allocation11 + $0x28] sm:$0xff]  }
 0xaf9   : > { %v7055_v32 = vpop.f32.mrf.mxu0  ;;  %v7550_v24 = vld [vmem:[#allocation11 + $0x10] sm:$0xff]  }
 0xafa   : > { %v4957_v53 = vadd.f32 %v4956_v17, %v4949_v36  ;;  %v4952_v8 = vadd.f32 %v7055_v32, %v4830_v26  ;;  %v4963_v42 = vmax.f32 %v4959_v25, 0.0  ;;  %v7551_v26 = vld [vmem:[#allocation11 + $0x8] sm:$0xff]  }
 0xafb   : > { %v4937_v21 = vpop.f32.mrf.mxu0 }
 0xafc   : > { %v4961_v40 = vmax.f32 %v4957_v53, 0.0  ;;  %v4960_v33 = vadd.f32 %v4956_v17, %v4952_v8  ;;  %v4950_v41 = vadd.f32 %v4937_v21, %v4822_v39  ;;  %v4967_v57 = vrot.slane %v4963_v42, 7 }
 0xafd   : > { %v4979_v52 = vrot.slane %v4963_v42, 1 }
 0xafe   : > { %v4964_v45 = vmax.f32 %v4960_v33, 0.0  ;;  %v4958_v54 = vadd.f32 %v4956_v17, %v4950_v41  ;;  %v4965_v55 = vrot.slane %v4961_v40, 7  ;;  %v4977_v5 = vrot.slane %v4961_v40, 1  ;;  %v7548_v17 = vld [vmem:[#allocation11 + $0x20] sm:$0xff]  }
 0xaff   : > { %v5344_v33 = vrot.slane %v8476_v50, %v3395_v48 }
 0xb00   : > { %v4968_v37 = vrot.slane %v4964_v45, 7  ;;  %v4962_v56 = vmax.f32 %v4958_v54, 0.0  ;;  %v5009_v34 = vpack.c.bf16 %v4964_v45, %v4963_v42  ;;  %v4980_v3 = vrot.slane %v4964_v45, 1 }
 0xb02   : > { %v4972_v58 = vsel %vm436_vm1, %v4968_v37, %v4965_v55  ;;  %v4966_v59 = vrot.slane %v4962_v56, 7  ;;  %v4978_v63 = vrot.slane %v4962_v56, 1  ;;  %v5008_v61 = vpack.c.bf16 %v4962_v56, %v4961_v40 }
 0xb03   : > { %v4973_v4 = vmul.f32 %v8065_v28, %v4972_v58  ;;  %v4969_v28 = vsel %vm436_vm1, %v4967_v57, %v4968_v37  ;;  %v4984_v22 = vsel %vm449_vm5, %v4980_v3, %v4977_v5  ;;  %v4981_v1 = vsel %vm449_vm5, %v4979_v52, %v4980_v3 }
 0xb04   : > { %7072 = vmatprep.mubr.bf16.mxu1 %v5008_v61  ;;  %v4971_v35 = vsel %vm436_vm1, %v4965_v55, %v4966_v59  ;;  %v4970_v6 = vsel %vm436_vm1, %v4966_v59, %v4967_v57  ;;  %v4982_v9 = vsel %vm449_vm5, %v4978_v63, %v4979_v52  ;;  %v4983_v44 = vsel %vm449_vm5, %v4977_v5, %v4978_v63 }
 0xb05   : > { %7073 = vmatmul.mubr.bf16.vlgmr.msra.gmra.mxu1 %v5009_v34  ;;  %v4989_v38 = vpack.c.bf16 %v4971_v35, %v4973_v4  ;;  %v4975_v30 = vmul.f32 %v8088_v43, %v4970_v6  ;;  %v4986_v10 = vmul.f32 %v8095_v46, %v4982_v9  ;;  %v7541_v43 = vld [vmem:[#allocation7 + $0x458] sm:$0xff]   ;;  %v7542_v46 = vld [vmem:[#allocation7 + $0x450] sm:$0xff]   ;;  %v4988_v18 = vmul.f32 %v8102_v49, %v4984_v22  ;;  %v7549_v49 = vld [vmem:[#allocation11 + $0x18] sm:$0xff]  }
 0xb06   : > { %7097 = vmatpush3.bf16.msra.mxu1 %v7536_v15  ;;  %v7543_v15 = vld [vmem:[#allocation7 + $0x448] sm:$0xff]  }
 0xb07   : > { %7092 = vmatprep.mubr.bf16.mxu0 %v4989_v38  ;;  %7098 = vmatprep.subr.bf16.mxu1 %v7538_v29  ;;  %v4990_v2 = vpack.c.bf16 %v4969_v28, %v4975_v30  ;;  %v5221_v14 = vpack.c.bf16 %v4986_v10, %v4983_v44  ;;  %v5222_v19 = vpack.c.bf16 %v4988_v18, %v4981_v1 }
 0xb09   : > { %7093 = vmatmul.mubr.bf16.vlgmr.msra.gmra.mxu0 %v4990_v2  ;;  %7112 = vmatprep.mubr.bf16.mxu1 %v5221_v14 }
 0xb0a   : > { %7099 = vmatpush3.bf16.msra.mxu1 %v7538_v29  ;;  %7117 = vmatpush3.bf16.msra.mxu0 %v7545_v0 }
 0xb0b   : > { %7100 = vmatprep.subr.bf16.mxu1 %v7539_v51  ;;  %7118 = vmatprep.subr.bf16.mxu0 %v7805_v27 }
 0xb0c   : > { %7132 = vmatprep.mubr.msk.bf16.mxu0 %vm7806_vm6, %v7805_v27 }
 0xb0e   : > { %7101 = vmatpush3.bf16.msra.mxu1 %v7539_v51  ;;  %7119 = vmatpush3.bf16.msra.mxu0 %v7546_v20 }
 0xb0f   : > { %7102 = vmatprep.subr.bf16.mxu1 %v7540_v60  ;;  %7120 = vmatprep.subr.bf16.mxu0 %v7805_v27 }
 0xb12   : > { %7103 = vmatpush3.bf16.msra.mxu1 %v7540_v60  ;;  %7121 = vmatpush3.bf16.msra.mxu0 %v7547_v23  ;;  %v5395_v23 = vrot.slane %v8476_v50, %v1208_v12 }
 0xb13   : > { %7104 = vmatprep.subr.bf16.mxu1 %v7541_v43  ;;  %7122 = vmatprep.subr.bf16.mxu0 %v7805_v27 }
 0xb16   : > { %7105 = vmatpush3.bf16.msra.mxu1 %v7541_v43  ;;  %7123 = vmatpush3.bf16.msra.mxu0 %v7548_v17 }
 0xb17   : > { %7106 = vmatprep.subr.bf16.mxu1 %v7542_v46  ;;  %7124 = vmatprep.subr.bf16.mxu0 %v7805_v27 }
 0xb1a   : > { %7107 = vmatpush3.bf16.msra.mxu1 %v7542_v46  ;;  %7125 = vmatpush3.bf16.msra.mxu0 %v7549_v49 }
 0xb1b   : > { %7108 = vmatprep.subr.bf16.mxu1 %v7543_v15  ;;  %7126 = vmatprep.subr.bf16.mxu0 %v7805_v27 }
 0xb1e   : > { %7109 = vmatpush3.bf16.msra.mxu1 %v7543_v15  ;;  %7127 = vmatpush3.bf16.msra.mxu0 %v7550_v24 }
 0xb1f   : > { %7110 = vmatprep.subr.bf16.mxu1 %v7544_v62  ;;  %7128 = vmatprep.subr.bf16.mxu0 %v7805_v27 }
 0xb22   : > { %7111 = vmatpush3.bf16.msra.mxu1 %v7544_v62  ;;  %7129 = vmatpush3.bf16.msra.mxu0 %v7551_v26 }
 0xb23   : > { %7130 = vmatprep.subr.bf16.mxu0 %v7805_v27 }
 0xb25   : > { %7113 = vmatmul.mubr.bf16.vlgmr.msra.gmra.mxu1 %v5222_v19 }
 0xb26   : > { %7131 = vmatpush3.bf16.msra.mxu0 %v7552_v31 }
 0xbc5   : > { %v7074_v36 = vpop.f32.mrf.mxu1 }
 0xbc7   : > { %v5109_v32 = vpop.f32.mrf.mxu1 }
 0xbc9   : > { %v7094_v25 = vpop.f32.mrf.mxu0  ;;  %v7075_v53 = vpop.f32.mrf.mxu1 }
 0xbca   : > { %v5215_v40 = vadd.f32 %v7094_v25, %v7074_v36 }
 0xbcb   : > { %v5206_v8 = vpop.f32.mrf.mxu0  ;;  %v5112_v39 = vpop.f32.mrf.mxu1 }
 0xbcc   : > { %v5207_v42 = vadd.f32 %v5206_v8, %v5109_v32 }
 0xbcd   : > { %v7095_v21 = vpop.f32.mrf.mxu0 }
 0xbce   : > { %v5218_v37 = vadd.f32 %v7095_v21, %v7075_v53 }
 0xbcf   : > { %v5209_v54 = vpop.f32.mrf.mxu0 }
 0xbd0   : > { %v5210_v52 = vadd.f32 %v5209_v54, %v5112_v39 }
 0xbe5   : > { %v7114_v41 = vpop.f32.mrf.mxu1 }
 0xbe6   : > { %v5339_v45 = vadd.f32 %v7114_v41, %v5215_v40 }
 0xbe7   : > { %v5322_v55 = vpop.f32.mrf.mxu1 }
 0xbe8   : > { %v5347_v27 = vadd.f32 %v5344_v33, %v5339_v45  ;;  %v5337_v56 = vadd.f32 %v5322_v55, %v5207_v42 }
 0xbe9   : > { %v7115_v57 = vpop.f32.mrf.mxu1 }
 0xbea   : > { %v5345_v58 = vadd.f32 %v5344_v33, %v5337_v56  ;;  %v5340_v59 = vadd.f32 %v7115_v57, %v5218_v37  ;;  %v5351_v61 = vadd.f32 %v5347_v27, %v8486_v13 }
 0xbeb   : > { %v5325_v63 = vpop.f32.mrf.mxu1 }
 0xbec   : > { %v5348_v4 = vadd.f32 %v5344_v33, %v5340_v59  ;;  %v5338_v34 = vadd.f32 %v5325_v63, %v5210_v52  ;;  %v5349_v29 = vadd.f32 %v5345_v58, %v8483_v11  ;;  %v5355_v35 = vmax.f32 %v5351_v61, 0.0 }
 0xbee   : > { %v5352_v48 = vadd.f32 %v5348_v4, %v8488_v47  ;;  %v5346_v5 = vadd.f32 %v5344_v33, %v5338_v34  ;;  %v5353_v38 = vmax.f32 %v5349_v29, 0.0 }
 0xbf0   : > { %v5356_v6 = vmax.f32 %v5352_v48, 0.0  ;;  %v5350_v9 = vadd.f32 %v5346_v5, %v8491_v16 }
 0xbf2   : > { %v5364_v30 = vadd.f32 %v5356_v6, %v5355_v35  ;;  %v5354_v10 = vmax.f32 %v5350_v9, 0.0 }
 0xbf4   : > { %v5365_v28 = vrot.slane %v5364_v30, 4  ;;  %v5357_v44 = vadd.f32 %v5354_v10, %v5353_v38 }
 0xbf6   : > { %v5366_v2 = vadd.f32 %v5365_v28, %v5364_v30  ;;  %v5358_v14 = vrot.slane %v5357_v44, 4 }
 0xbf8   : > { %v5367_v51 = vrot.slane %v5366_v2, 2  ;;  %v5359_v13 = vadd.f32 %v5358_v14, %v5357_v44 }
 0xbfa   : > { %v5368_v60 = vadd.f32 %v5367_v51, %v5366_v2  ;;  %v5360_v43 = vrot.slane %v5359_v13, 2 }
 0xbfc   : > { %v5369_v11 = vrot.slane %v5368_v60, 1  ;;  %v5361_v46 = vadd.f32 %v5360_v43, %v5359_v13 }
 0xbfe   : > { %v5370_v47 = vadd.f32 %v5369_v11, %v5368_v60  ;;  %v5362_v15 = vrot.slane %v5361_v46, 1 }
 0xc00   : > { %v5363_v3 = vadd.f32 %v5362_v15, %v5361_v46  ;;  %v5373_v62 = vmul.f32 0.0625, %v5370_v47 }
 0xc02   : > { %v5372_v16 = vmul.f32 0.0625, %v5363_v3  ;;  %v5375_v22 = vpack.c.bf16 %v5373_v62, %v5373_v62 }
 0xc04   : > { %v5374_v18 = vpack.c.bf16 %v5372_v16, %v5372_v16  ;;  %v5399_v19 = vunpack.c.l.b16 %v5375_v22 }
 0xc06   : > { %v5398_v1 = vunpack.c.l.b16 %v5374_v18 }
 0xc08   : > { %v5401_v0 = vsel %vm5400_vm7, %v5399_v19, %v5398_v1 }
 0xc09   : > { %v5402_v20 = vpack.c.b16 %v5401_v0, %v5401_v0 }
 0xc0b   : > { %7133 = vmatmul.mubr.bf16.vlgmr.msra.gmra.mxu0 %v5402_v20 }
 0xccb   : > { %v5486_v17 = vpop.f32.mrf.mxu0 }
 0xccc   : > { %v5487_v49 = vadd.f32 %v5486_v17, %v5395_v23 }
 0xccd   : > { %v7134_v24 = vpop.f32.mrf.mxu0 }
 0xcce   : > { %5492 = vst [vmem:[%s342_s17] sm:$0x3] %v5487_v49 }
 0xccf   : > { %v5489_v7 = vpop.f32.mrf.mxu0 }
 0xcd0   : > { %7730 = shalt.err (!%p7727_p3)
}
 0xcd1   : > { %s7731_s13 = scalar_lea.hbm %s8572_s18, 32  ;;  %s7735_s16 = scalar_lea.hbm %s8621_s6, 64 }
 0xcd2   : > { %p7732_p4 = scmp.ne.s32.totalorder %s8572_s18, %s7731_s13  ;;  %p7736_p2 = scmp.lt.s32.totalorder %s8572_s18, %s8621_s6 }
 0xcd3   : > { %p7737_p7 = scmp.lt.s32.totalorder %s7735_s16, %s7731_s13 }
 0xcd4   : > { %p7733_p12 = pnand %p7732_p4, %p8653_p11 }
 0xcd5   : > { %p7738_p8 = por %p7737_p7, %p7736_p2 }
 0xcd6   : > { %p7734_p6 = pneg %p7733_p12 }
 0xcd8   : > { %p7739_p10 = pnand %p7738_p8, %p7734_p6 }
 0xcda   : > { %7742 = shalt.err (!%p7739_p10)
}
 0xcdb   : > { %7158 = dma.vmem_to_hbm [thread:$0]  (%p8653_p11), %s8574_s19, 32, %s8572_s18, %s5494_s8   ;;  %v7135_v12 = vpop.f32.mrf.mxu0 }
 0xcdc PF: > { %s5519_s17 = sand.u32 1, %s7781_s21   ;;  %p8654_p13 = scmp.ne.s32.totalorder %s8633_s11, 0 }
 0xcdd   : > { %p8655_p0 = scmp.ge.s32.totalorder %s7793_s24, 2  ;;  %s5520_s7 = scalar_lea.sflag [#allocation4], %s5519_s17 }
 0xcdf   : > { %p7181_p5 = pnand %p8655_p0, %p8654_p13 }
 0xce1   : > { %p7182_p9 = pneg %p7181_p5 }
 0xce3   : > { %7776 = dma.done.wait (%p7182_p9), %s5520_s7, 32  }
 0xce4   : > { %7778 = vsyncadd (%p7182_p9), %s5520_s7, 4294967264  ;;  %p22_p1 = scmp.ge.s32.totalorder %s7951_s10, 4   ;;  %s8656_s21 = smov %s7785_s22 }
 0xce5   : > { %s8657_s22 = smov %s7789_s23  ;;  %s8658_s23 = smov %s7963_s26 }
 0xce6   : > { %s8659_s24 = smov %s7951_s10  ;;  %24 = sbr.rel (!%p22_p1) target bundleno = 8 (0x8), region = 144 }
 0xceb   :  { %5525 = vsyncpa [#allocation3], 1 }
 0xcec   :  { %5527 = vsyncpa [#allocation3 + $0x1], 1 }
 0xced   :  { %5528 = vsyncpa [#allocation6], 1 }
 0xcee   :  { %5529 = vsyncpa [#allocation9], 1 }
 0xcef   :  { %5530 = vsyncpa [#allocation12], 1 }
 0xcf0   :  { %5531 = vsyncpa [#allocation4], 1 }
 0xcf1   :  { %5533 = vsyncpa [#allocation4 + $0x1], 1 }

</bundles_post_ra>
